<compile_context>
chip_gen: v6e
topology: v6e:2x2x1
jax: 0.10.0
libtpu: 0.0.40
codegen_flags: <defaults>
</compile_context>

<pallas_src>
import jax
import jax.numpy as jnp
from jax.experimental import pallas as pl
from jax.experimental.pallas import tpu as pltpu

_LANE = 1024                                # lane-dense last dim (multiple of 128)
_TARGET_OUT_BLOCK_BYTES = 6 * 1024 * 1024   # ~6 MiB f32 output per block
_MIN_BLOCK_ROWS = 256                       # 1 MiB f32 output; floor when splitting for 2 TCs
_VMEM_BUDGET = 48 * 1024 * 1024             # 2x(in+out) double-buffered stays under this
_SMALL_FALLBACK_ELEMS = 64 * 1024           # < 256 KiB f32 output -> plain XLA convert


def _round_up(a: int, m: int) -> int:
    return (a + m - 1) // m * m


def _to_float_kernel(x_ref, o_ref):
    # Elementwise cast of the whole VMEM tile to float32 (VPU only).
    o_ref[...] = x_ref[...].astype(jnp.float32)


def to_float(x):
    """Pallas equivalent of PyTorch `x.float()` (cast to float32), any shape."""
    if x.dtype == jnp.float32:
        return x                                   # no-op fast path
    n = int(x.size)
    # Tiny tensors (and bool, which has no useful vector layout here): a plain
    # XLA convert fuses with neighbors and beats a standalone pallas_call.
    if n == 0 or n < _SMALL_FALLBACK_ELEMS or x.dtype == jnp.bool_:
        return x.astype(jnp.float32)

    orig_shape = x.shape
    itemsize = jnp.dtype(x.dtype).itemsize

    # Lane-dense (rows, 1024) slab. Pad ONLY the <1024-element lane tail; the
    # row dimension is left ragged and the partial last block is clipped by
    # Pallas (no row padding, no extra full-tensor copies).
    flat = x.reshape(-1)
    lane_rem = n % _LANE
    if lane_rem:
        flat = jnp.pad(flat, (0, _LANE - lane_rem))
    rows = flat.size // _LANE
    x2d = flat.reshape(rows, _LANE)

    # --- block sizing (dtype- and generation-aware) --------------------------
    bytes_per_row = _LANE * (itemsize + 4)          # input + output bytes per row
    max_rows_vmem = max(32, (_VMEM_BUDGET // (2 * bytes_per_row)) // 32 * 32)
    target_rows = max(32, (_TARGET_OUT_BLOCK_BYTES // (_LANE * 4)) // 32 * 32)
    block_rows = min(target_rows, max_rows_vmem, _round_up(rows, 32))
    if rows >= 2 * _MIN_BLOCK_ROWS:
        # Ensure >= 2 grid steps so ("parallel",) can shard across both v7x TCs.
        block_rows = min(block_rows,
                         max(_MIN_BLOCK_ROWS, _round_up(pl.cdiv(rows, 2), 32)))
    grid = (pl.cdiv(rows, block_rows),)             # ragged last block handled by Pallas

    out2d = pl.pallas_call(
        _to_float_kernel,
        out_shape=jax.ShapeDtypeStruct((rows, _LANE), jnp.float32),
        grid_spec=pltpu.PrefetchScalarGridSpec(
            num_scalar_prefetch=0,
            grid=grid,
            in_specs=[pl.BlockSpec((block_rows, _LANE), lambda i: (i, 0))],
            out_specs=pl.BlockSpec((block_rows, _LANE), lambda i: (i, 0)),
        ),
        compiler_params=pltpu.CompilerParams(
            dimension_semantics=("parallel",),
            vmem_limit_bytes=_VMEM_BUDGET,
            # Let XLA fold the (tiny) lane-tail pad / reshape into the input.
            allow_input_fusion=[True],
        ),
        cost_estimate=pl.CostEstimate(
            flops=0,
            transcendentals=0,
            bytes_accessed=n * (itemsize + 4),      # actual traffic, not padded
        ),
    )(x2d)

    out_flat = out2d.reshape(-1)
    if lane_rem:
        out_flat = out_flat[:n]
    return out_flat.reshape(orig_shape)


if __name__ == "__main__":
    key = jax.random.PRNGKey(0)
    k1, k2, k3 = jax.random.split(key, 3)

    # 1) Small NCHW input (matches the autoencoder preprocess usage): hits the
    #    small-tensor fallback path (plain XLA convert).
    x_small = jax.random.randint(k1, (2, 4, 16, 16), minval=-128, maxval=128,
                                 dtype=jnp.int32)
    y_small = to_float(x_small)
    jax.block_until_ready(y_small)
    assert y_small.dtype == jnp.float32
    assert y_small.shape == x_small.shape
    assert bool(jnp.all(y_small == x_small.astype(jnp.float32)))

    # 2) uint8 input, size divides cleanly, big enough for a 2-step parallel
    #    grid -> exercises the multi-block pipelined Pallas path.
    x_u8 = jax.random.randint(k2, (8, 8, 128, 128), minval=0, maxval=256,
                              dtype=jnp.int32).astype(jnp.uint8)
    y_u8 = to_float(x_u8)
    jax.block_until_ready(y_u8)
    assert y_u8.dtype == jnp.float32
    assert y_u8.shape == x_u8.shape
    assert bool(jnp.all(y_u8 == x_u8.astype(jnp.float32)))

    # 3) Ragged size above the fallback threshold -> exercises the lane-tail
    #    pad + partial-last-block path of the kernel.
    x_ragged = jax.random.randint(k3, (3, 5, 37, 129), minval=-1000, maxval=1000,
                                  dtype=jnp.int32)
    y_ragged = to_float(x_ragged)
    jax.block_until_ready(y_ragged)
    assert y_ragged.dtype == jnp.float32
    assert y_ragged.shape == x_ragged.shape
    assert bool(jnp.all(y_ragged == x_ragged.astype(jnp.float32)))

    # 4) float32 input -> no-op fast path.
    y_noop = to_float(y_ragged)
    assert y_noop.dtype == jnp.float32
    assert bool(jnp.all(y_noop == y_ragged))

    print("KERNEL_OK")
</pallas_src>

<mosaic_0001>
module attributes {stable_mosaic.version = 11 : i64} {
  func.func @_to_float_kernel(%arg0: i32, %arg1: memref<512x1024xi8, #tpu.memory_space<vmem>>, %arg2: memref<512x1024xf32, #tpu.memory_space<vmem>>) attributes {dimension_semantics = [#tpu.dimension_semantics<parallel>], iteration_bounds = array<i64: 2>, scalar_prefetch = 0 : i64, scratch_operands = 0 : i64, tpu.core_type = #tpu.core_type<tc>, window_params = [{transform_indices = @transform_0, window_bounds = array<i64: 512, 1024>}, {transform_indices = @transform_1, window_bounds = array<i64: 512, 1024>}]} {
    %c0 = arith.constant 0 : index
    %c0_0 = arith.constant 0 : index
    %0 = vector.load %arg1[%c0, %c0_0] : memref<512x1024xi8, #tpu.memory_space<vmem>>, vector<512x1024xi8>
    %1 = arith.uitofp %0 : vector<512x1024xi8> to vector<512x1024xf32>
    %c0_1 = arith.constant 0 : index
    %c0_2 = arith.constant 0 : index
    %2 = vector.load %arg2[%c0_1, %c0_2] : memref<512x1024xf32, #tpu.memory_space<vmem>>, vector<512x1024xf32>
    tpu.vector_store %arg2[%c0_1, %c0_2], %1 {strides = array<i32>} : memref<512x1024xf32, #tpu.memory_space<vmem>>, vector<512x1024xf32>,
    return
  }
  func.func @transform_0(%arg0: i32) -> (i32, i32) {
    %c0_i32 = arith.constant 0 : i32
    %c0_i32_0 = arith.constant 0 : i32
    return %arg0, %c0_i32 : i32, i32
  }
  func.func @transform_1(%arg0: i32) -> (i32, i32) {
    %c0_i32 = arith.constant 0 : i32
    %c0_i32_0 = arith.constant 0 : i32
    return %arg0, %c0_i32 : i32, i32
  }
}

</mosaic_0001>

<bundles_post_ra>
// kernel: tpu_custom_call.1
= control target key start
LH: loop header
LB: loop body
LE: loop exit
PB: predicated region body
PF: predicated region fallthrough
CT: control target
= control target key end

     0   :  { %6 = vsyncpa [#allocation3], 0  ;;  %s4150_s0 = inlined_call_operand.hbm [shape: u8[1024,1024], index: 0, kind: input, shape index: {}]   ;;  %s4151_s1 = inlined_call_operand.hbm [shape: f32[1024,1024], index: 1, kind: output, shape index: {}]  }
   0x1   :  { %8 = vsyncpa [#allocation3 + $0x1], 0 }
   0x2   :  { %9 = vsyncpa [#allocation4], 0 }
   0x3   :  { %11 = vsyncpa [#allocation4 + $0x1], 0  ;;  %s2582_s6 = smov 0   ;;  %s2584_s7 = smov 0  }
   0x4   :  { %s2586_s8 = smov 0   ;;  %s2588_s9 = smov 0  }
   0x5 LB: > { %s2603_s10 = sadd.s32 4294967295, %s2564_s9   ;;  %s2402_s11 = sadd.s32 4294967294, %s2564_s9   ;;  %s2564_s9 = sphi %s2588_s9, %s4166_s9   ;;  %s2560_s8 = sphi %s2586_s8, %s4165_s8   ;;  %s2556_s7 = sphi %s2584_s7, %s4164_s7   ;;  %s2552_s6 = sphi %s2582_s6, %s4163_s6  }
   0x6   : > { %s2607_s12 = sadd.s32 1, %s2564_s9   ;;  %s24_s13 = sadd.s32 1, %s2560_s8 }
   0x7   : > { %s21_s14 = ssub.s32 %s2564_s9, %s2607_s12  ;;  %p31_p0 = scmp.ne.s32.totalorder %s2560_s8, %s2556_s7 }
   0x8   : > { %p22_p1 = scmp.eq.s32.totalorder %s21_s14, 0  ;;  %p32_p2 = scmp.eq.s32.totalorder %s2564_s9, 0 }
   0x9   : > { %p37_p3 = scmp.ne.s32.totalorder %s2556_s7, %s2552_s6  ;;  %p38_p4 = scmp.eq.s32.totalorder %s2603_s10, 0 }
   0xa   : > { %s2619_s15 = scalar_select %p22_p1, %s2560_s8, %s24_s13  }
   0xb   : > { %p2621_p5 = por %p32_p2, %p31_p0  ;;  %p2625_p6 = por %p38_p4, %p37_p3 }
   0xc   : > { %p61_p7 = scmp.eq.s32.totalorder %s2603_s10, 1  ;;  %p67_p8 = scmp.eq.s32.totalorder %s2402_s11, 1 }
   0xd   : > { %s4155_s17 = scalar_select %p2625_p6, 1, 0 }
   0xe   : > { %p2434_p10 = scmp.lt.s32.totalorder %s2564_s9, 2  ;;  %p2632_p11 = por %p61_p7, %p31_p0 }
   0xf   : > { %p2636_p12 = por %p67_p8, %p37_p3  ;;  %s87_s20 = sand.u32 1, %s2560_s8  }
  0x10   : > { %s4156_s18 = scalar_select %p2632_p11, 1, 0 }
  0x11   : > { %s4157_s19 = scalar_select %p2636_p12, 1, 0 }
  0x12   : > { %s2419_s21 = sshll.u32 %s2564_s9, 14  ;;  %s2405_s22 = sshll.u32 %s87_s20, 10 }
  0x13   : > { %s2645_s25 = scalar_lea.hbm %s4150_s0, %s2419_s21  ;;  %s91_s26 = scalar_lea.vmem [#allocation2], %s2405_s22 }
  0x14   : > { %s99_s27 = sshll.u32 %s91_s26, 4  ;;  %p2649_p13 = pnand %p2434_p10, %p2621_p5  ;;  %s2653_s27 = int_to_ptr.vmem [resolvable:$true] %s99_s27 }
  0x15   : > { %s2655_s29 = scalar_lea.sflag [#allocation3], %s87_s20  ;;  %s2472_s30 = scalar_lea.hbm %s2645_s25, 16384 }
  0x16   : > { %p2473_p0 = scmp.ne.s32.totalorder %s2645_s25, %s2472_s30  ;;  %p2474_p1 = pneg %p2649_p13 }
  0x17   : > { %s2477_s4 = scalar_lea.hbm %s4150_s0, 32768  ;;  %p2478_p4 = scmp.lt.s32.totalorder %s2645_s25, %s4150_s0 }
  0x18   : > { %p2475_p2 = pnand %p2474_p1, %p2473_p0  ;;  %p2479_p5 = scmp.lt.s32.totalorder %s2477_s4, %s2472_s30 }
  0x1a   : > { %p2476_p3 = pneg %p2475_p2  ;;  %p2480_p7 = por %p2479_p5, %p2478_p4 }
  0x1c   : > { %p2481_p8 = pnand %p2480_p7, %p2476_p3 }
  0x1e   : > { %2484 = shalt.err (!%p2481_p8)
}
  0x1f   : > { %s2485_s13 = scalar_lea.vmem %s2653_s27, 16384  ;;  %s2566_s14 = smov [#allocation2]  }
  0x20   : > { %p2486_p10 = scmp.ne.s32.totalorder %s2653_s27, %s2485_s13  ;;  %s2490_s16 = sshll.u32 %s2566_s14, 4  ;;  %s2491_s16 = int_to_ptr.vmem [resolvable:$false] %s2490_s16 }
  0x21   : > { %s2492_s20 = scalar_lea.vmem %s2491_s16, 32768  ;;  %p2493_p2 = scmp.lt.s32.totalorder %s2653_s27, %s2491_s16 }
  0x22   : > { %p2488_p9 = pnand %p2486_p10, %p2474_p1  ;;  %p2494_p12 = scmp.lt.s32.totalorder %s2492_s20, %s2485_s13 }
  0x24   : > { %p2489_p0 = pneg %p2488_p9  ;;  %p2495_p11 = por %p2494_p12, %p2493_p2 }
  0x26   : > { %p2496_p6 = pnand %p2495_p11, %p2489_p0 }
  0x28   : > { %2499 = shalt.err (!%p2496_p6)
}
  0x29   : > { %s2567_s21 = smov 1024   ;;  %s2568_s22 = smov 64  }
  0x2a   : > { %2429 = dma.hbm_to_vmem [thread:$0]  (!%p2649_p13), %s2645_s25, 16384, %s2653_s27, %s2655_s29, %s2567_s21, %s2567_s21, %s2568_s22  }
  0x2b   : > { %p2409_p9 = scmp.ge.s32.totalorder %s2564_s9, 1  ;;  %p107_p1 = scmp.lt.s32.totalorder %s2564_s9, 3 }
  0x2d   : > { %p108_p3 = pnand %p2409_p9, %p107_p1 }
  0x2e   : > { %s2679_s23 = sand.u32 (!%p108_p3), 1, %s2556_s7   ;;  %p4159_p6 = scmp.ne.s32.totalorder (!%p108_p3), %s4155_s17, 0 }
  0x2f   : > { %111 = sbr.rel (%p108_p3) target bundleno = 455 (0x1c7), region = 24  ;;  %s2410_s24 = sshll.u32 (!%p108_p3), %s2679_s23, 10 }
  0x30   : > { %s114_s26 = scalar_lea.sflag (!%p108_p3), [#allocation3], %s2679_s23  ;;  %s2683_s30 = scalar_lea.vmem (!%p108_p3), [#allocation2], %s2410_s24 }
  0x34   : > { %2543 = dma.done.wait (%p4159_p6), %s114_s26, 16384  }
  0x35   : > { %2545 = vsyncadd (%p4159_p6), %s114_s26, 4294950912  ;;  %v2690_v0 = vld [vmem:[%s2683_s30] sm:$0xff]  ;;  %v2693_v1 = vld [vmem:[%s2683_s30 + $0x8] sm:$0xff]  ;;  %s2411_s25 = sshll.u32 %s2679_s23, 12  ;;  %s2421_s27 = sshll.u32 %s2603_s10, 16 }
  0x36   : > { %v2696_v2 = vld [vmem:[%s2683_s30 + $0x10] sm:$0xff]  ;;  %v266_v3 = vunpack.c.0.s8 %v2690_v0  ;;  %v267_v4 = vunpack.c.0.s8 %v2693_v1  ;;  %v2703_v6 = vld [vmem:[%s2683_s30 + $0x18] sm:$0xff]  ;;  %v2706_v7 = vld [vmem:[%s2683_s30 + $0x20] sm:$0xff]  ;;  %v274_v9 = vunpack.c.1.s8 %v2690_v0  ;;  %v275_v15 = vunpack.c.1.s8 %v2693_v1  ;;  %s2724_s17 = scalar_lea.vmem [#allocation5], %s2411_s25  ;;  %s4100_s10 = scalar_lea.hbm %s4151_s1, %s2421_s27 }
  0x37   : > { %v268_v5 = vunpack.c.0.s8 %v2696_v2  ;;  %v2709_v8 = vld [vmem:[%s2683_s30 + $0x28] sm:$0xff]  ;;  %v269_v10 = vunpack.c.0.s8 %v2703_v6  ;;  %v270_v11 = vunpack.c.0.s8 %v2706_v7  ;;  %v2716_v13 = vld [vmem:[%s2683_s30 + $0x30] sm:$0xff]  ;;  %v2719_v14 = vld [vmem:[%s2683_s30 + $0x38] sm:$0xff]  ;;  %v276_v35 = vunpack.c.1.s8 %v2696_v2  ;;  %s2329_s28 = sshll.u32 %s2724_s17, 4  ;;  %s2315_s3 = scalar_lea.sflag [#allocation4], %s2679_s23  ;;  %s4102_s28 = int_to_ptr.vmem [resolvable:$true] %s2329_s28 }
  0x38   : > { %v271_v12 = vunpack.c.0.s8 %v2709_v8  ;;  %v778_v16 = vand.u32 255, %v266_v3  ;;  %v779_v17 = vand.u32 255, %v267_v4  ;;  %v272_v19 = vunpack.c.0.s8 %v2716_v13  ;;  %s2500_s4 = scalar_lea.vmem %s4102_s28, 65536  ;;  %p4160_p12 = scmp.ne.s32.totalorder %s4156_s18, 0 }
  0x39   : > { %v780_v18 = vand.u32 255, %v268_v5  ;;  %v781_v20 = vand.u32 255, %v269_v10  ;;  %v782_v21 = vand.u32 255, %v270_v11  ;;  %v273_v23 = vunpack.c.0.s8 %v2719_v14  ;;  %p2501_p11 = scmp.ne.s32.totalorder %s4102_s28, %s2500_s4  ;;  %s2569_s5 = smov [#allocation5]  }
  0x3a   : > { %v783_v22 = vand.u32 255, %v271_v12  ;;  %v1290_v24 = vcvt.s32.f32 %v778_v16  ;;  %v1291_v25 = vcvt.s32.f32 %v779_v17  ;;  %v784_v27 = vand.u32 255, %v272_v19  ;;  %s2504_s11 = sshll.u32 %s2569_s5, 4  ;;  %s2505_s11 = int_to_ptr.vmem [resolvable:$false] %s2504_s11 }
  0x3b   : > { %v1292_v26 = vcvt.s32.f32 %v780_v18  ;;  %v1293_v28 = vcvt.s32.f32 %v781_v20  ;;  %v1294_v29 = vcvt.s32.f32 %v782_v21  ;;  %v785_v31 = vand.u32 255, %v273_v23  ;;  %p2502_p13 = pnand %p2501_p11, %p4160_p12  ;;  %s2506_s13 = scalar_lea.vmem %s2505_s11, 131072 }
  0x3c   : > { %v1295_v30 = vcvt.s32.f32 %v783_v22  ;;  %1802 = vst [vmem:[%s2724_s17] sm:$0xff] %v1290_v24  ;;  %1803 = vst [vmem:[%s2724_s17 + $0x8] sm:$0xff] %v1291_v25  ;;  %v1296_v32 = vcvt.s32.f32 %v784_v27  ;;  %v786_v33 = vand.u32 255, %v274_v9  ;;  %v787_v34 = vand.u32 255, %v275_v15  ;;  %p2507_p5 = scmp.lt.s32.totalorder %s4102_s28, %s2505_s11  ;;  %p2508_p7 = scmp.lt.s32.totalorder %s2506_s13, %s2500_s4 }
  0x3d   : > { %1804 = vst [vmem:[%s2724_s17 + $0x10] sm:$0xff] %v1292_v26  ;;  %1805 = vst [vmem:[%s2724_s17 + $0x18] sm:$0xff] %v1293_v28  ;;  %v1297_v36 = vcvt.s32.f32 %v785_v31  ;;  %v277_v37 = vunpack.c.1.s8 %v2703_v6  ;;  %v278_v38 = vunpack.c.1.s8 %v2706_v7  ;;  %v279_v39 = vunpack.c.1.s8 %v2709_v8  ;;  %v2772_v31 = vld [vmem:[%s2683_s30 + $0x48] sm:$0xff]  ;;  %p2503_p4 = pneg %p2502_p13 }
  0x3e   : > { %1806 = vst [vmem:[%s2724_s17 + $0x20] sm:$0xff] %v1294_v29  ;;  %1807 = vst [vmem:[%s2724_s17 + $0x28] sm:$0xff] %v1295_v30  ;;  %v1298_v40 = vcvt.s32.f32 %v786_v33  ;;  %v1299_v41 = vcvt.s32.f32 %v787_v34  ;;  %v788_v42 = vand.u32 255, %v276_v35  ;;  %v280_v43 = vunpack.c.1.s8 %v2716_v13  ;;  %v2769_v30 = vld [vmem:[%s2683_s30 + $0x40] sm:$0xff]  ;;  %p2509_p8 = por %p2508_p7, %p2507_p5 }
  0x3f   : > { %1808 = vst [vmem:[%s2724_s17 + $0x30] sm:$0xff] %v1296_v32  ;;  %1809 = vst [vmem:[%s2724_s17 + $0x38] sm:$0xff] %v1297_v36  ;;  %v789_v44 = vand.u32 255, %v277_v37  ;;  %v790_v45 = vand.u32 255, %v278_v38  ;;  %v791_v46 = vand.u32 255, %v279_v39  ;;  %v281_v47 = vunpack.c.1.s8 %v2719_v14  ;;  %v2779_v36 = vld [vmem:[%s2683_s30 + $0x50] sm:$0xff] }
  0x40   : > { %1810 = vst [vmem:[%s2724_s17 + $0x40] sm:$0xff] %v1298_v40  ;;  %1811 = vst [vmem:[%s2724_s17 + $0x48] sm:$0xff] %v1299_v41  ;;  %v1300_v48 = vcvt.s32.f32 %v788_v42  ;;  %v792_v49 = vand.u32 255, %v280_v43  ;;  %v282_v50 = vunpack.c.2.s8 %v2690_v0  ;;  %v283_v51 = vunpack.c.2.s8 %v2693_v1  ;;  %v2786_v40 = vld [vmem:[%s2683_s30 + $0x58] sm:$0xff]  ;;  %v2789_v41 = vld [vmem:[%s2683_s30 + $0x60] sm:$0xff]  ;;  %p2510_p10 = pnand %p2509_p8, %p2503_p4 }
  0x41   : > { %v1301_v52 = vcvt.s32.f32 %v789_v44  ;;  %v1302_v53 = vcvt.s32.f32 %v790_v45  ;;  %v1303_v54 = vcvt.s32.f32 %v791_v46  ;;  %v793_v55 = vand.u32 255, %v281_v47  ;;  %v2795_v46 = vld [vmem:[%s2683_s30 + $0x70] sm:$0xff] }
  0x42   : > { %1812 = vst [vmem:[%s2724_s17 + $0x50] sm:$0xff] %v1300_v48  ;;  %v1304_v56 = vcvt.s32.f32 %v792_v49  ;;  %v794_v57 = vand.u32 255, %v282_v50  ;;  %v795_v58 = vand.u32 255, %v283_v51  ;;  %v284_v59 = vunpack.c.2.s8 %v2696_v2  ;;  %v2800_v51 = vld [vmem:[%s2683_s30 + $0x78] sm:$0xff] }
  0x43   : > { %1813 = vst [vmem:[%s2724_s17 + $0x58] sm:$0xff] %v1301_v52  ;;  %1814 = vst [vmem:[%s2724_s17 + $0x60] sm:$0xff] %v1302_v53  ;;  %v1305_v60 = vcvt.s32.f32 %v793_v55  ;;  %v285_v61 = vunpack.c.2.s8 %v2703_v6  ;;  %v286_v62 = vunpack.c.2.s8 %v2706_v7  ;;  %v287_v63 = vunpack.c.2.s8 %v2709_v8 }
  0x44   : > { %1815 = vst [vmem:[%s2724_s17 + $0x68] sm:$0xff] %v1303_v54  ;;  %1816 = vst [vmem:[%s2724_s17 + $0x70] sm:$0xff] %v1304_v56  ;;  %v1306_v3 = vcvt.s32.f32 %v794_v57  ;;  %v1307_v4 = vcvt.s32.f32 %v795_v58  ;;  %v796_v5 = vand.u32 255, %v284_v59  ;;  %v288_v9 = vunpack.c.2.s8 %v2716_v13 }
  0x45   : > { %1817 = vst [vmem:[%s2724_s17 + $0x78] sm:$0xff] %v1305_v60  ;;  %v797_v10 = vand.u32 255, %v285_v61  ;;  %v798_v11 = vand.u32 255, %v286_v62  ;;  %v799_v12 = vand.u32 255, %v287_v63  ;;  %v289_v15 = vunpack.c.2.s8 %v2719_v14 }
  0x46   : > { %1818 = vst [vmem:[%s2724_s17 + $0x80] sm:$0xff] %v1306_v3  ;;  %1819 = vst [vmem:[%s2724_s17 + $0x88] sm:$0xff] %v1307_v4  ;;  %v1308_v16 = vcvt.s32.f32 %v796_v5  ;;  %v800_v17 = vand.u32 255, %v288_v9  ;;  %v290_v18 = vunpack.c.3.s8 %v2690_v0  ;;  %v291_v19 = vunpack.c.3.s8 %v2693_v1 }
  0x47   : > { %v1309_v20 = vcvt.s32.f32 %v797_v10  ;;  %v1310_v21 = vcvt.s32.f32 %v798_v11  ;;  %v1311_v22 = vcvt.s32.f32 %v799_v12  ;;  %v801_v23 = vand.u32 255, %v289_v15 }
  0x48   : > { %1820 = vst [vmem:[%s2724_s17 + $0x90] sm:$0xff] %v1308_v16  ;;  %v1312_v24 = vcvt.s32.f32 %v800_v17  ;;  %v802_v25 = vand.u32 255, %v290_v18  ;;  %v803_v26 = vand.u32 255, %v291_v19  ;;  %v292_v27 = vunpack.c.3.s8 %v2696_v2 }
  0x49   : > { %1821 = vst [vmem:[%s2724_s17 + $0x98] sm:$0xff] %v1309_v20  ;;  %1822 = vst [vmem:[%s2724_s17 + $0xa0] sm:$0xff] %v1310_v21  ;;  %v1313_v0 = vcvt.s32.f32 %v801_v23  ;;  %v293_v1 = vunpack.c.3.s8 %v2703_v6  ;;  %v294_v28 = vunpack.c.3.s8 %v2706_v7  ;;  %v295_v29 = vunpack.c.3.s8 %v2709_v8 }
  0x4a   : > { %1823 = vst [vmem:[%s2724_s17 + $0xa8] sm:$0xff] %v1311_v22  ;;  %1824 = vst [vmem:[%s2724_s17 + $0xb0] sm:$0xff] %v1312_v24  ;;  %v1314_v32 = vcvt.s32.f32 %v802_v25  ;;  %v1315_v2 = vcvt.s32.f32 %v803_v26  ;;  %v804_v33 = vand.u32 255, %v292_v27  ;;  %v296_v34 = vunpack.c.3.s8 %v2716_v13 }
  0x4b   : > { %1825 = vst [vmem:[%s2724_s17 + $0xb8] sm:$0xff] %v1313_v0  ;;  %v805_v6 = vand.u32 255, %v293_v1  ;;  %v806_v35 = vand.u32 255, %v294_v28  ;;  %v807_v7 = vand.u32 255, %v295_v29  ;;  %v297_v8 = vunpack.c.3.s8 %v2719_v14  ;;  %v2792_v14 = vld [vmem:[%s2683_s30 + $0x68] sm:$0xff] }
  0x4c   : > { %1826 = vst [vmem:[%s2724_s17 + $0xc0] sm:$0xff] %v1314_v32  ;;  %1827 = vst [vmem:[%s2724_s17 + $0xc8] sm:$0xff] %v1315_v2  ;;  %v1316_v37 = vcvt.s32.f32 %v804_v33  ;;  %v808_v38 = vand.u32 255, %v296_v34  ;;  %v298_v39 = vunpack.c.0.s8 %v2769_v30  ;;  %v299_v13 = vunpack.c.0.s8 %v2772_v31 }
  0x4d   : > { %v1317_v42 = vcvt.s32.f32 %v805_v6  ;;  %v1318_v43 = vcvt.s32.f32 %v806_v35  ;;  %v1319_v44 = vcvt.s32.f32 %v807_v7  ;;  %v809_v45 = vand.u32 255, %v297_v8 }
  0x4e   : > { %1828 = vst [vmem:[%s2724_s17 + $0xd0] sm:$0xff] %v1316_v37  ;;  %v1320_v47 = vcvt.s32.f32 %v808_v38  ;;  %v810_v48 = vand.u32 255, %v298_v39  ;;  %v811_v49 = vand.u32 255, %v299_v13  ;;  %v300_v50 = vunpack.c.0.s8 %v2779_v36 }
  0x4f   : > { %1829 = vst [vmem:[%s2724_s17 + $0xd8] sm:$0xff] %v1317_v42  ;;  %1830 = vst [vmem:[%s2724_s17 + $0xe0] sm:$0xff] %v1318_v43  ;;  %v1321_v52 = vcvt.s32.f32 %v809_v45  ;;  %v301_v53 = vunpack.c.0.s8 %v2786_v40  ;;  %v302_v54 = vunpack.c.0.s8 %v2789_v41  ;;  %v303_v55 = vunpack.c.0.s8 %v2792_v14 }
  0x50   : > { %1831 = vst [vmem:[%s2724_s17 + $0xe8] sm:$0xff] %v1319_v44  ;;  %1832 = vst [vmem:[%s2724_s17 + $0xf0] sm:$0xff] %v1320_v47  ;;  %v1322_v56 = vcvt.s32.f32 %v810_v48  ;;  %v1323_v57 = vcvt.s32.f32 %v811_v49  ;;  %v812_v58 = vand.u32 255, %v300_v50  ;;  %v304_v59 = vunpack.c.0.s8 %v2795_v46 }
  0x51   : > { %1833 = vst [vmem:[%s2724_s17 + $0xf8] sm:$0xff] %v1321_v52  ;;  %v813_v60 = vand.u32 255, %v301_v53  ;;  %v814_v61 = vand.u32 255, %v302_v54  ;;  %v815_v62 = vand.u32 255, %v303_v55  ;;  %v305_v63 = vunpack.c.0.s8 %v2800_v51 }
  0x52   : > { %1834 = vst [vmem:[%s2724_s17 + $0x100] sm:$0xff] %v1322_v56  ;;  %1835 = vst [vmem:[%s2724_s17 + $0x108] sm:$0xff] %v1323_v57  ;;  %v1324_v3 = vcvt.s32.f32 %v812_v58  ;;  %v816_v4 = vand.u32 255, %v304_v59  ;;  %v306_v5 = vunpack.c.1.s8 %v2769_v30  ;;  %v307_v9 = vunpack.c.1.s8 %v2772_v31 }
  0x53   : > { %v1325_v10 = vcvt.s32.f32 %v813_v60  ;;  %v1326_v11 = vcvt.s32.f32 %v814_v61  ;;  %v1327_v12 = vcvt.s32.f32 %v815_v62  ;;  %v817_v15 = vand.u32 255, %v305_v63 }
  0x54   : > { %1836 = vst [vmem:[%s2724_s17 + $0x110] sm:$0xff] %v1324_v3  ;;  %v1328_v16 = vcvt.s32.f32 %v816_v4  ;;  %v818_v17 = vand.u32 255, %v306_v5  ;;  %v819_v18 = vand.u32 255, %v307_v9  ;;  %v308_v19 = vunpack.c.1.s8 %v2779_v36 }
  0x55   : > { %1837 = vst [vmem:[%s2724_s17 + $0x118] sm:$0xff] %v1325_v10  ;;  %1838 = vst [vmem:[%s2724_s17 + $0x120] sm:$0xff] %v1326_v11  ;;  %v1329_v20 = vcvt.s32.f32 %v817_v15  ;;  %v309_v21 = vunpack.c.1.s8 %v2786_v40  ;;  %v310_v22 = vunpack.c.1.s8 %v2789_v41  ;;  %v311_v23 = vunpack.c.1.s8 %v2792_v14  ;;  %v2860_v15 = vld [vmem:[%s2683_s30 + $0x88] sm:$0xff] }
  0x56   : > { %1839 = vst [vmem:[%s2724_s17 + $0x128] sm:$0xff] %v1327_v12  ;;  %1840 = vst [vmem:[%s2724_s17 + $0x130] sm:$0xff] %v1328_v16  ;;  %v1330_v24 = vcvt.s32.f32 %v818_v17  ;;  %v1331_v25 = vcvt.s32.f32 %v819_v18  ;;  %v820_v26 = vand.u32 255, %v308_v19  ;;  %v312_v27 = vunpack.c.1.s8 %v2795_v46  ;;  %v2857_v12 = vld [vmem:[%s2683_s30 + $0x80] sm:$0xff] }
  0x57   : > { %1841 = vst [vmem:[%s2724_s17 + $0x138] sm:$0xff] %v1329_v20  ;;  %v821_v0 = vand.u32 255, %v309_v21  ;;  %v822_v1 = vand.u32 255, %v310_v22  ;;  %v823_v28 = vand.u32 255, %v311_v23  ;;  %v313_v29 = vunpack.c.1.s8 %v2800_v51  ;;  %v2867_v20 = vld [vmem:[%s2683_s30 + $0x90] sm:$0xff] }
  0x58   : > { %1842 = vst [vmem:[%s2724_s17 + $0x140] sm:$0xff] %v1330_v24  ;;  %1843 = vst [vmem:[%s2724_s17 + $0x148] sm:$0xff] %v1331_v25  ;;  %v1332_v32 = vcvt.s32.f32 %v820_v26  ;;  %v824_v2 = vand.u32 255, %v312_v27  ;;  %v314_v33 = vunpack.c.2.s8 %v2769_v30  ;;  %v315_v34 = vunpack.c.2.s8 %v2772_v31  ;;  %v2874_v24 = vld [vmem:[%s2683_s30 + $0x98] sm:$0xff]  ;;  %v2877_v25 = vld [vmem:[%s2683_s30 + $0xa0] sm:$0xff] }
  0x59   : > { %v1333_v6 = vcvt.s32.f32 %v821_v0  ;;  %v1334_v35 = vcvt.s32.f32 %v822_v1  ;;  %v1335_v7 = vcvt.s32.f32 %v823_v28  ;;  %v825_v8 = vand.u32 255, %v313_v29  ;;  %v2883_v28 = vld [vmem:[%s2683_s30 + $0xb0] sm:$0xff] }
  0x5a   : > { %1844 = vst [vmem:[%s2724_s17 + $0x150] sm:$0xff] %v1332_v32  ;;  %v1336_v37 = vcvt.s32.f32 %v824_v2  ;;  %v826_v38 = vand.u32 255, %v314_v33  ;;  %v827_v39 = vand.u32 255, %v315_v34  ;;  %v316_v13 = vunpack.c.2.s8 %v2779_v36  ;;  %v2888_v34 = vld [vmem:[%s2683_s30 + $0xb8] sm:$0xff] }
  0x5b   : > { %1845 = vst [vmem:[%s2724_s17 + $0x158] sm:$0xff] %v1333_v6  ;;  %1846 = vst [vmem:[%s2724_s17 + $0x160] sm:$0xff] %v1334_v35  ;;  %v1337_v42 = vcvt.s32.f32 %v825_v8  ;;  %v317_v43 = vunpack.c.2.s8 %v2786_v40  ;;  %v318_v44 = vunpack.c.2.s8 %v2789_v41  ;;  %v319_v45 = vunpack.c.2.s8 %v2792_v14 }
  0x5c   : > { %1847 = vst [vmem:[%s2724_s17 + $0x168] sm:$0xff] %v1335_v7  ;;  %1848 = vst [vmem:[%s2724_s17 + $0x170] sm:$0xff] %v1336_v37  ;;  %v1338_v47 = vcvt.s32.f32 %v826_v38  ;;  %v1339_v48 = vcvt.s32.f32 %v827_v39  ;;  %v828_v49 = vand.u32 255, %v316_v13  ;;  %v320_v50 = vunpack.c.2.s8 %v2795_v46 }
  0x5d   : > { %1849 = vst [vmem:[%s2724_s17 + $0x178] sm:$0xff] %v1337_v42  ;;  %v829_v52 = vand.u32 255, %v317_v43  ;;  %v830_v53 = vand.u32 255, %v318_v44  ;;  %v831_v54 = vand.u32 255, %v319_v45  ;;  %v321_v55 = vunpack.c.2.s8 %v2800_v51 }
  0x5e   : > { %1850 = vst [vmem:[%s2724_s17 + $0x180] sm:$0xff] %v1338_v47  ;;  %1851 = vst [vmem:[%s2724_s17 + $0x188] sm:$0xff] %v1339_v48  ;;  %v1340_v56 = vcvt.s32.f32 %v828_v49  ;;  %v832_v57 = vand.u32 255, %v320_v50  ;;  %v322_v58 = vunpack.c.3.s8 %v2769_v30  ;;  %v323_v59 = vunpack.c.3.s8 %v2772_v31 }
  0x5f   : > { %v1341_v60 = vcvt.s32.f32 %v829_v52  ;;  %v1342_v61 = vcvt.s32.f32 %v830_v53  ;;  %v1343_v62 = vcvt.s32.f32 %v831_v54  ;;  %v833_v63 = vand.u32 255, %v321_v55 }
  0x60   : > { %1852 = vst [vmem:[%s2724_s17 + $0x190] sm:$0xff] %v1340_v56  ;;  %v1344_v3 = vcvt.s32.f32 %v832_v57  ;;  %v834_v4 = vand.u32 255, %v322_v58  ;;  %v835_v5 = vand.u32 255, %v323_v59  ;;  %v324_v9 = vunpack.c.3.s8 %v2779_v36 }
  0x61   : > { %1853 = vst [vmem:[%s2724_s17 + $0x198] sm:$0xff] %v1341_v60  ;;  %1854 = vst [vmem:[%s2724_s17 + $0x1a0] sm:$0xff] %v1342_v61  ;;  %v1345_v30 = vcvt.s32.f32 %v833_v63  ;;  %v325_v31 = vunpack.c.3.s8 %v2786_v40  ;;  %v326_v10 = vunpack.c.3.s8 %v2789_v41  ;;  %v327_v11 = vunpack.c.3.s8 %v2792_v14 }
  0x62   : > { %1855 = vst [vmem:[%s2724_s17 + $0x1a8] sm:$0xff] %v1343_v62  ;;  %1856 = vst [vmem:[%s2724_s17 + $0x1b0] sm:$0xff] %v1344_v3  ;;  %v1346_v16 = vcvt.s32.f32 %v834_v4  ;;  %v1347_v36 = vcvt.s32.f32 %v835_v5  ;;  %v836_v17 = vand.u32 255, %v324_v9  ;;  %v328_v18 = vunpack.c.3.s8 %v2795_v46 }
  0x63   : > { %1857 = vst [vmem:[%s2724_s17 + $0x1b8] sm:$0xff] %v1345_v30  ;;  %v837_v40 = vand.u32 255, %v325_v31  ;;  %v838_v19 = vand.u32 255, %v326_v10  ;;  %v839_v41 = vand.u32 255, %v327_v11  ;;  %v329_v14 = vunpack.c.3.s8 %v2800_v51  ;;  %v2880_v51 = vld [vmem:[%s2683_s30 + $0xa8] sm:$0xff] }
  0x64   : > { %1858 = vst [vmem:[%s2724_s17 + $0x1c0] sm:$0xff] %v1346_v16  ;;  %1859 = vst [vmem:[%s2724_s17 + $0x1c8] sm:$0xff] %v1347_v36  ;;  %v1348_v21 = vcvt.s32.f32 %v836_v17  ;;  %v840_v22 = vand.u32 255, %v328_v18  ;;  %v330_v23 = vunpack.c.0.s8 %v2857_v12  ;;  %v331_v46 = vunpack.c.0.s8 %v2860_v15 }
  0x65   : > { %v1349_v26 = vcvt.s32.f32 %v837_v40  ;;  %v1350_v27 = vcvt.s32.f32 %v838_v19  ;;  %v1351_v0 = vcvt.s32.f32 %v839_v41  ;;  %v841_v1 = vand.u32 255, %v329_v14 }
  0x66   : > { %1860 = vst [vmem:[%s2724_s17 + $0x1d0] sm:$0xff] %v1348_v21  ;;  %v1352_v29 = vcvt.s32.f32 %v840_v22  ;;  %v842_v32 = vand.u32 255, %v330_v23  ;;  %v843_v2 = vand.u32 255, %v331_v46  ;;  %v332_v33 = vunpack.c.0.s8 %v2867_v20 }
  0x67   : > { %1861 = vst [vmem:[%s2724_s17 + $0x1d8] sm:$0xff] %v1349_v26  ;;  %1862 = vst [vmem:[%s2724_s17 + $0x1e0] sm:$0xff] %v1350_v27  ;;  %v1353_v6 = vcvt.s32.f32 %v841_v1  ;;  %v333_v35 = vunpack.c.0.s8 %v2874_v24  ;;  %v334_v7 = vunpack.c.0.s8 %v2877_v25  ;;  %v335_v8 = vunpack.c.0.s8 %v2880_v51 }
  0x68   : > { %1863 = vst [vmem:[%s2724_s17 + $0x1e8] sm:$0xff] %v1351_v0  ;;  %1864 = vst [vmem:[%s2724_s17 + $0x1f0] sm:$0xff] %v1352_v29  ;;  %v1354_v37 = vcvt.s32.f32 %v842_v32  ;;  %v1355_v38 = vcvt.s32.f32 %v843_v2  ;;  %v844_v39 = vand.u32 255, %v332_v33  ;;  %v336_v13 = vunpack.c.0.s8 %v2883_v28 }
  0x69   : > { %1865 = vst [vmem:[%s2724_s17 + $0x1f8] sm:$0xff] %v1353_v6  ;;  %v845_v42 = vand.u32 255, %v333_v35  ;;  %v846_v43 = vand.u32 255, %v334_v7  ;;  %v847_v44 = vand.u32 255, %v335_v8  ;;  %v337_v45 = vunpack.c.0.s8 %v2888_v34 }
  0x6a   : > { %1866 = vst [vmem:[%s2724_s17 + $0x200] sm:$0xff] %v1354_v37  ;;  %1867 = vst [vmem:[%s2724_s17 + $0x208] sm:$0xff] %v1355_v38  ;;  %v1356_v47 = vcvt.s32.f32 %v844_v39  ;;  %v848_v48 = vand.u32 255, %v336_v13  ;;  %v338_v49 = vunpack.c.1.s8 %v2857_v12  ;;  %v339_v50 = vunpack.c.1.s8 %v2860_v15 }
  0x6b   : > { %v1357_v52 = vcvt.s32.f32 %v845_v42  ;;  %v1358_v53 = vcvt.s32.f32 %v846_v43  ;;  %v1359_v54 = vcvt.s32.f32 %v847_v44  ;;  %v849_v55 = vand.u32 255, %v337_v45 }
  0x6c   : > { %1868 = vst [vmem:[%s2724_s17 + $0x210] sm:$0xff] %v1356_v47  ;;  %v1360_v56 = vcvt.s32.f32 %v848_v48  ;;  %v850_v57 = vand.u32 255, %v338_v49  ;;  %v851_v58 = vand.u32 255, %v339_v50  ;;  %v340_v59 = vunpack.c.1.s8 %v2867_v20 }
  0x6d   : > { %1869 = vst [vmem:[%s2724_s17 + $0x218] sm:$0xff] %v1357_v52  ;;  %1870 = vst [vmem:[%s2724_s17 + $0x220] sm:$0xff] %v1358_v53  ;;  %v1361_v60 = vcvt.s32.f32 %v849_v55  ;;  %v341_v61 = vunpack.c.1.s8 %v2874_v24  ;;  %v342_v62 = vunpack.c.1.s8 %v2877_v25  ;;  %v343_v63 = vunpack.c.1.s8 %v2880_v51  ;;  %v2948_v55 = vld [vmem:[%s2683_s30 + $0xc8] sm:$0xff] }
  0x6e   : > { %1871 = vst [vmem:[%s2724_s17 + $0x228] sm:$0xff] %v1359_v54  ;;  %1872 = vst [vmem:[%s2724_s17 + $0x230] sm:$0xff] %v1360_v56  ;;  %v1362_v3 = vcvt.s32.f32 %v850_v57  ;;  %v1363_v4 = vcvt.s32.f32 %v851_v58  ;;  %v852_v5 = vand.u32 255, %v340_v59  ;;  %v344_v9 = vunpack.c.1.s8 %v2883_v28  ;;  %v2945_v54 = vld [vmem:[%s2683_s30 + $0xc0] sm:$0xff] }
  0x6f   : > { %1873 = vst [vmem:[%s2724_s17 + $0x238] sm:$0xff] %v1361_v60  ;;  %v853_v30 = vand.u32 255, %v341_v61  ;;  %v854_v31 = vand.u32 255, %v342_v62  ;;  %v855_v10 = vand.u32 255, %v343_v63  ;;  %v345_v11 = vunpack.c.1.s8 %v2888_v34  ;;  %v2955_v60 = vld [vmem:[%s2683_s30 + $0xd0] sm:$0xff] }
  0x70   : > { %1874 = vst [vmem:[%s2724_s17 + $0x240] sm:$0xff] %v1362_v3  ;;  %1875 = vst [vmem:[%s2724_s17 + $0x248] sm:$0xff] %v1363_v4  ;;  %v1364_v16 = vcvt.s32.f32 %v852_v5  ;;  %v856_v36 = vand.u32 255, %v344_v9  ;;  %v346_v17 = vunpack.c.2.s8 %v2857_v12  ;;  %v347_v18 = vunpack.c.2.s8 %v2860_v15  ;;  %v2962_v3 = vld [vmem:[%s2683_s30 + $0xd8] sm:$0xff]  ;;  %v2965_v4 = vld [vmem:[%s2683_s30 + $0xe0] sm:$0xff] }
  0x71   : > { %v1365_v40 = vcvt.s32.f32 %v853_v30  ;;  %v1366_v19 = vcvt.s32.f32 %v854_v31  ;;  %v1367_v41 = vcvt.s32.f32 %v855_v10  ;;  %v857_v14 = vand.u32 255, %v345_v11  ;;  %v2971_v10 = vld [vmem:[%s2683_s30 + $0xf0] sm:$0xff] }
  0x72   : > { %1876 = vst [vmem:[%s2724_s17 + $0x250] sm:$0xff] %v1364_v16  ;;  %v1368_v21 = vcvt.s32.f32 %v856_v36  ;;  %v858_v22 = vand.u32 255, %v346_v17  ;;  %v859_v23 = vand.u32 255, %v347_v18  ;;  %v348_v46 = vunpack.c.2.s8 %v2867_v20  ;;  %v2976_v18 = vld [vmem:[%s2683_s30 + $0xf8] sm:$0xff] }
  0x73   : > { %1877 = vst [vmem:[%s2724_s17 + $0x258] sm:$0xff] %v1365_v40  ;;  %1878 = vst [vmem:[%s2724_s17 + $0x260] sm:$0xff] %v1366_v19  ;;  %v1369_v26 = vcvt.s32.f32 %v857_v14  ;;  %v349_v27 = vunpack.c.2.s8 %v2874_v24  ;;  %v350_v0 = vunpack.c.2.s8 %v2877_v25  ;;  %v351_v1 = vunpack.c.2.s8 %v2880_v51 }
  0x74   : > { %1879 = vst [vmem:[%s2724_s17 + $0x268] sm:$0xff] %v1367_v41  ;;  %1880 = vst [vmem:[%s2724_s17 + $0x270] sm:$0xff] %v1368_v21  ;;  %v1370_v29 = vcvt.s32.f32 %v858_v22  ;;  %v1371_v32 = vcvt.s32.f32 %v859_v23  ;;  %v860_v2 = vand.u32 255, %v348_v46  ;;  %v352_v33 = vunpack.c.2.s8 %v2883_v28 }
  0x75   : > { %1881 = vst [vmem:[%s2724_s17 + $0x278] sm:$0xff] %v1369_v26  ;;  %v861_v6 = vand.u32 255, %v349_v27  ;;  %v862_v35 = vand.u32 255, %v350_v0  ;;  %v863_v7 = vand.u32 255, %v351_v1  ;;  %v353_v8 = vunpack.c.2.s8 %v2888_v34 }
  0x76   : > { %1882 = vst [vmem:[%s2724_s17 + $0x280] sm:$0xff] %v1370_v29  ;;  %1883 = vst [vmem:[%s2724_s17 + $0x288] sm:$0xff] %v1371_v32  ;;  %v1372_v37 = vcvt.s32.f32 %v860_v2  ;;  %v864_v38 = vand.u32 255, %v352_v33  ;;  %v354_v39 = vunpack.c.3.s8 %v2857_v12  ;;  %v355_v13 = vunpack.c.3.s8 %v2860_v15 }
  0x77   : > { %v1373_v42 = vcvt.s32.f32 %v861_v6  ;;  %v1374_v43 = vcvt.s32.f32 %v862_v35  ;;  %v1375_v44 = vcvt.s32.f32 %v863_v7  ;;  %v865_v45 = vand.u32 255, %v353_v8 }
  0x78   : > { %1884 = vst [vmem:[%s2724_s17 + $0x290] sm:$0xff] %v1372_v37  ;;  %v1376_v47 = vcvt.s32.f32 %v864_v38  ;;  %v866_v48 = vand.u32 255, %v354_v39  ;;  %v867_v49 = vand.u32 255, %v355_v13  ;;  %v356_v50 = vunpack.c.3.s8 %v2867_v20 }
  0x79   : > { %1885 = vst [vmem:[%s2724_s17 + $0x298] sm:$0xff] %v1373_v42  ;;  %1886 = vst [vmem:[%s2724_s17 + $0x2a0] sm:$0xff] %v1374_v43  ;;  %v1377_v12 = vcvt.s32.f32 %v865_v45  ;;  %v357_v15 = vunpack.c.3.s8 %v2874_v24  ;;  %v358_v52 = vunpack.c.3.s8 %v2877_v25  ;;  %v359_v53 = vunpack.c.3.s8 %v2880_v51 }
  0x7a   : > { %1887 = vst [vmem:[%s2724_s17 + $0x2a8] sm:$0xff] %v1375_v44  ;;  %1888 = vst [vmem:[%s2724_s17 + $0x2b0] sm:$0xff] %v1376_v47  ;;  %v1378_v56 = vcvt.s32.f32 %v866_v48  ;;  %v1379_v20 = vcvt.s32.f32 %v867_v49  ;;  %v868_v57 = vand.u32 255, %v356_v50  ;;  %v360_v58 = vunpack.c.3.s8 %v2883_v28 }
  0x7b   : > { %1889 = vst [vmem:[%s2724_s17 + $0x2b8] sm:$0xff] %v1377_v12  ;;  %v869_v24 = vand.u32 255, %v357_v15  ;;  %v870_v59 = vand.u32 255, %v358_v52  ;;  %v871_v25 = vand.u32 255, %v359_v53  ;;  %v361_v51 = vunpack.c.3.s8 %v2888_v34  ;;  %v2968_v34 = vld [vmem:[%s2683_s30 + $0xe8] sm:$0xff] }
  0x7c   : > { %1890 = vst [vmem:[%s2724_s17 + $0x2c0] sm:$0xff] %v1378_v56  ;;  %1891 = vst [vmem:[%s2724_s17 + $0x2c8] sm:$0xff] %v1379_v20  ;;  %v1380_v61 = vcvt.s32.f32 %v868_v57  ;;  %v872_v62 = vand.u32 255, %v360_v58  ;;  %v362_v63 = vunpack.c.0.s8 %v2945_v54  ;;  %v363_v28 = vunpack.c.0.s8 %v2948_v55 }
  0x7d   : > { %v1381_v5 = vcvt.s32.f32 %v869_v24  ;;  %v1382_v9 = vcvt.s32.f32 %v870_v59  ;;  %v1383_v30 = vcvt.s32.f32 %v871_v25  ;;  %v873_v31 = vand.u32 255, %v361_v51 }
  0x7e   : > { %1892 = vst [vmem:[%s2724_s17 + $0x2d0] sm:$0xff] %v1380_v61  ;;  %v1384_v11 = vcvt.s32.f32 %v872_v62  ;;  %v874_v16 = vand.u32 255, %v362_v63  ;;  %v875_v36 = vand.u32 255, %v363_v28  ;;  %v364_v17 = vunpack.c.0.s8 %v2955_v60 }
  0x7f   : > { %1893 = vst [vmem:[%s2724_s17 + $0x2d8] sm:$0xff] %v1381_v5  ;;  %1894 = vst [vmem:[%s2724_s17 + $0x2e0] sm:$0xff] %v1382_v9  ;;  %v1385_v40 = vcvt.s32.f32 %v873_v31  ;;  %v365_v19 = vunpack.c.0.s8 %v2962_v3  ;;  %v366_v41 = vunpack.c.0.s8 %v2965_v4  ;;  %v367_v14 = vunpack.c.0.s8 %v2968_v34 }
  0x80   : > { %1895 = vst [vmem:[%s2724_s17 + $0x2e8] sm:$0xff] %v1383_v30  ;;  %1896 = vst [vmem:[%s2724_s17 + $0x2f0] sm:$0xff] %v1384_v11  ;;  %v1386_v21 = vcvt.s32.f32 %v874_v16  ;;  %v1387_v22 = vcvt.s32.f32 %v875_v36  ;;  %v876_v23 = vand.u32 255, %v364_v17  ;;  %v368_v46 = vunpack.c.0.s8 %v2971_v10 }
  0x81   : > { %1897 = vst [vmem:[%s2724_s17 + $0x2f8] sm:$0xff] %v1385_v40  ;;  %v877_v26 = vand.u32 255, %v365_v19  ;;  %v878_v27 = vand.u32 255, %v366_v41  ;;  %v879_v0 = vand.u32 255, %v367_v14  ;;  %v369_v1 = vunpack.c.0.s8 %v2976_v18 }
  0x82   : > { %1898 = vst [vmem:[%s2724_s17 + $0x300] sm:$0xff] %v1386_v21  ;;  %1899 = vst [vmem:[%s2724_s17 + $0x308] sm:$0xff] %v1387_v22  ;;  %v1388_v29 = vcvt.s32.f32 %v876_v23  ;;  %v880_v32 = vand.u32 255, %v368_v46  ;;  %v370_v2 = vunpack.c.1.s8 %v2945_v54  ;;  %v371_v33 = vunpack.c.1.s8 %v2948_v55 }
  0x83   : > { %v1389_v6 = vcvt.s32.f32 %v877_v26  ;;  %v1390_v35 = vcvt.s32.f32 %v878_v27  ;;  %v1391_v7 = vcvt.s32.f32 %v879_v0  ;;  %v881_v8 = vand.u32 255, %v369_v1 }
  0x84   : > { %1900 = vst [vmem:[%s2724_s17 + $0x310] sm:$0xff] %v1388_v29  ;;  %v1392_v37 = vcvt.s32.f32 %v880_v32  ;;  %v882_v38 = vand.u32 255, %v370_v2  ;;  %v883_v39 = vand.u32 255, %v371_v33  ;;  %v372_v13 = vunpack.c.1.s8 %v2955_v60 }
  0x85   : > { %1901 = vst [vmem:[%s2724_s17 + $0x318] sm:$0xff] %v1389_v6  ;;  %1902 = vst [vmem:[%s2724_s17 + $0x320] sm:$0xff] %v1390_v35  ;;  %v1393_v42 = vcvt.s32.f32 %v881_v8  ;;  %v373_v43 = vunpack.c.1.s8 %v2962_v3  ;;  %v374_v44 = vunpack.c.1.s8 %v2965_v4  ;;  %v375_v45 = vunpack.c.1.s8 %v2968_v34  ;;  %v3036_v8 = vld [vmem:[%s2683_s30 + $0x108] sm:$0xff] }
  0x86   : > { %1903 = vst [vmem:[%s2724_s17 + $0x328] sm:$0xff] %v1391_v7  ;;  %1904 = vst [vmem:[%s2724_s17 + $0x330] sm:$0xff] %v1392_v37  ;;  %v1394_v47 = vcvt.s32.f32 %v882_v38  ;;  %v1395_v48 = vcvt.s32.f32 %v883_v39  ;;  %v884_v49 = vand.u32 255, %v372_v13  ;;  %v376_v50 = vunpack.c.1.s8 %v2971_v10  ;;  %v3033_v7 = vld [vmem:[%s2683_s30 + $0x100] sm:$0xff] }
  0x87   : > { %1905 = vst [vmem:[%s2724_s17 + $0x338] sm:$0xff] %v1393_v42  ;;  %v885_v12 = vand.u32 255, %v373_v43  ;;  %v886_v15 = vand.u32 255, %v374_v44  ;;  %v887_v52 = vand.u32 255, %v375_v45  ;;  %v377_v53 = vunpack.c.1.s8 %v2976_v18  ;;  %v3043_v42 = vld [vmem:[%s2683_s30 + $0x110] sm:$0xff] }
  0x88   : > { %1906 = vst [vmem:[%s2724_s17 + $0x340] sm:$0xff] %v1394_v47  ;;  %1907 = vst [vmem:[%s2724_s17 + $0x348] sm:$0xff] %v1395_v48  ;;  %v1396_v56 = vcvt.s32.f32 %v884_v49  ;;  %v888_v20 = vand.u32 255, %v376_v50  ;;  %v378_v57 = vunpack.c.2.s8 %v2945_v54  ;;  %v379_v58 = vunpack.c.2.s8 %v2948_v55  ;;  %v3050_v47 = vld [vmem:[%s2683_s30 + $0x118] sm:$0xff]  ;;  %v3053_v48 = vld [vmem:[%s2683_s30 + $0x120] sm:$0xff] }
  0x89   : > { %v1397_v24 = vcvt.s32.f32 %v885_v12  ;;  %v1398_v59 = vcvt.s32.f32 %v886_v15  ;;  %v1399_v25 = vcvt.s32.f32 %v887_v52  ;;  %v889_v51 = vand.u32 255, %v377_v53  ;;  %v3059_v52 = vld [vmem:[%s2683_s30 + $0x130] sm:$0xff] }
  0x8a   : > { %1908 = vst [vmem:[%s2724_s17 + $0x350] sm:$0xff] %v1396_v56  ;;  %v1400_v61 = vcvt.s32.f32 %v888_v20  ;;  %v890_v62 = vand.u32 255, %v378_v57  ;;  %v891_v63 = vand.u32 255, %v379_v58  ;;  %v380_v28 = vunpack.c.2.s8 %v2955_v60  ;;  %v3064_v58 = vld [vmem:[%s2683_s30 + $0x138] sm:$0xff] }
  0x8b   : > { %1909 = vst [vmem:[%s2724_s17 + $0x358] sm:$0xff] %v1397_v24  ;;  %1910 = vst [vmem:[%s2724_s17 + $0x360] sm:$0xff] %v1398_v59  ;;  %v1401_v5 = vcvt.s32.f32 %v889_v51  ;;  %v381_v9 = vunpack.c.2.s8 %v2962_v3  ;;  %v382_v30 = vunpack.c.2.s8 %v2965_v4  ;;  %v383_v31 = vunpack.c.2.s8 %v2968_v34 }
  0x8c   : > { %1911 = vst [vmem:[%s2724_s17 + $0x368] sm:$0xff] %v1399_v25  ;;  %1912 = vst [vmem:[%s2724_s17 + $0x370] sm:$0xff] %v1400_v61  ;;  %v1402_v11 = vcvt.s32.f32 %v890_v62  ;;  %v1403_v16 = vcvt.s32.f32 %v891_v63  ;;  %v892_v36 = vand.u32 255, %v380_v28  ;;  %v384_v17 = vunpack.c.2.s8 %v2971_v10 }
  0x8d   : > { %1913 = vst [vmem:[%s2724_s17 + $0x378] sm:$0xff] %v1401_v5  ;;  %v893_v40 = vand.u32 255, %v381_v9  ;;  %v894_v19 = vand.u32 255, %v382_v30  ;;  %v895_v41 = vand.u32 255, %v383_v31  ;;  %v385_v14 = vunpack.c.2.s8 %v2976_v18 }
  0x8e   : > { %1914 = vst [vmem:[%s2724_s17 + $0x380] sm:$0xff] %v1402_v11  ;;  %1915 = vst [vmem:[%s2724_s17 + $0x388] sm:$0xff] %v1403_v16  ;;  %v1404_v21 = vcvt.s32.f32 %v892_v36  ;;  %v896_v22 = vand.u32 255, %v384_v17  ;;  %v386_v23 = vunpack.c.3.s8 %v2945_v54  ;;  %v387_v46 = vunpack.c.3.s8 %v2948_v55 }
  0x8f   : > { %v1405_v26 = vcvt.s32.f32 %v893_v40  ;;  %v1406_v27 = vcvt.s32.f32 %v894_v19  ;;  %v1407_v0 = vcvt.s32.f32 %v895_v41  ;;  %v897_v1 = vand.u32 255, %v385_v14 }
  0x90   : > { %1916 = vst [vmem:[%s2724_s17 + $0x390] sm:$0xff] %v1404_v21  ;;  %v1408_v29 = vcvt.s32.f32 %v896_v22  ;;  %v898_v32 = vand.u32 255, %v386_v23  ;;  %v899_v2 = vand.u32 255, %v387_v46  ;;  %v388_v33 = vunpack.c.3.s8 %v2955_v60 }
  0x91   : > { %1917 = vst [vmem:[%s2724_s17 + $0x398] sm:$0xff] %v1405_v26  ;;  %1918 = vst [vmem:[%s2724_s17 + $0x3a0] sm:$0xff] %v1406_v27  ;;  %v1409_v54 = vcvt.s32.f32 %v897_v1  ;;  %v389_v55 = vunpack.c.3.s8 %v2962_v3  ;;  %v390_v6 = vunpack.c.3.s8 %v2965_v4  ;;  %v391_v35 = vunpack.c.3.s8 %v2968_v34 }
  0x92   : > { %1919 = vst [vmem:[%s2724_s17 + $0x3a8] sm:$0xff] %v1407_v0  ;;  %1920 = vst [vmem:[%s2724_s17 + $0x3b0] sm:$0xff] %v1408_v29  ;;  %v1410_v37 = vcvt.s32.f32 %v898_v32  ;;  %v1411_v60 = vcvt.s32.f32 %v899_v2  ;;  %v900_v38 = vand.u32 255, %v388_v33  ;;  %v392_v39 = vunpack.c.3.s8 %v2971_v10 }
  0x93   : > { %1921 = vst [vmem:[%s2724_s17 + $0x3b8] sm:$0xff] %v1409_v54  ;;  %v901_v3 = vand.u32 255, %v389_v55  ;;  %v902_v13 = vand.u32 255, %v390_v6  ;;  %v903_v4 = vand.u32 255, %v391_v35  ;;  %v393_v34 = vunpack.c.3.s8 %v2976_v18  ;;  %v3056_v18 = vld [vmem:[%s2683_s30 + $0x128] sm:$0xff] }
  0x94   : > { %1922 = vst [vmem:[%s2724_s17 + $0x3c0] sm:$0xff] %v1410_v37  ;;  %1923 = vst [vmem:[%s2724_s17 + $0x3c8] sm:$0xff] %v1411_v60  ;;  %v1412_v43 = vcvt.s32.f32 %v900_v38  ;;  %v904_v44 = vand.u32 255, %v392_v39  ;;  %v394_v45 = vunpack.c.0.s8 %v3033_v7  ;;  %v395_v10 = vunpack.c.0.s8 %v3036_v8 }
  0x95   : > { %v1413_v49 = vcvt.s32.f32 %v901_v3  ;;  %v1414_v50 = vcvt.s32.f32 %v902_v13  ;;  %v1415_v12 = vcvt.s32.f32 %v903_v4  ;;  %v905_v15 = vand.u32 255, %v393_v34 }
  0x96   : > { %1924 = vst [vmem:[%s2724_s17 + $0x3d0] sm:$0xff] %v1412_v43  ;;  %v1416_v53 = vcvt.s32.f32 %v904_v44  ;;  %v906_v56 = vand.u32 255, %v394_v45  ;;  %v907_v20 = vand.u32 255, %v395_v10  ;;  %v396_v57 = vunpack.c.0.s8 %v3043_v42 }
  0x97   : > { %1925 = vst [vmem:[%s2724_s17 + $0x3d8] sm:$0xff] %v1413_v49  ;;  %1926 = vst [vmem:[%s2724_s17 + $0x3e0] sm:$0xff] %v1414_v50  ;;  %v1417_v24 = vcvt.s32.f32 %v905_v15  ;;  %v397_v59 = vunpack.c.0.s8 %v3050_v47  ;;  %v398_v25 = vunpack.c.0.s8 %v3053_v48  ;;  %v399_v51 = vunpack.c.0.s8 %v3056_v18 }
  0x98   : > { %1927 = vst [vmem:[%s2724_s17 + $0x3e8] sm:$0xff] %v1415_v12  ;;  %1928 = vst [vmem:[%s2724_s17 + $0x3f0] sm:$0xff] %v1416_v53  ;;  %v1418_v61 = vcvt.s32.f32 %v906_v56  ;;  %v1419_v62 = vcvt.s32.f32 %v907_v20  ;;  %v908_v63 = vand.u32 255, %v396_v57  ;;  %v400_v28 = vunpack.c.0.s8 %v3059_v52 }
  0x99   : > { %1929 = vst [vmem:[%s2724_s17 + $0x3f8] sm:$0xff] %v1417_v24  ;;  %v909_v5 = vand.u32 255, %v397_v59  ;;  %v910_v9 = vand.u32 255, %v398_v25  ;;  %v911_v30 = vand.u32 255, %v399_v51  ;;  %v401_v31 = vunpack.c.0.s8 %v3064_v58 }
  0x9a   : > { %1930 = vst [vmem:[%s2724_s17 + $0x400] sm:$0xff] %v1418_v61  ;;  %1931 = vst [vmem:[%s2724_s17 + $0x408] sm:$0xff] %v1419_v62  ;;  %v1420_v11 = vcvt.s32.f32 %v908_v63  ;;  %v912_v16 = vand.u32 255, %v400_v28  ;;  %v402_v36 = vunpack.c.1.s8 %v3033_v7  ;;  %v403_v17 = vunpack.c.1.s8 %v3036_v8 }
  0x9b   : > { %v1421_v40 = vcvt.s32.f32 %v909_v5  ;;  %v1422_v19 = vcvt.s32.f32 %v910_v9  ;;  %v1423_v41 = vcvt.s32.f32 %v911_v30  ;;  %v913_v14 = vand.u32 255, %v401_v31 }
  0x9c   : > { %1932 = vst [vmem:[%s2724_s17 + $0x410] sm:$0xff] %v1420_v11  ;;  %v1424_v21 = vcvt.s32.f32 %v912_v16  ;;  %v914_v22 = vand.u32 255, %v402_v36  ;;  %v915_v23 = vand.u32 255, %v403_v17  ;;  %v404_v46 = vunpack.c.1.s8 %v3043_v42 }
  0x9d   : > { %1933 = vst [vmem:[%s2724_s17 + $0x418] sm:$0xff] %v1421_v40  ;;  %1934 = vst [vmem:[%s2724_s17 + $0x420] sm:$0xff] %v1422_v19  ;;  %v1425_v26 = vcvt.s32.f32 %v913_v14  ;;  %v405_v27 = vunpack.c.1.s8 %v3050_v47  ;;  %v406_v0 = vunpack.c.1.s8 %v3053_v48  ;;  %v407_v1 = vunpack.c.1.s8 %v3056_v18  ;;  %v3124_v14 = vld [vmem:[%s2683_s30 + $0x148] sm:$0xff] }
  0x9e   : > { %1935 = vst [vmem:[%s2724_s17 + $0x428] sm:$0xff] %v1423_v41  ;;  %1936 = vst [vmem:[%s2724_s17 + $0x430] sm:$0xff] %v1424_v21  ;;  %v1426_v29 = vcvt.s32.f32 %v914_v22  ;;  %v1427_v32 = vcvt.s32.f32 %v915_v23  ;;  %v916_v2 = vand.u32 255, %v404_v46  ;;  %v408_v33 = vunpack.c.1.s8 %v3059_v52  ;;  %v3121_v41 = vld [vmem:[%s2683_s30 + $0x140] sm:$0xff] }
  0x9f   : > { %1937 = vst [vmem:[%s2724_s17 + $0x438] sm:$0xff] %v1425_v26  ;;  %v917_v54 = vand.u32 255, %v405_v27  ;;  %v918_v55 = vand.u32 255, %v406_v0  ;;  %v919_v6 = vand.u32 255, %v407_v1  ;;  %v409_v35 = vunpack.c.1.s8 %v3064_v58  ;;  %v3131_v26 = vld [vmem:[%s2683_s30 + $0x150] sm:$0xff] }
  0xa0   : > { %1938 = vst [vmem:[%s2724_s17 + $0x440] sm:$0xff] %v1426_v29  ;;  %1939 = vst [vmem:[%s2724_s17 + $0x448] sm:$0xff] %v1427_v32  ;;  %v1428_v37 = vcvt.s32.f32 %v916_v2  ;;  %v920_v60 = vand.u32 255, %v408_v33  ;;  %v410_v38 = vunpack.c.2.s8 %v3033_v7  ;;  %v411_v39 = vunpack.c.2.s8 %v3036_v8  ;;  %v3138_v29 = vld [vmem:[%s2683_s30 + $0x158] sm:$0xff]  ;;  %v3141_v32 = vld [vmem:[%s2683_s30 + $0x160] sm:$0xff] }
  0xa1   : > { %v1429_v3 = vcvt.s32.f32 %v917_v54  ;;  %v1430_v13 = vcvt.s32.f32 %v918_v55  ;;  %v1431_v4 = vcvt.s32.f32 %v919_v6  ;;  %v921_v34 = vand.u32 255, %v409_v35  ;;  %v3147_v6 = vld [vmem:[%s2683_s30 + $0x170] sm:$0xff] }
  0xa2   : > { %1940 = vst [vmem:[%s2724_s17 + $0x450] sm:$0xff] %v1428_v37  ;;  %v1432_v43 = vcvt.s32.f32 %v920_v60  ;;  %v922_v44 = vand.u32 255, %v410_v38  ;;  %v923_v45 = vand.u32 255, %v411_v39  ;;  %v412_v10 = vunpack.c.2.s8 %v3043_v42  ;;  %v3152_v39 = vld [vmem:[%s2683_s30 + $0x178] sm:$0xff] }
  0xa3   : > { %1941 = vst [vmem:[%s2724_s17 + $0x458] sm:$0xff] %v1429_v3  ;;  %1942 = vst [vmem:[%s2724_s17 + $0x460] sm:$0xff] %v1430_v13  ;;  %v1433_v49 = vcvt.s32.f32 %v921_v34  ;;  %v413_v50 = vunpack.c.2.s8 %v3050_v47  ;;  %v414_v12 = vunpack.c.2.s8 %v3053_v48  ;;  %v415_v15 = vunpack.c.2.s8 %v3056_v18 }
  0xa4   : > { %1943 = vst [vmem:[%s2724_s17 + $0x468] sm:$0xff] %v1431_v4  ;;  %1944 = vst [vmem:[%s2724_s17 + $0x470] sm:$0xff] %v1432_v43  ;;  %v1434_v53 = vcvt.s32.f32 %v922_v44  ;;  %v1435_v56 = vcvt.s32.f32 %v923_v45  ;;  %v924_v20 = vand.u32 255, %v412_v10  ;;  %v416_v57 = vunpack.c.2.s8 %v3059_v52 }
  0xa5   : > { %1945 = vst [vmem:[%s2724_s17 + $0x478] sm:$0xff] %v1433_v49  ;;  %v925_v24 = vand.u32 255, %v413_v50  ;;  %v926_v59 = vand.u32 255, %v414_v12  ;;  %v927_v25 = vand.u32 255, %v415_v15  ;;  %v417_v51 = vunpack.c.2.s8 %v3064_v58 }
  0xa6   : > { %1946 = vst [vmem:[%s2724_s17 + $0x480] sm:$0xff] %v1434_v53  ;;  %1947 = vst [vmem:[%s2724_s17 + $0x488] sm:$0xff] %v1435_v56  ;;  %v1436_v61 = vcvt.s32.f32 %v924_v20  ;;  %v928_v62 = vand.u32 255, %v416_v57  ;;  %v418_v63 = vunpack.c.3.s8 %v3033_v7  ;;  %v419_v28 = vunpack.c.3.s8 %v3036_v8 }
  0xa7   : > { %v1437_v5 = vcvt.s32.f32 %v925_v24  ;;  %v1438_v9 = vcvt.s32.f32 %v926_v59  ;;  %v1439_v30 = vcvt.s32.f32 %v927_v25  ;;  %v929_v31 = vand.u32 255, %v417_v51 }
  0xa8   : > { %1948 = vst [vmem:[%s2724_s17 + $0x490] sm:$0xff] %v1436_v61  ;;  %v1440_v11 = vcvt.s32.f32 %v928_v62  ;;  %v930_v16 = vand.u32 255, %v418_v63  ;;  %v931_v36 = vand.u32 255, %v419_v28  ;;  %v420_v17 = vunpack.c.3.s8 %v3043_v42 }
  0xa9   : > { %1949 = vst [vmem:[%s2724_s17 + $0x498] sm:$0xff] %v1437_v5  ;;  %1950 = vst [vmem:[%s2724_s17 + $0x4a0] sm:$0xff] %v1438_v9  ;;  %v1441_v7 = vcvt.s32.f32 %v929_v31  ;;  %v421_v8 = vunpack.c.3.s8 %v3050_v47  ;;  %v422_v40 = vunpack.c.3.s8 %v3053_v48  ;;  %v423_v19 = vunpack.c.3.s8 %v3056_v18 }
  0xaa   : > { %1951 = vst [vmem:[%s2724_s17 + $0x4a8] sm:$0xff] %v1439_v30  ;;  %1952 = vst [vmem:[%s2724_s17 + $0x4b0] sm:$0xff] %v1440_v11  ;;  %v1442_v21 = vcvt.s32.f32 %v930_v16  ;;  %v1443_v42 = vcvt.s32.f32 %v931_v36  ;;  %v932_v22 = vand.u32 255, %v420_v17  ;;  %v424_v23 = vunpack.c.3.s8 %v3059_v52 }
  0xab   : > { %1953 = vst [vmem:[%s2724_s17 + $0x4b8] sm:$0xff] %v1441_v7  ;;  %v933_v47 = vand.u32 255, %v421_v8  ;;  %v934_v46 = vand.u32 255, %v422_v40  ;;  %v935_v48 = vand.u32 255, %v423_v19  ;;  %v425_v18 = vunpack.c.3.s8 %v3064_v58  ;;  %v3144_v58 = vld [vmem:[%s2683_s30 + $0x168] sm:$0xff] }
  0xac   : > { %1954 = vst [vmem:[%s2724_s17 + $0x4c0] sm:$0xff] %v1442_v21  ;;  %1955 = vst [vmem:[%s2724_s17 + $0x4c8] sm:$0xff] %v1443_v42  ;;  %v1444_v27 = vcvt.s32.f32 %v932_v22  ;;  %v936_v0 = vand.u32 255, %v424_v23  ;;  %v426_v1 = vunpack.c.0.s8 %v3121_v41  ;;  %v427_v52 = vunpack.c.0.s8 %v3124_v14 }
  0xad   : > { %v1445_v2 = vcvt.s32.f32 %v933_v47  ;;  %v1446_v33 = vcvt.s32.f32 %v934_v46  ;;  %v1447_v54 = vcvt.s32.f32 %v935_v48  ;;  %v937_v55 = vand.u32 255, %v425_v18 }
  0xae   : > { %1956 = vst [vmem:[%s2724_s17 + $0x4d0] sm:$0xff] %v1444_v27  ;;  %v1448_v35 = vcvt.s32.f32 %v936_v0  ;;  %v938_v37 = vand.u32 255, %v426_v1  ;;  %v939_v60 = vand.u32 255, %v427_v52  ;;  %v428_v38 = vunpack.c.0.s8 %v3131_v26 }
  0xaf   : > { %1957 = vst [vmem:[%s2724_s17 + $0x4d8] sm:$0xff] %v1445_v2  ;;  %1958 = vst [vmem:[%s2724_s17 + $0x4e0] sm:$0xff] %v1446_v33  ;;  %v1449_v3 = vcvt.s32.f32 %v937_v55  ;;  %v429_v13 = vunpack.c.0.s8 %v3138_v29  ;;  %v430_v4 = vunpack.c.0.s8 %v3141_v32  ;;  %v431_v34 = vunpack.c.0.s8 %v3144_v58 }
  0xb0   : > { %1959 = vst [vmem:[%s2724_s17 + $0x4e8] sm:$0xff] %v1447_v54  ;;  %1960 = vst [vmem:[%s2724_s17 + $0x4f0] sm:$0xff] %v1448_v35  ;;  %v1450_v43 = vcvt.s32.f32 %v938_v37  ;;  %v1451_v44 = vcvt.s32.f32 %v939_v60  ;;  %v940_v45 = vand.u32 255, %v428_v38  ;;  %v432_v10 = vunpack.c.0.s8 %v3147_v6 }
  0xb1   : > { %1961 = vst [vmem:[%s2724_s17 + $0x4f8] sm:$0xff] %v1449_v3  ;;  %v941_v49 = vand.u32 255, %v429_v13  ;;  %v942_v50 = vand.u32 255, %v430_v4  ;;  %v943_v12 = vand.u32 255, %v431_v34  ;;  %v433_v15 = vunpack.c.0.s8 %v3152_v39 }
  0xb2   : > { %1962 = vst [vmem:[%s2724_s17 + $0x500] sm:$0xff] %v1450_v43  ;;  %1963 = vst [vmem:[%s2724_s17 + $0x508] sm:$0xff] %v1451_v44  ;;  %v1452_v53 = vcvt.s32.f32 %v940_v45  ;;  %v944_v56 = vand.u32 255, %v432_v10  ;;  %v434_v20 = vunpack.c.1.s8 %v3121_v41  ;;  %v435_v57 = vunpack.c.1.s8 %v3124_v14 }
  0xb3   : > { %v1453_v24 = vcvt.s32.f32 %v941_v49  ;;  %v1454_v59 = vcvt.s32.f32 %v942_v50  ;;  %v1455_v25 = vcvt.s32.f32 %v943_v12  ;;  %v945_v51 = vand.u32 255, %v433_v15 }
  0xb4   : > { %1964 = vst [vmem:[%s2724_s17 + $0x510] sm:$0xff] %v1452_v53  ;;  %v1456_v61 = vcvt.s32.f32 %v944_v56  ;;  %v946_v62 = vand.u32 255, %v434_v20  ;;  %v947_v63 = vand.u32 255, %v435_v57  ;;  %v436_v28 = vunpack.c.1.s8 %v3131_v26 }
  0xb5   : > { %1965 = vst [vmem:[%s2724_s17 + $0x518] sm:$0xff] %v1453_v24  ;;  %1966 = vst [vmem:[%s2724_s17 + $0x520] sm:$0xff] %v1454_v59  ;;  %v1457_v5 = vcvt.s32.f32 %v945_v51  ;;  %v437_v9 = vunpack.c.1.s8 %v3138_v29  ;;  %v438_v30 = vunpack.c.1.s8 %v3141_v32  ;;  %v439_v31 = vunpack.c.1.s8 %v3144_v58  ;;  %v3212_v51 = vld [vmem:[%s2683_s30 + $0x188] sm:$0xff] }
  0xb6   : > { %1967 = vst [vmem:[%s2724_s17 + $0x528] sm:$0xff] %v1455_v25  ;;  %1968 = vst [vmem:[%s2724_s17 + $0x530] sm:$0xff] %v1456_v61  ;;  %v1458_v11 = vcvt.s32.f32 %v946_v62  ;;  %v1459_v16 = vcvt.s32.f32 %v947_v63  ;;  %v948_v36 = vand.u32 255, %v436_v28  ;;  %v440_v17 = vunpack.c.1.s8 %v3147_v6  ;;  %v3209_v25 = vld [vmem:[%s2683_s30 + $0x180] sm:$0xff] }
  0xb7   : > { %1969 = vst [vmem:[%s2724_s17 + $0x538] sm:$0xff] %v1457_v5  ;;  %v949_v7 = vand.u32 255, %v437_v9  ;;  %v950_v8 = vand.u32 255, %v438_v30  ;;  %v951_v40 = vand.u32 255, %v439_v31  ;;  %v441_v19 = vunpack.c.1.s8 %v3152_v39  ;;  %v3219_v5 = vld [vmem:[%s2683_s30 + $0x190] sm:$0xff] }
  0xb8   : > { %1970 = vst [vmem:[%s2724_s17 + $0x540] sm:$0xff] %v1458_v11  ;;  %1971 = vst [vmem:[%s2724_s17 + $0x548] sm:$0xff] %v1459_v16  ;;  %v1460_v21 = vcvt.s32.f32 %v948_v36  ;;  %v952_v42 = vand.u32 255, %v440_v17  ;;  %v442_v22 = vunpack.c.2.s8 %v3121_v41  ;;  %v443_v23 = vunpack.c.2.s8 %v3124_v14  ;;  %v3226_v11 = vld [vmem:[%s2683_s30 + $0x198] sm:$0xff]  ;;  %v3229_v16 = vld [vmem:[%s2683_s30 + $0x1a0] sm:$0xff] }
  0xb9   : > { %v1461_v47 = vcvt.s32.f32 %v949_v7  ;;  %v1462_v46 = vcvt.s32.f32 %v950_v8  ;;  %v1463_v48 = vcvt.s32.f32 %v951_v40  ;;  %v953_v18 = vand.u32 255, %v441_v19  ;;  %v3235_v40 = vld [vmem:[%s2683_s30 + $0x1b0] sm:$0xff] }
  0xba   : > { %1972 = vst [vmem:[%s2724_s17 + $0x550] sm:$0xff] %v1460_v21  ;;  %v1464_v27 = vcvt.s32.f32 %v952_v42  ;;  %v954_v0 = vand.u32 255, %v442_v22  ;;  %v955_v1 = vand.u32 255, %v443_v23  ;;  %v444_v52 = vunpack.c.2.s8 %v3131_v26  ;;  %v3240_v23 = vld [vmem:[%s2683_s30 + $0x1b8] sm:$0xff] }
  0xbb   : > { %1973 = vst [vmem:[%s2724_s17 + $0x558] sm:$0xff] %v1461_v47  ;;  %1974 = vst [vmem:[%s2724_s17 + $0x560] sm:$0xff] %v1462_v46  ;;  %v1465_v2 = vcvt.s32.f32 %v953_v18  ;;  %v445_v33 = vunpack.c.2.s8 %v3138_v29  ;;  %v446_v54 = vunpack.c.2.s8 %v3141_v32  ;;  %v447_v55 = vunpack.c.2.s8 %v3144_v58 }
  0xbc   : > { %1975 = vst [vmem:[%s2724_s17 + $0x568] sm:$0xff] %v1463_v48  ;;  %1976 = vst [vmem:[%s2724_s17 + $0x570] sm:$0xff] %v1464_v27  ;;  %v1466_v35 = vcvt.s32.f32 %v954_v0  ;;  %v1467_v37 = vcvt.s32.f32 %v955_v1  ;;  %v956_v60 = vand.u32 255, %v444_v52  ;;  %v448_v38 = vunpack.c.2.s8 %v3147_v6 }
  0xbd   : > { %1977 = vst [vmem:[%s2724_s17 + $0x578] sm:$0xff] %v1465_v2  ;;  %v957_v3 = vand.u32 255, %v445_v33  ;;  %v958_v13 = vand.u32 255, %v446_v54  ;;  %v959_v4 = vand.u32 255, %v447_v55  ;;  %v449_v34 = vunpack.c.2.s8 %v3152_v39 }
  0xbe   : > { %1978 = vst [vmem:[%s2724_s17 + $0x580] sm:$0xff] %v1466_v35  ;;  %1979 = vst [vmem:[%s2724_s17 + $0x588] sm:$0xff] %v1467_v37  ;;  %v1468_v43 = vcvt.s32.f32 %v956_v60  ;;  %v960_v44 = vand.u32 255, %v448_v38  ;;  %v450_v45 = vunpack.c.3.s8 %v3121_v41  ;;  %v451_v10 = vunpack.c.3.s8 %v3124_v14 }
  0xbf   : > { %v1469_v49 = vcvt.s32.f32 %v957_v3  ;;  %v1470_v50 = vcvt.s32.f32 %v958_v13  ;;  %v1471_v12 = vcvt.s32.f32 %v959_v4  ;;  %v961_v15 = vand.u32 255, %v449_v34 }
  0xc0   : > { %1980 = vst [vmem:[%s2724_s17 + $0x590] sm:$0xff] %v1468_v43  ;;  %v1472_v53 = vcvt.s32.f32 %v960_v44  ;;  %v962_v56 = vand.u32 255, %v450_v45  ;;  %v963_v20 = vand.u32 255, %v451_v10  ;;  %v452_v57 = vunpack.c.3.s8 %v3131_v26 }
  0xc1   : > { %1981 = vst [vmem:[%s2724_s17 + $0x598] sm:$0xff] %v1469_v49  ;;  %1982 = vst [vmem:[%s2724_s17 + $0x5a0] sm:$0xff] %v1470_v50  ;;  %v1473_v41 = vcvt.s32.f32 %v961_v15  ;;  %v453_v14 = vunpack.c.3.s8 %v3138_v29  ;;  %v454_v24 = vunpack.c.3.s8 %v3141_v32  ;;  %v455_v59 = vunpack.c.3.s8 %v3144_v58 }
  0xc2   : > { %1983 = vst [vmem:[%s2724_s17 + $0x5a8] sm:$0xff] %v1471_v12  ;;  %1984 = vst [vmem:[%s2724_s17 + $0x5b0] sm:$0xff] %v1472_v53  ;;  %v1474_v61 = vcvt.s32.f32 %v962_v56  ;;  %v1475_v26 = vcvt.s32.f32 %v963_v20  ;;  %v964_v62 = vand.u32 255, %v452_v57  ;;  %v456_v63 = vunpack.c.3.s8 %v3147_v6 }
  0xc3   : > { %1985 = vst [vmem:[%s2724_s17 + $0x5b8] sm:$0xff] %v1473_v41  ;;  %v965_v29 = vand.u32 255, %v453_v14  ;;  %v966_v28 = vand.u32 255, %v454_v24  ;;  %v967_v32 = vand.u32 255, %v455_v59  ;;  %v457_v58 = vunpack.c.3.s8 %v3152_v39  ;;  %v3232_v39 = vld [vmem:[%s2683_s30 + $0x1a8] sm:$0xff] }
  0xc4   : > { %1986 = vst [vmem:[%s2724_s17 + $0x5c0] sm:$0xff] %v1474_v61  ;;  %1987 = vst [vmem:[%s2724_s17 + $0x5c8] sm:$0xff] %v1475_v26  ;;  %v1476_v9 = vcvt.s32.f32 %v964_v62  ;;  %v968_v30 = vand.u32 255, %v456_v63  ;;  %v458_v31 = vunpack.c.0.s8 %v3209_v25  ;;  %v459_v6 = vunpack.c.0.s8 %v3212_v51 }
  0xc5   : > { %v1477_v36 = vcvt.s32.f32 %v965_v29  ;;  %v1478_v17 = vcvt.s32.f32 %v966_v28  ;;  %v1479_v7 = vcvt.s32.f32 %v967_v32  ;;  %v969_v8 = vand.u32 255, %v457_v58 }
  0xc6   : > { %1988 = vst [vmem:[%s2724_s17 + $0x5d0] sm:$0xff] %v1476_v9  ;;  %v1480_v19 = vcvt.s32.f32 %v968_v30  ;;  %v970_v21 = vand.u32 255, %v458_v31  ;;  %v971_v42 = vand.u32 255, %v459_v6  ;;  %v460_v22 = vunpack.c.0.s8 %v3219_v5 }
  0xc7   : > { %1989 = vst [vmem:[%s2724_s17 + $0x5d8] sm:$0xff] %v1477_v36  ;;  %1990 = vst [vmem:[%s2724_s17 + $0x5e0] sm:$0xff] %v1478_v17  ;;  %v1481_v47 = vcvt.s32.f32 %v969_v8  ;;  %v461_v46 = vunpack.c.0.s8 %v3226_v11  ;;  %v462_v48 = vunpack.c.0.s8 %v3229_v16  ;;  %v463_v18 = vunpack.c.0.s8 %v3232_v39 }
  0xc8   : > { %1991 = vst [vmem:[%s2724_s17 + $0x5e8] sm:$0xff] %v1479_v7  ;;  %1992 = vst [vmem:[%s2724_s17 + $0x5f0] sm:$0xff] %v1480_v19  ;;  %v1482_v27 = vcvt.s32.f32 %v970_v21  ;;  %v1483_v0 = vcvt.s32.f32 %v971_v42  ;;  %v972_v1 = vand.u32 255, %v460_v22  ;;  %v464_v52 = vunpack.c.0.s8 %v3235_v40 }
  0xc9   : > { %1993 = vst [vmem:[%s2724_s17 + $0x5f8] sm:$0xff] %v1481_v47  ;;  %v973_v2 = vand.u32 255, %v461_v46  ;;  %v974_v33 = vand.u32 255, %v462_v48  ;;  %v975_v54 = vand.u32 255, %v463_v18  ;;  %v465_v55 = vunpack.c.0.s8 %v3240_v23 }
  0xca   : > { %1994 = vst [vmem:[%s2724_s17 + $0x600] sm:$0xff] %v1482_v27  ;;  %1995 = vst [vmem:[%s2724_s17 + $0x608] sm:$0xff] %v1483_v0  ;;  %v1484_v35 = vcvt.s32.f32 %v972_v1  ;;  %v976_v37 = vand.u32 255, %v464_v52  ;;  %v466_v60 = vunpack.c.1.s8 %v3209_v25  ;;  %v467_v38 = vunpack.c.1.s8 %v3212_v51 }
  0xcb   : > { %v1485_v3 = vcvt.s32.f32 %v973_v2  ;;  %v1486_v13 = vcvt.s32.f32 %v974_v33  ;;  %v1487_v4 = vcvt.s32.f32 %v975_v54  ;;  %v977_v34 = vand.u32 255, %v465_v55 }
  0xcc   : > { %1996 = vst [vmem:[%s2724_s17 + $0x610] sm:$0xff] %v1484_v35  ;;  %v1488_v43 = vcvt.s32.f32 %v976_v37  ;;  %v978_v44 = vand.u32 255, %v466_v60  ;;  %v979_v45 = vand.u32 255, %v467_v38  ;;  %v468_v10 = vunpack.c.1.s8 %v3219_v5 }
  0xcd   : > { %1997 = vst [vmem:[%s2724_s17 + $0x618] sm:$0xff] %v1485_v3  ;;  %1998 = vst [vmem:[%s2724_s17 + $0x620] sm:$0xff] %v1486_v13  ;;  %v1489_v49 = vcvt.s32.f32 %v977_v34  ;;  %v469_v50 = vunpack.c.1.s8 %v3226_v11  ;;  %v470_v12 = vunpack.c.1.s8 %v3229_v16  ;;  %v471_v15 = vunpack.c.1.s8 %v3232_v39  ;;  %v3300_v34 = vld [vmem:[%s2683_s30 + $0x1c8] sm:$0xff] }
  0xce   : > { %1999 = vst [vmem:[%s2724_s17 + $0x628] sm:$0xff] %v1487_v4  ;;  %2000 = vst [vmem:[%s2724_s17 + $0x630] sm:$0xff] %v1488_v43  ;;  %v1490_v53 = vcvt.s32.f32 %v978_v44  ;;  %v1491_v56 = vcvt.s32.f32 %v979_v45  ;;  %v980_v20 = vand.u32 255, %v468_v10  ;;  %v472_v57 = vunpack.c.1.s8 %v3235_v40  ;;  %v3297_v4 = vld [vmem:[%s2683_s30 + $0x1c0] sm:$0xff] }
  0xcf   : > { %2001 = vst [vmem:[%s2724_s17 + $0x638] sm:$0xff] %v1489_v49  ;;  %v981_v41 = vand.u32 255, %v469_v50  ;;  %v982_v14 = vand.u32 255, %v470_v12  ;;  %v983_v24 = vand.u32 255, %v471_v15  ;;  %v473_v59 = vunpack.c.1.s8 %v3240_v23  ;;  %v3307_v49 = vld [vmem:[%s2683_s30 + $0x1d0] sm:$0xff] }
  0xd0   : > { %2002 = vst [vmem:[%s2724_s17 + $0x640] sm:$0xff] %v1490_v53  ;;  %2003 = vst [vmem:[%s2724_s17 + $0x648] sm:$0xff] %v1491_v56  ;;  %v1492_v61 = vcvt.s32.f32 %v980_v20  ;;  %v984_v26 = vand.u32 255, %v472_v57  ;;  %v474_v62 = vunpack.c.2.s8 %v3209_v25  ;;  %v475_v63 = vunpack.c.2.s8 %v3212_v51  ;;  %v3314_v53 = vld [vmem:[%s2683_s30 + $0x1d8] sm:$0xff]  ;;  %v3317_v56 = vld [vmem:[%s2683_s30 + $0x1e0] sm:$0xff] }
  0xd1   : > { %v1493_v29 = vcvt.s32.f32 %v981_v41  ;;  %v1494_v28 = vcvt.s32.f32 %v982_v14  ;;  %v1495_v32 = vcvt.s32.f32 %v983_v24  ;;  %v985_v58 = vand.u32 255, %v473_v59  ;;  %v3323_v24 = vld [vmem:[%s2683_s30 + $0x1f0] sm:$0xff] }
  0xd2   : > { %2004 = vst [vmem:[%s2724_s17 + $0x650] sm:$0xff] %v1492_v61  ;;  %v1496_v9 = vcvt.s32.f32 %v984_v26  ;;  %v986_v30 = vand.u32 255, %v474_v62  ;;  %v987_v31 = vand.u32 255, %v475_v63  ;;  %v476_v6 = vunpack.c.2.s8 %v3219_v5  ;;  %v3328_v63 = vld [vmem:[%s2683_s30 + $0x1f8] sm:$0xff] }
  0xd3   : > { %2005 = vst [vmem:[%s2724_s17 + $0x658] sm:$0xff] %v1493_v29  ;;  %2006 = vst [vmem:[%s2724_s17 + $0x660] sm:$0xff] %v1494_v28  ;;  %v1497_v36 = vcvt.s32.f32 %v985_v58  ;;  %v477_v17 = vunpack.c.2.s8 %v3226_v11  ;;  %v478_v7 = vunpack.c.2.s8 %v3229_v16  ;;  %v479_v8 = vunpack.c.2.s8 %v3232_v39 }
  0xd4   : > { %2007 = vst [vmem:[%s2724_s17 + $0x668] sm:$0xff] %v1495_v32  ;;  %2008 = vst [vmem:[%s2724_s17 + $0x670] sm:$0xff] %v1496_v9  ;;  %v1498_v19 = vcvt.s32.f32 %v986_v30  ;;  %v1499_v21 = vcvt.s32.f32 %v987_v31  ;;  %v988_v42 = vand.u32 255, %v476_v6  ;;  %v480_v22 = vunpack.c.2.s8 %v3235_v40 }
  0xd5   : > { %2009 = vst [vmem:[%s2724_s17 + $0x678] sm:$0xff] %v1497_v36  ;;  %v989_v47 = vand.u32 255, %v477_v17  ;;  %v990_v46 = vand.u32 255, %v478_v7  ;;  %v991_v48 = vand.u32 255, %v479_v8  ;;  %v481_v18 = vunpack.c.2.s8 %v3240_v23 }
  0xd6   : > { %2010 = vst [vmem:[%s2724_s17 + $0x680] sm:$0xff] %v1498_v19  ;;  %2011 = vst [vmem:[%s2724_s17 + $0x688] sm:$0xff] %v1499_v21  ;;  %v1500_v27 = vcvt.s32.f32 %v988_v42  ;;  %v992_v0 = vand.u32 255, %v480_v22  ;;  %v482_v1 = vunpack.c.3.s8 %v3209_v25  ;;  %v483_v52 = vunpack.c.3.s8 %v3212_v51 }
  0xd7   : > { %v1501_v2 = vcvt.s32.f32 %v989_v47  ;;  %v1502_v33 = vcvt.s32.f32 %v990_v46  ;;  %v1503_v54 = vcvt.s32.f32 %v991_v48  ;;  %v993_v55 = vand.u32 255, %v481_v18 }
  0xd8   : > { %2012 = vst [vmem:[%s2724_s17 + $0x690] sm:$0xff] %v1500_v27  ;;  %v1504_v35 = vcvt.s32.f32 %v992_v0  ;;  %v994_v37 = vand.u32 255, %v482_v1  ;;  %v995_v60 = vand.u32 255, %v483_v52  ;;  %v484_v38 = vunpack.c.3.s8 %v3219_v5 }
  0xd9   : > { %2013 = vst [vmem:[%s2724_s17 + $0x698] sm:$0xff] %v1501_v2  ;;  %2014 = vst [vmem:[%s2724_s17 + $0x6a0] sm:$0xff] %v1502_v33  ;;  %v1505_v25 = vcvt.s32.f32 %v993_v55  ;;  %v485_v51 = vunpack.c.3.s8 %v3226_v11  ;;  %v486_v3 = vunpack.c.3.s8 %v3229_v16  ;;  %v487_v13 = vunpack.c.3.s8 %v3232_v39 }
  0xda   : > { %2015 = vst [vmem:[%s2724_s17 + $0x6a8] sm:$0xff] %v1503_v54  ;;  %2016 = vst [vmem:[%s2724_s17 + $0x6b0] sm:$0xff] %v1504_v35  ;;  %v1506_v43 = vcvt.s32.f32 %v994_v37  ;;  %v1507_v5 = vcvt.s32.f32 %v995_v60  ;;  %v996_v44 = vand.u32 255, %v484_v38  ;;  %v488_v45 = vunpack.c.3.s8 %v3235_v40 }
  0xdb   : > { %2017 = vst [vmem:[%s2724_s17 + $0x6b8] sm:$0xff] %v1505_v25  ;;  %v997_v11 = vand.u32 255, %v485_v51  ;;  %v998_v10 = vand.u32 255, %v486_v3  ;;  %v999_v16 = vand.u32 255, %v487_v13  ;;  %v489_v39 = vunpack.c.3.s8 %v3240_v23  ;;  %v3320_v23 = vld [vmem:[%s2683_s30 + $0x1e8] sm:$0xff] }
  0xdc   : > { %2018 = vst [vmem:[%s2724_s17 + $0x6c0] sm:$0xff] %v1506_v43  ;;  %2019 = vst [vmem:[%s2724_s17 + $0x6c8] sm:$0xff] %v1507_v5  ;;  %v1508_v50 = vcvt.s32.f32 %v996_v44  ;;  %v1000_v12 = vand.u32 255, %v488_v45  ;;  %v490_v15 = vunpack.c.0.s8 %v3297_v4  ;;  %v491_v40 = vunpack.c.0.s8 %v3300_v34 }
  0xdd   : > { %v1509_v20 = vcvt.s32.f32 %v997_v11  ;;  %v1510_v57 = vcvt.s32.f32 %v998_v10  ;;  %v1511_v41 = vcvt.s32.f32 %v999_v16  ;;  %v1001_v14 = vand.u32 255, %v489_v39 }
  0xde   : > { %2020 = vst [vmem:[%s2724_s17 + $0x6d0] sm:$0xff] %v1508_v50  ;;  %v1512_v59 = vcvt.s32.f32 %v1000_v12  ;;  %v1002_v61 = vand.u32 255, %v490_v15  ;;  %v1003_v26 = vand.u32 255, %v491_v40  ;;  %v492_v62 = vunpack.c.0.s8 %v3307_v49 }
  0xdf   : > { %2021 = vst [vmem:[%s2724_s17 + $0x6d8] sm:$0xff] %v1509_v20  ;;  %2022 = vst [vmem:[%s2724_s17 + $0x6e0] sm:$0xff] %v1510_v57  ;;  %v1513_v29 = vcvt.s32.f32 %v1001_v14  ;;  %v493_v28 = vunpack.c.0.s8 %v3314_v53  ;;  %v494_v32 = vunpack.c.0.s8 %v3317_v56  ;;  %v495_v58 = vunpack.c.0.s8 %v3320_v23 }
  0xe0   : > { %2023 = vst [vmem:[%s2724_s17 + $0x6e8] sm:$0xff] %v1511_v41  ;;  %2024 = vst [vmem:[%s2724_s17 + $0x6f0] sm:$0xff] %v1512_v59  ;;  %v1514_v9 = vcvt.s32.f32 %v1002_v61  ;;  %v1515_v30 = vcvt.s32.f32 %v1003_v26  ;;  %v1004_v31 = vand.u32 255, %v492_v62  ;;  %v496_v6 = vunpack.c.0.s8 %v3323_v24 }
  0xe1   : > { %2025 = vst [vmem:[%s2724_s17 + $0x6f8] sm:$0xff] %v1513_v29  ;;  %v1005_v36 = vand.u32 255, %v493_v28  ;;  %v1006_v17 = vand.u32 255, %v494_v32  ;;  %v1007_v7 = vand.u32 255, %v495_v58  ;;  %v497_v8 = vunpack.c.0.s8 %v3328_v63 }
  0xe2   : > { %2026 = vst [vmem:[%s2724_s17 + $0x700] sm:$0xff] %v1514_v9  ;;  %2027 = vst [vmem:[%s2724_s17 + $0x708] sm:$0xff] %v1515_v30  ;;  %v1516_v19 = vcvt.s32.f32 %v1004_v31  ;;  %v1008_v21 = vand.u32 255, %v496_v6  ;;  %v498_v42 = vunpack.c.1.s8 %v3297_v4  ;;  %v499_v22 = vunpack.c.1.s8 %v3300_v34 }
  0xe3   : > { %v1517_v47 = vcvt.s32.f32 %v1005_v36  ;;  %v1518_v46 = vcvt.s32.f32 %v1006_v17  ;;  %v1519_v48 = vcvt.s32.f32 %v1007_v7  ;;  %v1009_v18 = vand.u32 255, %v497_v8 }
  0xe4   : > { %2028 = vst [vmem:[%s2724_s17 + $0x710] sm:$0xff] %v1516_v19  ;;  %v1520_v27 = vcvt.s32.f32 %v1008_v21  ;;  %v1010_v0 = vand.u32 255, %v498_v42  ;;  %v1011_v1 = vand.u32 255, %v499_v22  ;;  %v500_v52 = vunpack.c.1.s8 %v3307_v49 }
  0xe5   : > { %2029 = vst [vmem:[%s2724_s17 + $0x718] sm:$0xff] %v1517_v47  ;;  %2030 = vst [vmem:[%s2724_s17 + $0x720] sm:$0xff] %v1518_v46  ;;  %v1521_v2 = vcvt.s32.f32 %v1009_v18  ;;  %v501_v33 = vunpack.c.1.s8 %v3314_v53  ;;  %v502_v54 = vunpack.c.1.s8 %v3317_v56  ;;  %v503_v55 = vunpack.c.1.s8 %v3320_v23  ;;  %v3388_v18 = vld [vmem:[%s2683_s30 + $0x208] sm:$0xff] }
  0xe6   : > { %2031 = vst [vmem:[%s2724_s17 + $0x728] sm:$0xff] %v1519_v48  ;;  %2032 = vst [vmem:[%s2724_s17 + $0x730] sm:$0xff] %v1520_v27  ;;  %v1522_v35 = vcvt.s32.f32 %v1010_v0  ;;  %v1523_v37 = vcvt.s32.f32 %v1011_v1  ;;  %v1012_v60 = vand.u32 255, %v500_v52  ;;  %v504_v38 = vunpack.c.1.s8 %v3323_v24  ;;  %v3385_v48 = vld [vmem:[%s2683_s30 + $0x200] sm:$0xff] }
  0xe7   : > { %2033 = vst [vmem:[%s2724_s17 + $0x738] sm:$0xff] %v1521_v2  ;;  %v1013_v25 = vand.u32 255, %v501_v33  ;;  %v1014_v51 = vand.u32 255, %v502_v54  ;;  %v1015_v3 = vand.u32 255, %v503_v55  ;;  %v505_v13 = vunpack.c.1.s8 %v3328_v63  ;;  %v3395_v2 = vld [vmem:[%s2683_s30 + $0x210] sm:$0xff] }
  0xe8   : > { %2034 = vst [vmem:[%s2724_s17 + $0x740] sm:$0xff] %v1522_v35  ;;  %2035 = vst [vmem:[%s2724_s17 + $0x748] sm:$0xff] %v1523_v37  ;;  %v1524_v43 = vcvt.s32.f32 %v1012_v60  ;;  %v1016_v5 = vand.u32 255, %v504_v38  ;;  %v506_v44 = vunpack.c.2.s8 %v3297_v4  ;;  %v507_v45 = vunpack.c.2.s8 %v3300_v34  ;;  %v3402_v35 = vld [vmem:[%s2683_s30 + $0x218] sm:$0xff]  ;;  %v3405_v37 = vld [vmem:[%s2683_s30 + $0x220] sm:$0xff] }
  0xe9   : > { %v1525_v11 = vcvt.s32.f32 %v1013_v25  ;;  %v1526_v10 = vcvt.s32.f32 %v1014_v51  ;;  %v1527_v16 = vcvt.s32.f32 %v1015_v3  ;;  %v1017_v39 = vand.u32 255, %v505_v13  ;;  %v3411_v3 = vld [vmem:[%s2683_s30 + $0x230] sm:$0xff] }
  0xea   : > { %2036 = vst [vmem:[%s2724_s17 + $0x750] sm:$0xff] %v1524_v43  ;;  %v1528_v50 = vcvt.s32.f32 %v1016_v5  ;;  %v1018_v12 = vand.u32 255, %v506_v44  ;;  %v1019_v15 = vand.u32 255, %v507_v45  ;;  %v508_v40 = vunpack.c.2.s8 %v3307_v49  ;;  %v3416_v45 = vld [vmem:[%s2683_s30 + $0x238] sm:$0xff] }
  0xeb   : > { %2037 = vst [vmem:[%s2724_s17 + $0x758] sm:$0xff] %v1525_v11  ;;  %2038 = vst [vmem:[%s2724_s17 + $0x760] sm:$0xff] %v1526_v10  ;;  %v1529_v20 = vcvt.s32.f32 %v1017_v39  ;;  %v509_v57 = vunpack.c.2.s8 %v3314_v53  ;;  %v510_v41 = vunpack.c.2.s8 %v3317_v56  ;;  %v511_v14 = vunpack.c.2.s8 %v3320_v23 }
  0xec   : > { %2039 = vst [vmem:[%s2724_s17 + $0x768] sm:$0xff] %v1527_v16  ;;  %2040 = vst [vmem:[%s2724_s17 + $0x770] sm:$0xff] %v1528_v50  ;;  %v1530_v59 = vcvt.s32.f32 %v1018_v12  ;;  %v1531_v61 = vcvt.s32.f32 %v1019_v15  ;;  %v1020_v26 = vand.u32 255, %v508_v40  ;;  %v512_v62 = vunpack.c.2.s8 %v3323_v24 }
  0xed   : > { %2041 = vst [vmem:[%s2724_s17 + $0x778] sm:$0xff] %v1529_v20  ;;  %v1021_v29 = vand.u32 255, %v509_v57  ;;  %v1022_v28 = vand.u32 255, %v510_v41  ;;  %v1023_v32 = vand.u32 255, %v511_v14  ;;  %v513_v58 = vunpack.c.2.s8 %v3328_v63 }
  0xee   : > { %2042 = vst [vmem:[%s2724_s17 + $0x780] sm:$0xff] %v1530_v59  ;;  %2043 = vst [vmem:[%s2724_s17 + $0x788] sm:$0xff] %v1531_v61  ;;  %v1532_v9 = vcvt.s32.f32 %v1020_v26  ;;  %v1024_v30 = vand.u32 255, %v512_v62  ;;  %v514_v31 = vunpack.c.3.s8 %v3297_v4  ;;  %v515_v6 = vunpack.c.3.s8 %v3300_v34 }
  0xef   : > { %v1533_v36 = vcvt.s32.f32 %v1021_v29  ;;  %v1534_v17 = vcvt.s32.f32 %v1022_v28  ;;  %v1535_v7 = vcvt.s32.f32 %v1023_v32  ;;  %v1025_v8 = vand.u32 255, %v513_v58 }
  0xf0   : > { %2044 = vst [vmem:[%s2724_s17 + $0x790] sm:$0xff] %v1532_v9  ;;  %v1536_v19 = vcvt.s32.f32 %v1024_v30  ;;  %v1026_v21 = vand.u32 255, %v514_v31  ;;  %v1027_v42 = vand.u32 255, %v515_v6  ;;  %v516_v22 = vunpack.c.3.s8 %v3307_v49 }
  0xf1   : > { %2045 = vst [vmem:[%s2724_s17 + $0x798] sm:$0xff] %v1533_v36  ;;  %2046 = vst [vmem:[%s2724_s17 + $0x7a0] sm:$0xff] %v1534_v17  ;;  %v1537_v4 = vcvt.s32.f32 %v1025_v8  ;;  %v517_v34 = vunpack.c.3.s8 %v3314_v53  ;;  %v518_v47 = vunpack.c.3.s8 %v3317_v56  ;;  %v519_v46 = vunpack.c.3.s8 %v3320_v23 }
  0xf2   : > { %2047 = vst [vmem:[%s2724_s17 + $0x7a8] sm:$0xff] %v1535_v7  ;;  %2048 = vst [vmem:[%s2724_s17 + $0x7b0] sm:$0xff] %v1536_v19  ;;  %v1538_v27 = vcvt.s32.f32 %v1026_v21  ;;  %v1539_v49 = vcvt.s32.f32 %v1027_v42  ;;  %v1028_v0 = vand.u32 255, %v516_v22  ;;  %v520_v1 = vunpack.c.3.s8 %v3323_v24 }
  0xf3   : > { %2049 = vst [vmem:[%s2724_s17 + $0x7b8] sm:$0xff] %v1537_v4  ;;  %v1029_v53 = vand.u32 255, %v517_v34  ;;  %v1030_v52 = vand.u32 255, %v518_v47  ;;  %v1031_v56 = vand.u32 255, %v519_v46  ;;  %v521_v23 = vunpack.c.3.s8 %v3328_v63  ;;  %v3408_v63 = vld [vmem:[%s2683_s30 + $0x228] sm:$0xff] }
  0xf4   : > { %2050 = vst [vmem:[%s2724_s17 + $0x7c0] sm:$0xff] %v1538_v27  ;;  %2051 = vst [vmem:[%s2724_s17 + $0x7c8] sm:$0xff] %v1539_v49  ;;  %v1540_v33 = vcvt.s32.f32 %v1028_v0  ;;  %v1032_v54 = vand.u32 255, %v520_v1  ;;  %v522_v55 = vunpack.c.0.s8 %v3385_v48  ;;  %v523_v24 = vunpack.c.0.s8 %v3388_v18 }
  0xf5   : > { %v1541_v60 = vcvt.s32.f32 %v1029_v53  ;;  %v1542_v38 = vcvt.s32.f32 %v1030_v52  ;;  %v1543_v25 = vcvt.s32.f32 %v1031_v56  ;;  %v1033_v51 = vand.u32 255, %v521_v23 }
  0xf6   : > { %2052 = vst [vmem:[%s2724_s17 + $0x7d0] sm:$0xff] %v1540_v33  ;;  %v1544_v13 = vcvt.s32.f32 %v1032_v54  ;;  %v1034_v43 = vand.u32 255, %v522_v55  ;;  %v1035_v5 = vand.u32 255, %v523_v24  ;;  %v524_v44 = vunpack.c.0.s8 %v3395_v2 }
  0xf7   : > { %2053 = vst [vmem:[%s2724_s17 + $0x7d8] sm:$0xff] %v1541_v60  ;;  %2054 = vst [vmem:[%s2724_s17 + $0x7e0] sm:$0xff] %v1542_v38  ;;  %v1545_v11 = vcvt.s32.f32 %v1033_v51  ;;  %v525_v10 = vunpack.c.0.s8 %v3402_v35  ;;  %v526_v16 = vunpack.c.0.s8 %v3405_v37  ;;  %v527_v39 = vunpack.c.0.s8 %v3408_v63 }
  0xf8   : > { %2055 = vst [vmem:[%s2724_s17 + $0x7e8] sm:$0xff] %v1543_v25  ;;  %2056 = vst [vmem:[%s2724_s17 + $0x7f0] sm:$0xff] %v1544_v13  ;;  %v1546_v50 = vcvt.s32.f32 %v1034_v43  ;;  %v1547_v12 = vcvt.s32.f32 %v1035_v5  ;;  %v1036_v15 = vand.u32 255, %v524_v44  ;;  %v528_v40 = vunpack.c.0.s8 %v3411_v3 }
  0xf9   : > { %2057 = vst [vmem:[%s2724_s17 + $0x7f8] sm:$0xff] %v1545_v11  ;;  %v1037_v20 = vand.u32 255, %v525_v10  ;;  %v1038_v57 = vand.u32 255, %v526_v16  ;;  %v1039_v41 = vand.u32 255, %v527_v39  ;;  %v529_v14 = vunpack.c.0.s8 %v3416_v45 }
  0xfa   : > { %2058 = vst [vmem:[%s2724_s17 + $0x800] sm:$0xff] %v1546_v50  ;;  %2059 = vst [vmem:[%s2724_s17 + $0x808] sm:$0xff] %v1547_v12  ;;  %v1548_v59 = vcvt.s32.f32 %v1036_v15  ;;  %v1040_v61 = vand.u32 255, %v528_v40  ;;  %v530_v26 = vunpack.c.1.s8 %v3385_v48  ;;  %v531_v62 = vunpack.c.1.s8 %v3388_v18 }
  0xfb   : > { %v1549_v29 = vcvt.s32.f32 %v1037_v20  ;;  %v1550_v28 = vcvt.s32.f32 %v1038_v57  ;;  %v1551_v32 = vcvt.s32.f32 %v1039_v41  ;;  %v1041_v58 = vand.u32 255, %v529_v14 }
  0xfc   : > { %2060 = vst [vmem:[%s2724_s17 + $0x810] sm:$0xff] %v1548_v59  ;;  %v1552_v9 = vcvt.s32.f32 %v1040_v61  ;;  %v1042_v30 = vand.u32 255, %v530_v26  ;;  %v1043_v31 = vand.u32 255, %v531_v62  ;;  %v532_v6 = vunpack.c.1.s8 %v3395_v2 }
  0xfd   : > { %2061 = vst [vmem:[%s2724_s17 + $0x818] sm:$0xff] %v1549_v29  ;;  %2062 = vst [vmem:[%s2724_s17 + $0x820] sm:$0xff] %v1550_v28  ;;  %v1553_v36 = vcvt.s32.f32 %v1041_v58  ;;  %v533_v17 = vunpack.c.1.s8 %v3402_v35  ;;  %v534_v7 = vunpack.c.1.s8 %v3405_v37  ;;  %v535_v8 = vunpack.c.1.s8 %v3408_v63  ;;  %v3476_v58 = vld [vmem:[%s2683_s30 + $0x248] sm:$0xff] }
  0xfe   : > { %2063 = vst [vmem:[%s2724_s17 + $0x828] sm:$0xff] %v1551_v32  ;;  %2064 = vst [vmem:[%s2724_s17 + $0x830] sm:$0xff] %v1552_v9  ;;  %v1554_v19 = vcvt.s32.f32 %v1042_v30  ;;  %v1555_v21 = vcvt.s32.f32 %v1043_v31  ;;  %v1044_v42 = vand.u32 255, %v532_v6  ;;  %v536_v22 = vunpack.c.1.s8 %v3411_v3  ;;  %v3473_v32 = vld [vmem:[%s2683_s30 + $0x240] sm:$0xff] }
  0xff   : > { %2065 = vst [vmem:[%s2724_s17 + $0x838] sm:$0xff] %v1553_v36  ;;  %v1045_v4 = vand.u32 255, %v533_v17  ;;  %v1046_v34 = vand.u32 255, %v534_v7  ;;  %v1047_v47 = vand.u32 255, %v535_v8  ;;  %v537_v46 = vunpack.c.1.s8 %v3416_v45  ;;  %v3483_v36 = vld [vmem:[%s2683_s30 + $0x250] sm:$0xff] }
 0x100   : > { %2066 = vst [vmem:[%s2724_s17 + $0x840] sm:$0xff] %v1554_v19  ;;  %2067 = vst [vmem:[%s2724_s17 + $0x848] sm:$0xff] %v1555_v21  ;;  %v1556_v27 = vcvt.s32.f32 %v1044_v42  ;;  %v1048_v49 = vand.u32 255, %v536_v22  ;;  %v538_v0 = vunpack.c.2.s8 %v3385_v48  ;;  %v539_v1 = vunpack.c.2.s8 %v3388_v18  ;;  %v3490_v19 = vld [vmem:[%s2683_s30 + $0x258] sm:$0xff]  ;;  %v3493_v21 = vld [vmem:[%s2683_s30 + $0x260] sm:$0xff] }
 0x101   : > { %v1557_v53 = vcvt.s32.f32 %v1045_v4  ;;  %v1558_v52 = vcvt.s32.f32 %v1046_v34  ;;  %v1559_v56 = vcvt.s32.f32 %v1047_v47  ;;  %v1049_v23 = vand.u32 255, %v537_v46  ;;  %v3499_v47 = vld [vmem:[%s2683_s30 + $0x270] sm:$0xff] }
 0x102   : > { %2068 = vst [vmem:[%s2724_s17 + $0x850] sm:$0xff] %v1556_v27  ;;  %v1560_v33 = vcvt.s32.f32 %v1048_v49  ;;  %v1050_v54 = vand.u32 255, %v538_v0  ;;  %v1051_v55 = vand.u32 255, %v539_v1  ;;  %v540_v24 = vunpack.c.2.s8 %v3395_v2  ;;  %v3504_v1 = vld [vmem:[%s2683_s30 + $0x278] sm:$0xff] }
 0x103   : > { %2069 = vst [vmem:[%s2724_s17 + $0x858] sm:$0xff] %v1557_v53  ;;  %2070 = vst [vmem:[%s2724_s17 + $0x860] sm:$0xff] %v1558_v52  ;;  %v1561_v60 = vcvt.s32.f32 %v1049_v23  ;;  %v541_v38 = vunpack.c.2.s8 %v3402_v35  ;;  %v542_v25 = vunpack.c.2.s8 %v3405_v37  ;;  %v543_v51 = vunpack.c.2.s8 %v3408_v63 }
 0x104   : > { %2071 = vst [vmem:[%s2724_s17 + $0x868] sm:$0xff] %v1559_v56  ;;  %2072 = vst [vmem:[%s2724_s17 + $0x870] sm:$0xff] %v1560_v33  ;;  %v1562_v13 = vcvt.s32.f32 %v1050_v54  ;;  %v1563_v43 = vcvt.s32.f32 %v1051_v55  ;;  %v1052_v5 = vand.u32 255, %v540_v24  ;;  %v544_v44 = vunpack.c.2.s8 %v3411_v3 }
 0x105   : > { %2073 = vst [vmem:[%s2724_s17 + $0x878] sm:$0xff] %v1561_v60  ;;  %v1053_v11 = vand.u32 255, %v541_v38  ;;  %v1054_v10 = vand.u32 255, %v542_v25  ;;  %v1055_v16 = vand.u32 255, %v543_v51  ;;  %v545_v39 = vunpack.c.2.s8 %v3416_v45 }
 0x106   : > { %2074 = vst [vmem:[%s2724_s17 + $0x880] sm:$0xff] %v1562_v13  ;;  %2075 = vst [vmem:[%s2724_s17 + $0x888] sm:$0xff] %v1563_v43  ;;  %v1564_v50 = vcvt.s32.f32 %v1052_v5  ;;  %v1056_v12 = vand.u32 255, %v544_v44  ;;  %v546_v15 = vunpack.c.3.s8 %v3385_v48  ;;  %v547_v40 = vunpack.c.3.s8 %v3388_v18 }
 0x107   : > { %v1565_v20 = vcvt.s32.f32 %v1053_v11  ;;  %v1566_v57 = vcvt.s32.f32 %v1054_v10  ;;  %v1567_v41 = vcvt.s32.f32 %v1055_v16  ;;  %v1057_v14 = vand.u32 255, %v545_v39 }
 0x108   : > { %2076 = vst [vmem:[%s2724_s17 + $0x890] sm:$0xff] %v1564_v50  ;;  %v1568_v59 = vcvt.s32.f32 %v1056_v12  ;;  %v1058_v61 = vand.u32 255, %v546_v15  ;;  %v1059_v26 = vand.u32 255, %v547_v40  ;;  %v548_v62 = vunpack.c.3.s8 %v3395_v2 }
 0x109   : > { %2077 = vst [vmem:[%s2724_s17 + $0x898] sm:$0xff] %v1565_v20  ;;  %2078 = vst [vmem:[%s2724_s17 + $0x8a0] sm:$0xff] %v1566_v57  ;;  %v1569_v48 = vcvt.s32.f32 %v1057_v14  ;;  %v549_v18 = vunpack.c.3.s8 %v3402_v35  ;;  %v550_v29 = vunpack.c.3.s8 %v3405_v37  ;;  %v551_v28 = vunpack.c.3.s8 %v3408_v63 }
 0x10a   : > { %2079 = vst [vmem:[%s2724_s17 + $0x8a8] sm:$0xff] %v1567_v41  ;;  %2080 = vst [vmem:[%s2724_s17 + $0x8b0] sm:$0xff] %v1568_v59  ;;  %v1570_v9 = vcvt.s32.f32 %v1058_v61  ;;  %v1571_v2 = vcvt.s32.f32 %v1059_v26  ;;  %v1060_v30 = vand.u32 255, %v548_v62  ;;  %v552_v31 = vunpack.c.3.s8 %v3411_v3 }
 0x10b   : > { %2081 = vst [vmem:[%s2724_s17 + $0x8b8] sm:$0xff] %v1569_v48  ;;  %v1061_v35 = vand.u32 255, %v549_v18  ;;  %v1062_v6 = vand.u32 255, %v550_v29  ;;  %v1063_v37 = vand.u32 255, %v551_v28  ;;  %v553_v63 = vunpack.c.3.s8 %v3416_v45  ;;  %v3496_v45 = vld [vmem:[%s2683_s30 + $0x268] sm:$0xff] }
 0x10c   : > { %2082 = vst [vmem:[%s2724_s17 + $0x8c0] sm:$0xff] %v1570_v9  ;;  %2083 = vst [vmem:[%s2724_s17 + $0x8c8] sm:$0xff] %v1571_v2  ;;  %v1572_v17 = vcvt.s32.f32 %v1060_v30  ;;  %v1064_v7 = vand.u32 255, %v552_v31  ;;  %v554_v8 = vunpack.c.0.s8 %v3473_v32  ;;  %v555_v3 = vunpack.c.0.s8 %v3476_v58 }
 0x10d   : > { %v1573_v42 = vcvt.s32.f32 %v1061_v35  ;;  %v1574_v22 = vcvt.s32.f32 %v1062_v6  ;;  %v1575_v4 = vcvt.s32.f32 %v1063_v37  ;;  %v1065_v34 = vand.u32 255, %v553_v63 }
 0x10e   : > { %2084 = vst [vmem:[%s2724_s17 + $0x8d0] sm:$0xff] %v1572_v17  ;;  %v1576_v46 = vcvt.s32.f32 %v1064_v7  ;;  %v1066_v27 = vand.u32 255, %v554_v8  ;;  %v1067_v49 = vand.u32 255, %v555_v3  ;;  %v556_v0 = vunpack.c.0.s8 %v3483_v36 }
 0x10f   : > { %2085 = vst [vmem:[%s2724_s17 + $0x8d8] sm:$0xff] %v1573_v42  ;;  %2086 = vst [vmem:[%s2724_s17 + $0x8e0] sm:$0xff] %v1574_v22  ;;  %v1577_v53 = vcvt.s32.f32 %v1065_v34  ;;  %v557_v52 = vunpack.c.0.s8 %v3490_v19  ;;  %v558_v56 = vunpack.c.0.s8 %v3493_v21  ;;  %v559_v23 = vunpack.c.0.s8 %v3496_v45 }
 0x110   : > { %2087 = vst [vmem:[%s2724_s17 + $0x8e8] sm:$0xff] %v1575_v4  ;;  %2088 = vst [vmem:[%s2724_s17 + $0x8f0] sm:$0xff] %v1576_v46  ;;  %v1578_v33 = vcvt.s32.f32 %v1066_v27  ;;  %v1579_v54 = vcvt.s32.f32 %v1067_v49  ;;  %v1068_v55 = vand.u32 255, %v556_v0  ;;  %v560_v24 = vunpack.c.0.s8 %v3499_v47 }
 0x111   : > { %2089 = vst [vmem:[%s2724_s17 + $0x8f8] sm:$0xff] %v1577_v53  ;;  %v1069_v60 = vand.u32 255, %v557_v52  ;;  %v1070_v38 = vand.u32 255, %v558_v56  ;;  %v1071_v25 = vand.u32 255, %v559_v23  ;;  %v561_v51 = vunpack.c.0.s8 %v3504_v1 }
 0x112   : > { %2090 = vst [vmem:[%s2724_s17 + $0x900] sm:$0xff] %v1578_v33  ;;  %2091 = vst [vmem:[%s2724_s17 + $0x908] sm:$0xff] %v1579_v54  ;;  %v1580_v13 = vcvt.s32.f32 %v1068_v55  ;;  %v1072_v43 = vand.u32 255, %v560_v24  ;;  %v562_v5 = vunpack.c.1.s8 %v3473_v32  ;;  %v563_v44 = vunpack.c.1.s8 %v3476_v58 }
 0x113   : > { %v1581_v11 = vcvt.s32.f32 %v1069_v60  ;;  %v1582_v10 = vcvt.s32.f32 %v1070_v38  ;;  %v1583_v16 = vcvt.s32.f32 %v1071_v25  ;;  %v1073_v39 = vand.u32 255, %v561_v51 }
 0x114   : > { %2092 = vst [vmem:[%s2724_s17 + $0x910] sm:$0xff] %v1580_v13  ;;  %v1584_v50 = vcvt.s32.f32 %v1072_v43  ;;  %v1074_v12 = vand.u32 255, %v562_v5  ;;  %v1075_v15 = vand.u32 255, %v563_v44  ;;  %v564_v40 = vunpack.c.1.s8 %v3483_v36 }
 0x115   : > { %2093 = vst [vmem:[%s2724_s17 + $0x918] sm:$0xff] %v1581_v11  ;;  %2094 = vst [vmem:[%s2724_s17 + $0x920] sm:$0xff] %v1582_v10  ;;  %v1585_v20 = vcvt.s32.f32 %v1073_v39  ;;  %v565_v57 = vunpack.c.1.s8 %v3490_v19  ;;  %v566_v41 = vunpack.c.1.s8 %v3493_v21  ;;  %v567_v14 = vunpack.c.1.s8 %v3496_v45  ;;  %v3564_v39 = vld [vmem:[%s2683_s30 + $0x288] sm:$0xff] }
 0x116   : > { %2095 = vst [vmem:[%s2724_s17 + $0x928] sm:$0xff] %v1583_v16  ;;  %2096 = vst [vmem:[%s2724_s17 + $0x930] sm:$0xff] %v1584_v50  ;;  %v1586_v59 = vcvt.s32.f32 %v1074_v12  ;;  %v1587_v61 = vcvt.s32.f32 %v1075_v15  ;;  %v1076_v26 = vand.u32 255, %v564_v40  ;;  %v568_v62 = vunpack.c.1.s8 %v3499_v47  ;;  %v3561_v16 = vld [vmem:[%s2683_s30 + $0x280] sm:$0xff] }
 0x117   : > { %2097 = vst [vmem:[%s2724_s17 + $0x938] sm:$0xff] %v1585_v20  ;;  %v1077_v48 = vand.u32 255, %v565_v57  ;;  %v1078_v18 = vand.u32 255, %v566_v41  ;;  %v1079_v29 = vand.u32 255, %v567_v14  ;;  %v569_v28 = vunpack.c.1.s8 %v3504_v1  ;;  %v3571_v20 = vld [vmem:[%s2683_s30 + $0x290] sm:$0xff] }
 0x118   : > { %2098 = vst [vmem:[%s2724_s17 + $0x940] sm:$0xff] %v1586_v59  ;;  %2099 = vst [vmem:[%s2724_s17 + $0x948] sm:$0xff] %v1587_v61  ;;  %v1588_v9 = vcvt.s32.f32 %v1076_v26  ;;  %v1080_v2 = vand.u32 255, %v568_v62  ;;  %v570_v30 = vunpack.c.2.s8 %v3473_v32  ;;  %v571_v31 = vunpack.c.2.s8 %v3476_v58  ;;  %v3578_v59 = vld [vmem:[%s2683_s30 + $0x298] sm:$0xff]  ;;  %v3581_v61 = vld [vmem:[%s2683_s30 + $0x2a0] sm:$0xff] }
 0x119   : > { %v1589_v35 = vcvt.s32.f32 %v1077_v48  ;;  %v1590_v6 = vcvt.s32.f32 %v1078_v18  ;;  %v1591_v37 = vcvt.s32.f32 %v1079_v29  ;;  %v1081_v63 = vand.u32 255, %v569_v28  ;;  %v3587_v29 = vld [vmem:[%s2683_s30 + $0x2b0] sm:$0xff] }
 0x11a   : > { %2100 = vst [vmem:[%s2724_s17 + $0x950] sm:$0xff] %v1588_v9  ;;  %v1592_v17 = vcvt.s32.f32 %v1080_v2  ;;  %v1082_v7 = vand.u32 255, %v570_v30  ;;  %v1083_v8 = vand.u32 255, %v571_v31  ;;  %v572_v3 = vunpack.c.2.s8 %v3483_v36  ;;  %v3592_v31 = vld [vmem:[%s2683_s30 + $0x2b8] sm:$0xff] }
 0x11b   : > { %2101 = vst [vmem:[%s2724_s17 + $0x958] sm:$0xff] %v1589_v35  ;;  %2102 = vst [vmem:[%s2724_s17 + $0x960] sm:$0xff] %v1590_v6  ;;  %v1593_v42 = vcvt.s32.f32 %v1081_v63  ;;  %v573_v22 = vunpack.c.2.s8 %v3490_v19  ;;  %v574_v4 = vunpack.c.2.s8 %v3493_v21  ;;  %v575_v34 = vunpack.c.2.s8 %v3496_v45 }
 0x11c   : > { %2103 = vst [vmem:[%s2724_s17 + $0x968] sm:$0xff] %v1591_v37  ;;  %2104 = vst [vmem:[%s2724_s17 + $0x970] sm:$0xff] %v1592_v17  ;;  %v1594_v46 = vcvt.s32.f32 %v1082_v7  ;;  %v1595_v27 = vcvt.s32.f32 %v1083_v8  ;;  %v1084_v49 = vand.u32 255, %v572_v3  ;;  %v576_v0 = vunpack.c.2.s8 %v3499_v47 }
 0x11d   : > { %2105 = vst [vmem:[%s2724_s17 + $0x978] sm:$0xff] %v1593_v42  ;;  %v1085_v53 = vand.u32 255, %v573_v22  ;;  %v1086_v52 = vand.u32 255, %v574_v4  ;;  %v1087_v56 = vand.u32 255, %v575_v34  ;;  %v577_v23 = vunpack.c.2.s8 %v3504_v1 }
 0x11e   : > { %2106 = vst [vmem:[%s2724_s17 + $0x980] sm:$0xff] %v1594_v46  ;;  %2107 = vst [vmem:[%s2724_s17 + $0x988] sm:$0xff] %v1595_v27  ;;  %v1596_v33 = vcvt.s32.f32 %v1084_v49  ;;  %v1088_v54 = vand.u32 255, %v576_v0  ;;  %v578_v55 = vunpack.c.3.s8 %v3473_v32  ;;  %v579_v24 = vunpack.c.3.s8 %v3476_v58 }
 0x11f   : > { %v1597_v60 = vcvt.s32.f32 %v1085_v53  ;;  %v1598_v38 = vcvt.s32.f32 %v1086_v52  ;;  %v1599_v25 = vcvt.s32.f32 %v1087_v56  ;;  %v1089_v51 = vand.u32 255, %v577_v23 }
 0x120   : > { %2108 = vst [vmem:[%s2724_s17 + $0x990] sm:$0xff] %v1596_v33  ;;  %v1600_v13 = vcvt.s32.f32 %v1088_v54  ;;  %v1090_v43 = vand.u32 255, %v578_v55  ;;  %v1091_v5 = vand.u32 255, %v579_v24  ;;  %v580_v44 = vunpack.c.3.s8 %v3483_v36 }
 0x121   : > { %2109 = vst [vmem:[%s2724_s17 + $0x998] sm:$0xff] %v1597_v60  ;;  %2110 = vst [vmem:[%s2724_s17 + $0x9a0] sm:$0xff] %v1598_v38  ;;  %v1601_v32 = vcvt.s32.f32 %v1089_v51  ;;  %v581_v58 = vunpack.c.3.s8 %v3490_v19  ;;  %v582_v11 = vunpack.c.3.s8 %v3493_v21  ;;  %v583_v10 = vunpack.c.3.s8 %v3496_v45 }
 0x122   : > { %2111 = vst [vmem:[%s2724_s17 + $0x9a8] sm:$0xff] %v1599_v25  ;;  %2112 = vst [vmem:[%s2724_s17 + $0x9b0] sm:$0xff] %v1600_v13  ;;  %v1602_v50 = vcvt.s32.f32 %v1090_v43  ;;  %v1603_v36 = vcvt.s32.f32 %v1091_v5  ;;  %v1092_v12 = vand.u32 255, %v580_v44  ;;  %v584_v15 = vunpack.c.3.s8 %v3499_v47 }
 0x123   : > { %2113 = vst [vmem:[%s2724_s17 + $0x9b8] sm:$0xff] %v1601_v32  ;;  %v1093_v19 = vand.u32 255, %v581_v58  ;;  %v1094_v40 = vand.u32 255, %v582_v11  ;;  %v1095_v21 = vand.u32 255, %v583_v10  ;;  %v585_v45 = vunpack.c.3.s8 %v3504_v1  ;;  %v3584_v1 = vld [vmem:[%s2683_s30 + $0x2a8] sm:$0xff] }
 0x124   : > { %2114 = vst [vmem:[%s2724_s17 + $0x9c0] sm:$0xff] %v1602_v50  ;;  %2115 = vst [vmem:[%s2724_s17 + $0x9c8] sm:$0xff] %v1603_v36  ;;  %v1604_v57 = vcvt.s32.f32 %v1092_v12  ;;  %v1096_v41 = vand.u32 255, %v584_v15  ;;  %v586_v14 = vunpack.c.0.s8 %v3561_v16  ;;  %v587_v47 = vunpack.c.0.s8 %v3564_v39 }
 0x125   : > { %v1605_v26 = vcvt.s32.f32 %v1093_v19  ;;  %v1606_v62 = vcvt.s32.f32 %v1094_v40  ;;  %v1607_v48 = vcvt.s32.f32 %v1095_v21  ;;  %v1097_v18 = vand.u32 255, %v585_v45 }
 0x126   : > { %2116 = vst [vmem:[%s2724_s17 + $0x9d0] sm:$0xff] %v1604_v57  ;;  %v1608_v28 = vcvt.s32.f32 %v1096_v41  ;;  %v1098_v9 = vand.u32 255, %v586_v14  ;;  %v1099_v2 = vand.u32 255, %v587_v47  ;;  %v588_v30 = vunpack.c.0.s8 %v3571_v20 }
 0x127   : > { %2117 = vst [vmem:[%s2724_s17 + $0x9d8] sm:$0xff] %v1605_v26  ;;  %2118 = vst [vmem:[%s2724_s17 + $0x9e0] sm:$0xff] %v1606_v62  ;;  %v1609_v35 = vcvt.s32.f32 %v1097_v18  ;;  %v589_v6 = vunpack.c.0.s8 %v3578_v59  ;;  %v590_v37 = vunpack.c.0.s8 %v3581_v61  ;;  %v591_v63 = vunpack.c.0.s8 %v3584_v1 }
 0x128   : > { %2119 = vst [vmem:[%s2724_s17 + $0x9e8] sm:$0xff] %v1607_v48  ;;  %2120 = vst [vmem:[%s2724_s17 + $0x9f0] sm:$0xff] %v1608_v28  ;;  %v1610_v17 = vcvt.s32.f32 %v1098_v9  ;;  %v1611_v7 = vcvt.s32.f32 %v1099_v2  ;;  %v1100_v8 = vand.u32 255, %v588_v30  ;;  %v592_v3 = vunpack.c.0.s8 %v3587_v29 }
 0x129   : > { %2121 = vst [vmem:[%s2724_s17 + $0x9f8] sm:$0xff] %v1609_v35  ;;  %v1101_v42 = vand.u32 255, %v589_v6  ;;  %v1102_v22 = vand.u32 255, %v590_v37  ;;  %v1103_v4 = vand.u32 255, %v591_v63  ;;  %v593_v34 = vunpack.c.0.s8 %v3592_v31 }
 0x12a   : > { %2122 = vst [vmem:[%s2724_s17 + $0xa00] sm:$0xff] %v1610_v17  ;;  %2123 = vst [vmem:[%s2724_s17 + $0xa08] sm:$0xff] %v1611_v7  ;;  %v1612_v46 = vcvt.s32.f32 %v1100_v8  ;;  %v1104_v27 = vand.u32 255, %v592_v3  ;;  %v594_v49 = vunpack.c.1.s8 %v3561_v16  ;;  %v595_v0 = vunpack.c.1.s8 %v3564_v39 }
 0x12b   : > { %v1613_v53 = vcvt.s32.f32 %v1101_v42  ;;  %v1614_v52 = vcvt.s32.f32 %v1102_v22  ;;  %v1615_v56 = vcvt.s32.f32 %v1103_v4  ;;  %v1105_v23 = vand.u32 255, %v593_v34 }
 0x12c   : > { %2124 = vst [vmem:[%s2724_s17 + $0xa10] sm:$0xff] %v1612_v46  ;;  %v1616_v33 = vcvt.s32.f32 %v1104_v27  ;;  %v1106_v54 = vand.u32 255, %v594_v49  ;;  %v1107_v55 = vand.u32 255, %v595_v0  ;;  %v596_v24 = vunpack.c.1.s8 %v3571_v20 }
 0x12d   : > { %2125 = vst [vmem:[%s2724_s17 + $0xa18] sm:$0xff] %v1613_v53  ;;  %2126 = vst [vmem:[%s2724_s17 + $0xa20] sm:$0xff] %v1614_v52  ;;  %v1617_v60 = vcvt.s32.f32 %v1105_v23  ;;  %v597_v38 = vunpack.c.1.s8 %v3578_v59  ;;  %v598_v25 = vunpack.c.1.s8 %v3581_v61  ;;  %v599_v51 = vunpack.c.1.s8 %v3584_v1  ;;  %v3652_v23 = vld [vmem:[%s2683_s30 + $0x2c8] sm:$0xff] }
 0x12e   : > { %2127 = vst [vmem:[%s2724_s17 + $0xa28] sm:$0xff] %v1615_v56  ;;  %2128 = vst [vmem:[%s2724_s17 + $0xa30] sm:$0xff] %v1616_v33  ;;  %v1618_v13 = vcvt.s32.f32 %v1106_v54  ;;  %v1619_v43 = vcvt.s32.f32 %v1107_v55  ;;  %v1108_v5 = vand.u32 255, %v596_v24  ;;  %v600_v44 = vunpack.c.1.s8 %v3587_v29  ;;  %v3649_v56 = vld [vmem:[%s2683_s30 + $0x2c0] sm:$0xff] }
 0x12f   : > { %2129 = vst [vmem:[%s2724_s17 + $0xa38] sm:$0xff] %v1617_v60  ;;  %v1109_v32 = vand.u32 255, %v597_v38  ;;  %v1110_v58 = vand.u32 255, %v598_v25  ;;  %v1111_v11 = vand.u32 255, %v599_v51  ;;  %v601_v10 = vunpack.c.1.s8 %v3592_v31  ;;  %v3659_v60 = vld [vmem:[%s2683_s30 + $0x2d0] sm:$0xff] }
 0x130   : > { %2130 = vst [vmem:[%s2724_s17 + $0xa40] sm:$0xff] %v1618_v13  ;;  %2131 = vst [vmem:[%s2724_s17 + $0xa48] sm:$0xff] %v1619_v43  ;;  %v1620_v50 = vcvt.s32.f32 %v1108_v5  ;;  %v1112_v36 = vand.u32 255, %v600_v44  ;;  %v602_v12 = vunpack.c.2.s8 %v3561_v16  ;;  %v603_v15 = vunpack.c.2.s8 %v3564_v39  ;;  %v3666_v13 = vld [vmem:[%s2683_s30 + $0x2d8] sm:$0xff]  ;;  %v3669_v43 = vld [vmem:[%s2683_s30 + $0x2e0] sm:$0xff] }
 0x131   : > { %v1621_v19 = vcvt.s32.f32 %v1109_v32  ;;  %v1622_v40 = vcvt.s32.f32 %v1110_v58  ;;  %v1623_v21 = vcvt.s32.f32 %v1111_v11  ;;  %v1113_v45 = vand.u32 255, %v601_v10  ;;  %v3675_v11 = vld [vmem:[%s2683_s30 + $0x2f0] sm:$0xff] }
 0x132   : > { %2132 = vst [vmem:[%s2724_s17 + $0xa50] sm:$0xff] %v1620_v50  ;;  %v1624_v57 = vcvt.s32.f32 %v1112_v36  ;;  %v1114_v41 = vand.u32 255, %v602_v12  ;;  %v1115_v14 = vand.u32 255, %v603_v15  ;;  %v604_v47 = vunpack.c.2.s8 %v3571_v20  ;;  %v3680_v15 = vld [vmem:[%s2683_s30 + $0x2f8] sm:$0xff] }
 0x133   : > { %2133 = vst [vmem:[%s2724_s17 + $0xa58] sm:$0xff] %v1621_v19  ;;  %2134 = vst [vmem:[%s2724_s17 + $0xa60] sm:$0xff] %v1622_v40  ;;  %v1625_v26 = vcvt.s32.f32 %v1113_v45  ;;  %v605_v62 = vunpack.c.2.s8 %v3578_v59  ;;  %v606_v48 = vunpack.c.2.s8 %v3581_v61  ;;  %v607_v18 = vunpack.c.2.s8 %v3584_v1 }
 0x134   : > { %2135 = vst [vmem:[%s2724_s17 + $0xa68] sm:$0xff] %v1623_v21  ;;  %2136 = vst [vmem:[%s2724_s17 + $0xa70] sm:$0xff] %v1624_v57  ;;  %v1626_v28 = vcvt.s32.f32 %v1114_v41  ;;  %v1627_v9 = vcvt.s32.f32 %v1115_v14  ;;  %v1116_v2 = vand.u32 255, %v604_v47  ;;  %v608_v30 = vunpack.c.2.s8 %v3587_v29 }
 0x135   : > { %2137 = vst [vmem:[%s2724_s17 + $0xa78] sm:$0xff] %v1625_v26  ;;  %v1117_v35 = vand.u32 255, %v605_v62  ;;  %v1118_v6 = vand.u32 255, %v606_v48  ;;  %v1119_v37 = vand.u32 255, %v607_v18  ;;  %v609_v63 = vunpack.c.2.s8 %v3592_v31 }
 0x136   : > { %2138 = vst [vmem:[%s2724_s17 + $0xa80] sm:$0xff] %v1626_v28  ;;  %2139 = vst [vmem:[%s2724_s17 + $0xa88] sm:$0xff] %v1627_v9  ;;  %v1628_v17 = vcvt.s32.f32 %v1116_v2  ;;  %v1120_v7 = vand.u32 255, %v608_v30  ;;  %v610_v8 = vunpack.c.3.s8 %v3561_v16  ;;  %v611_v3 = vunpack.c.3.s8 %v3564_v39 }
 0x137   : > { %v1629_v42 = vcvt.s32.f32 %v1117_v35  ;;  %v1630_v22 = vcvt.s32.f32 %v1118_v6  ;;  %v1631_v4 = vcvt.s32.f32 %v1119_v37  ;;  %v1121_v34 = vand.u32 255, %v609_v63 }
 0x138   : > { %2140 = vst [vmem:[%s2724_s17 + $0xa90] sm:$0xff] %v1628_v17  ;;  %v1632_v46 = vcvt.s32.f32 %v1120_v7  ;;  %v1122_v27 = vand.u32 255, %v610_v8  ;;  %v1123_v49 = vand.u32 255, %v611_v3  ;;  %v612_v0 = vunpack.c.3.s8 %v3571_v20 }
 0x139   : > { %2141 = vst [vmem:[%s2724_s17 + $0xa98] sm:$0xff] %v1629_v42  ;;  %2142 = vst [vmem:[%s2724_s17 + $0xaa0] sm:$0xff] %v1630_v22  ;;  %v1633_v16 = vcvt.s32.f32 %v1121_v34  ;;  %v613_v39 = vunpack.c.3.s8 %v3578_v59  ;;  %v614_v53 = vunpack.c.3.s8 %v3581_v61  ;;  %v615_v52 = vunpack.c.3.s8 %v3584_v1 }
 0x13a   : > { %2143 = vst [vmem:[%s2724_s17 + $0xaa8] sm:$0xff] %v1631_v4  ;;  %2144 = vst [vmem:[%s2724_s17 + $0xab0] sm:$0xff] %v1632_v46  ;;  %v1634_v33 = vcvt.s32.f32 %v1122_v27  ;;  %v1635_v20 = vcvt.s32.f32 %v1123_v49  ;;  %v1124_v54 = vand.u32 255, %v612_v0  ;;  %v616_v55 = vunpack.c.3.s8 %v3587_v29 }
 0x13b   : > { %2145 = vst [vmem:[%s2724_s17 + $0xab8] sm:$0xff] %v1633_v16  ;;  %v1125_v59 = vand.u32 255, %v613_v39  ;;  %v1126_v24 = vand.u32 255, %v614_v53  ;;  %v1127_v61 = vand.u32 255, %v615_v52  ;;  %v617_v1 = vunpack.c.3.s8 %v3592_v31  ;;  %v3672_v31 = vld [vmem:[%s2683_s30 + $0x2e8] sm:$0xff] }
 0x13c   : > { %2146 = vst [vmem:[%s2724_s17 + $0xac0] sm:$0xff] %v1634_v33  ;;  %2147 = vst [vmem:[%s2724_s17 + $0xac8] sm:$0xff] %v1635_v20  ;;  %v1636_v38 = vcvt.s32.f32 %v1124_v54  ;;  %v1128_v25 = vand.u32 255, %v616_v55  ;;  %v618_v51 = vunpack.c.0.s8 %v3649_v56  ;;  %v619_v29 = vunpack.c.0.s8 %v3652_v23 }
 0x13d   : > { %v1637_v5 = vcvt.s32.f32 %v1125_v59  ;;  %v1638_v44 = vcvt.s32.f32 %v1126_v24  ;;  %v1639_v32 = vcvt.s32.f32 %v1127_v61  ;;  %v1129_v58 = vand.u32 255, %v617_v1 }
 0x13e   : > { %2148 = vst [vmem:[%s2724_s17 + $0xad0] sm:$0xff] %v1636_v38  ;;  %v1640_v10 = vcvt.s32.f32 %v1128_v25  ;;  %v1130_v50 = vand.u32 255, %v618_v51  ;;  %v1131_v36 = vand.u32 255, %v619_v29  ;;  %v620_v12 = vunpack.c.0.s8 %v3659_v60 }
 0x13f   : > { %2149 = vst [vmem:[%s2724_s17 + $0xad8] sm:$0xff] %v1637_v5  ;;  %2150 = vst [vmem:[%s2724_s17 + $0xae0] sm:$0xff] %v1638_v44  ;;  %v1641_v19 = vcvt.s32.f32 %v1129_v58  ;;  %v621_v40 = vunpack.c.0.s8 %v3666_v13  ;;  %v622_v21 = vunpack.c.0.s8 %v3669_v43  ;;  %v623_v45 = vunpack.c.0.s8 %v3672_v31 }
 0x140   : > { %2151 = vst [vmem:[%s2724_s17 + $0xae8] sm:$0xff] %v1639_v32  ;;  %2152 = vst [vmem:[%s2724_s17 + $0xaf0] sm:$0xff] %v1640_v10  ;;  %v1642_v57 = vcvt.s32.f32 %v1130_v50  ;;  %v1643_v41 = vcvt.s32.f32 %v1131_v36  ;;  %v1132_v14 = vand.u32 255, %v620_v12  ;;  %v624_v47 = vunpack.c.0.s8 %v3675_v11 }
 0x141   : > { %2153 = vst [vmem:[%s2724_s17 + $0xaf8] sm:$0xff] %v1641_v19  ;;  %v1133_v26 = vand.u32 255, %v621_v40  ;;  %v1134_v62 = vand.u32 255, %v622_v21  ;;  %v1135_v48 = vand.u32 255, %v623_v45  ;;  %v625_v18 = vunpack.c.0.s8 %v3680_v15 }
 0x142   : > { %2154 = vst [vmem:[%s2724_s17 + $0xb00] sm:$0xff] %v1642_v57  ;;  %2155 = vst [vmem:[%s2724_s17 + $0xb08] sm:$0xff] %v1643_v41  ;;  %v1644_v28 = vcvt.s32.f32 %v1132_v14  ;;  %v1136_v9 = vand.u32 255, %v624_v47  ;;  %v626_v2 = vunpack.c.1.s8 %v3649_v56  ;;  %v627_v30 = vunpack.c.1.s8 %v3652_v23 }
 0x143   : > { %v1645_v35 = vcvt.s32.f32 %v1133_v26  ;;  %v1646_v6 = vcvt.s32.f32 %v1134_v62  ;;  %v1647_v37 = vcvt.s32.f32 %v1135_v48  ;;  %v1137_v63 = vand.u32 255, %v625_v18 }
 0x144   : > { %2156 = vst [vmem:[%s2724_s17 + $0xb10] sm:$0xff] %v1644_v28  ;;  %v1648_v17 = vcvt.s32.f32 %v1136_v9  ;;  %v1138_v7 = vand.u32 255, %v626_v2  ;;  %v1139_v8 = vand.u32 255, %v627_v30  ;;  %v628_v3 = vunpack.c.1.s8 %v3659_v60 }
 0x145   : > { %2157 = vst [vmem:[%s2724_s17 + $0xb18] sm:$0xff] %v1645_v35  ;;  %2158 = vst [vmem:[%s2724_s17 + $0xb20] sm:$0xff] %v1646_v6  ;;  %v1649_v42 = vcvt.s32.f32 %v1137_v63  ;;  %v629_v22 = vunpack.c.1.s8 %v3666_v13  ;;  %v630_v4 = vunpack.c.1.s8 %v3669_v43  ;;  %v631_v34 = vunpack.c.1.s8 %v3672_v31  ;;  %v3740_v63 = vld [vmem:[%s2683_s30 + $0x308] sm:$0xff] }
 0x146   : > { %2159 = vst [vmem:[%s2724_s17 + $0xb28] sm:$0xff] %v1647_v37  ;;  %2160 = vst [vmem:[%s2724_s17 + $0xb30] sm:$0xff] %v1648_v17  ;;  %v1650_v46 = vcvt.s32.f32 %v1138_v7  ;;  %v1651_v27 = vcvt.s32.f32 %v1139_v8  ;;  %v1140_v49 = vand.u32 255, %v628_v3  ;;  %v632_v0 = vunpack.c.1.s8 %v3675_v11  ;;  %v3737_v37 = vld [vmem:[%s2683_s30 + $0x300] sm:$0xff] }
 0x147   : > { %2161 = vst [vmem:[%s2724_s17 + $0xb38] sm:$0xff] %v1649_v42  ;;  %v1141_v16 = vand.u32 255, %v629_v22  ;;  %v1142_v39 = vand.u32 255, %v630_v4  ;;  %v1143_v53 = vand.u32 255, %v631_v34  ;;  %v633_v52 = vunpack.c.1.s8 %v3680_v15  ;;  %v3747_v42 = vld [vmem:[%s2683_s30 + $0x310] sm:$0xff] }
 0x148   : > { %2162 = vst [vmem:[%s2724_s17 + $0xb40] sm:$0xff] %v1650_v46  ;;  %2163 = vst [vmem:[%s2724_s17 + $0xb48] sm:$0xff] %v1651_v27  ;;  %v1652_v33 = vcvt.s32.f32 %v1140_v49  ;;  %v1144_v20 = vand.u32 255, %v632_v0  ;;  %v634_v54 = vunpack.c.2.s8 %v3649_v56  ;;  %v635_v55 = vunpack.c.2.s8 %v3652_v23  ;;  %v3754_v46 = vld [vmem:[%s2683_s30 + $0x318] sm:$0xff]  ;;  %v3757_v27 = vld [vmem:[%s2683_s30 + $0x320] sm:$0xff] }
 0x149   : > { %v1653_v59 = vcvt.s32.f32 %v1141_v16  ;;  %v1654_v24 = vcvt.s32.f32 %v1142_v39  ;;  %v1655_v61 = vcvt.s32.f32 %v1143_v53  ;;  %v1145_v1 = vand.u32 255, %v633_v52  ;;  %v3763_v53 = vld [vmem:[%s2683_s30 + $0x330] sm:$0xff] }
 0x14a   : > { %2164 = vst [vmem:[%s2724_s17 + $0xb50] sm:$0xff] %v1652_v33  ;;  %v1656_v38 = vcvt.s32.f32 %v1144_v20  ;;  %v1146_v25 = vand.u32 255, %v634_v54  ;;  %v1147_v51 = vand.u32 255, %v635_v55  ;;  %v636_v29 = vunpack.c.2.s8 %v3659_v60  ;;  %v3768_v55 = vld [vmem:[%s2683_s30 + $0x338] sm:$0xff] }
 0x14b   : > { %2165 = vst [vmem:[%s2724_s17 + $0xb58] sm:$0xff] %v1653_v59  ;;  %2166 = vst [vmem:[%s2724_s17 + $0xb60] sm:$0xff] %v1654_v24  ;;  %v1657_v5 = vcvt.s32.f32 %v1145_v1  ;;  %v637_v44 = vunpack.c.2.s8 %v3666_v13  ;;  %v638_v32 = vunpack.c.2.s8 %v3669_v43  ;;  %v639_v58 = vunpack.c.2.s8 %v3672_v31 }
 0x14c   : > { %2167 = vst [vmem:[%s2724_s17 + $0xb68] sm:$0xff] %v1655_v61  ;;  %2168 = vst [vmem:[%s2724_s17 + $0xb70] sm:$0xff] %v1656_v38  ;;  %v1658_v10 = vcvt.s32.f32 %v1146_v25  ;;  %v1659_v50 = vcvt.s32.f32 %v1147_v51  ;;  %v1148_v36 = vand.u32 255, %v636_v29  ;;  %v640_v12 = vunpack.c.2.s8 %v3675_v11 }
 0x14d   : > { %2169 = vst [vmem:[%s2724_s17 + $0xb78] sm:$0xff] %v1657_v5  ;;  %v1149_v19 = vand.u32 255, %v637_v44  ;;  %v1150_v40 = vand.u32 255, %v638_v32  ;;  %v1151_v21 = vand.u32 255, %v639_v58  ;;  %v641_v45 = vunpack.c.2.s8 %v3680_v15 }
 0x14e   : > { %2170 = vst [vmem:[%s2724_s17 + $0xb80] sm:$0xff] %v1658_v10  ;;  %2171 = vst [vmem:[%s2724_s17 + $0xb88] sm:$0xff] %v1659_v50  ;;  %v1660_v57 = vcvt.s32.f32 %v1148_v36  ;;  %v1152_v41 = vand.u32 255, %v640_v12  ;;  %v642_v14 = vunpack.c.3.s8 %v3649_v56  ;;  %v643_v47 = vunpack.c.3.s8 %v3652_v23 }
 0x14f   : > { %v1661_v26 = vcvt.s32.f32 %v1149_v19  ;;  %v1662_v62 = vcvt.s32.f32 %v1150_v40  ;;  %v1663_v48 = vcvt.s32.f32 %v1151_v21  ;;  %v1153_v18 = vand.u32 255, %v641_v45 }
 0x150   : > { %2172 = vst [vmem:[%s2724_s17 + $0xb90] sm:$0xff] %v1660_v57  ;;  %v1664_v28 = vcvt.s32.f32 %v1152_v41  ;;  %v1154_v9 = vand.u32 255, %v642_v14  ;;  %v1155_v2 = vand.u32 255, %v643_v47  ;;  %v644_v30 = vunpack.c.3.s8 %v3659_v60 }
 0x151   : > { %2173 = vst [vmem:[%s2724_s17 + $0xb98] sm:$0xff] %v1661_v26  ;;  %2174 = vst [vmem:[%s2724_s17 + $0xba0] sm:$0xff] %v1662_v62  ;;  %v1665_v56 = vcvt.s32.f32 %v1153_v18  ;;  %v645_v23 = vunpack.c.3.s8 %v3666_v13  ;;  %v646_v35 = vunpack.c.3.s8 %v3669_v43  ;;  %v647_v6 = vunpack.c.3.s8 %v3672_v31 }
 0x152   : > { %2175 = vst [vmem:[%s2724_s17 + $0xba8] sm:$0xff] %v1663_v48  ;;  %2176 = vst [vmem:[%s2724_s17 + $0xbb0] sm:$0xff] %v1664_v28  ;;  %v1666_v17 = vcvt.s32.f32 %v1154_v9  ;;  %v1667_v60 = vcvt.s32.f32 %v1155_v2  ;;  %v1156_v7 = vand.u32 255, %v644_v30  ;;  %v648_v8 = vunpack.c.3.s8 %v3675_v11 }
 0x153   : > { %2177 = vst [vmem:[%s2724_s17 + $0xbb8] sm:$0xff] %v1665_v56  ;;  %v1157_v13 = vand.u32 255, %v645_v23  ;;  %v1158_v3 = vand.u32 255, %v646_v35  ;;  %v1159_v43 = vand.u32 255, %v647_v6  ;;  %v649_v31 = vunpack.c.3.s8 %v3680_v15  ;;  %v3760_v15 = vld [vmem:[%s2683_s30 + $0x328] sm:$0xff] }
 0x154   : > { %2178 = vst [vmem:[%s2724_s17 + $0xbc0] sm:$0xff] %v1666_v17  ;;  %2179 = vst [vmem:[%s2724_s17 + $0xbc8] sm:$0xff] %v1667_v60  ;;  %v1668_v22 = vcvt.s32.f32 %v1156_v7  ;;  %v1160_v4 = vand.u32 255, %v648_v8  ;;  %v650_v34 = vunpack.c.0.s8 %v3737_v37  ;;  %v651_v11 = vunpack.c.0.s8 %v3740_v63 }
 0x155   : > { %v1669_v49 = vcvt.s32.f32 %v1157_v13  ;;  %v1670_v0 = vcvt.s32.f32 %v1158_v3  ;;  %v1671_v16 = vcvt.s32.f32 %v1159_v43  ;;  %v1161_v39 = vand.u32 255, %v649_v31 }
 0x156   : > { %2180 = vst [vmem:[%s2724_s17 + $0xbd0] sm:$0xff] %v1668_v22  ;;  %v1672_v52 = vcvt.s32.f32 %v1160_v4  ;;  %v1162_v33 = vand.u32 255, %v650_v34  ;;  %v1163_v20 = vand.u32 255, %v651_v11  ;;  %v652_v54 = vunpack.c.0.s8 %v3747_v42 }
 0x157   : > { %2181 = vst [vmem:[%s2724_s17 + $0xbd8] sm:$0xff] %v1669_v49  ;;  %2182 = vst [vmem:[%s2724_s17 + $0xbe0] sm:$0xff] %v1670_v0  ;;  %v1673_v59 = vcvt.s32.f32 %v1161_v39  ;;  %v653_v24 = vunpack.c.0.s8 %v3754_v46  ;;  %v654_v61 = vunpack.c.0.s8 %v3757_v27  ;;  %v655_v1 = vunpack.c.0.s8 %v3760_v15 }
 0x158   : > { %2183 = vst [vmem:[%s2724_s17 + $0xbe8] sm:$0xff] %v1671_v16  ;;  %2184 = vst [vmem:[%s2724_s17 + $0xbf0] sm:$0xff] %v1672_v52  ;;  %v1674_v38 = vcvt.s32.f32 %v1162_v33  ;;  %v1675_v25 = vcvt.s32.f32 %v1163_v20  ;;  %v1164_v51 = vand.u32 255, %v652_v54  ;;  %v656_v29 = vunpack.c.0.s8 %v3763_v53 }
 0x159   : > { %2185 = vst [vmem:[%s2724_s17 + $0xbf8] sm:$0xff] %v1673_v59  ;;  %v1165_v5 = vand.u32 255, %v653_v24  ;;  %v1166_v44 = vand.u32 255, %v654_v61  ;;  %v1167_v32 = vand.u32 255, %v655_v1  ;;  %v657_v58 = vunpack.c.0.s8 %v3768_v55 }
 0x15a   : > { %2186 = vst [vmem:[%s2724_s17 + $0xc00] sm:$0xff] %v1674_v38  ;;  %2187 = vst [vmem:[%s2724_s17 + $0xc08] sm:$0xff] %v1675_v25  ;;  %v1676_v10 = vcvt.s32.f32 %v1164_v51  ;;  %v1168_v50 = vand.u32 255, %v656_v29  ;;  %v658_v36 = vunpack.c.1.s8 %v3737_v37  ;;  %v659_v12 = vunpack.c.1.s8 %v3740_v63 }
 0x15b   : > { %v1677_v19 = vcvt.s32.f32 %v1165_v5  ;;  %v1678_v40 = vcvt.s32.f32 %v1166_v44  ;;  %v1679_v21 = vcvt.s32.f32 %v1167_v32  ;;  %v1169_v45 = vand.u32 255, %v657_v58 }
 0x15c   : > { %2188 = vst [vmem:[%s2724_s17 + $0xc10] sm:$0xff] %v1676_v10  ;;  %v1680_v57 = vcvt.s32.f32 %v1168_v50  ;;  %v1170_v41 = vand.u32 255, %v658_v36  ;;  %v1171_v14 = vand.u32 255, %v659_v12  ;;  %v660_v47 = vunpack.c.1.s8 %v3747_v42 }
 0x15d   : > { %2189 = vst [vmem:[%s2724_s17 + $0xc18] sm:$0xff] %v1677_v19  ;;  %2190 = vst [vmem:[%s2724_s17 + $0xc20] sm:$0xff] %v1678_v40  ;;  %v1681_v26 = vcvt.s32.f32 %v1169_v45  ;;  %v661_v62 = vunpack.c.1.s8 %v3754_v46  ;;  %v662_v48 = vunpack.c.1.s8 %v3757_v27  ;;  %v663_v18 = vunpack.c.1.s8 %v3760_v15  ;;  %v3828_v45 = vld [vmem:[%s2683_s30 + $0x348] sm:$0xff] }
 0x15e   : > { %2191 = vst [vmem:[%s2724_s17 + $0xc28] sm:$0xff] %v1679_v21  ;;  %2192 = vst [vmem:[%s2724_s17 + $0xc30] sm:$0xff] %v1680_v57  ;;  %v1682_v28 = vcvt.s32.f32 %v1170_v41  ;;  %v1683_v9 = vcvt.s32.f32 %v1171_v14  ;;  %v1172_v2 = vand.u32 255, %v660_v47  ;;  %v664_v30 = vunpack.c.1.s8 %v3763_v53  ;;  %v3825_v21 = vld [vmem:[%s2683_s30 + $0x340] sm:$0xff] }
 0x15f   : > { %2193 = vst [vmem:[%s2724_s17 + $0xc38] sm:$0xff] %v1681_v26  ;;  %v1173_v56 = vand.u32 255, %v661_v62  ;;  %v1174_v23 = vand.u32 255, %v662_v48  ;;  %v1175_v35 = vand.u32 255, %v663_v18  ;;  %v665_v6 = vunpack.c.1.s8 %v3768_v55  ;;  %v3835_v26 = vld [vmem:[%s2683_s30 + $0x350] sm:$0xff] }
 0x160   : > { %2194 = vst [vmem:[%s2724_s17 + $0xc40] sm:$0xff] %v1682_v28  ;;  %2195 = vst [vmem:[%s2724_s17 + $0xc48] sm:$0xff] %v1683_v9  ;;  %v1684_v17 = vcvt.s32.f32 %v1172_v2  ;;  %v1176_v60 = vand.u32 255, %v664_v30  ;;  %v666_v7 = vunpack.c.2.s8 %v3737_v37  ;;  %v667_v8 = vunpack.c.2.s8 %v3740_v63  ;;  %v3842_v28 = vld [vmem:[%s2683_s30 + $0x358] sm:$0xff]  ;;  %v3845_v9 = vld [vmem:[%s2683_s30 + $0x360] sm:$0xff] }
 0x161   : > { %v1685_v13 = vcvt.s32.f32 %v1173_v56  ;;  %v1686_v3 = vcvt.s32.f32 %v1174_v23  ;;  %v1687_v43 = vcvt.s32.f32 %v1175_v35  ;;  %v1177_v31 = vand.u32 255, %v665_v6  ;;  %v3851_v35 = vld [vmem:[%s2683_s30 + $0x370] sm:$0xff] }
 0x162   : > { %2196 = vst [vmem:[%s2724_s17 + $0xc50] sm:$0xff] %v1684_v17  ;;  %v1688_v22 = vcvt.s32.f32 %v1176_v60  ;;  %v1178_v4 = vand.u32 255, %v666_v7  ;;  %v1179_v34 = vand.u32 255, %v667_v8  ;;  %v668_v11 = vunpack.c.2.s8 %v3747_v42  ;;  %v3856_v8 = vld [vmem:[%s2683_s30 + $0x378] sm:$0xff] }
 0x163   : > { %2197 = vst [vmem:[%s2724_s17 + $0xc58] sm:$0xff] %v1685_v13  ;;  %2198 = vst [vmem:[%s2724_s17 + $0xc60] sm:$0xff] %v1686_v3  ;;  %v1689_v49 = vcvt.s32.f32 %v1177_v31  ;;  %v669_v0 = vunpack.c.2.s8 %v3754_v46  ;;  %v670_v16 = vunpack.c.2.s8 %v3757_v27  ;;  %v671_v39 = vunpack.c.2.s8 %v3760_v15 }
 0x164   : > { %2199 = vst [vmem:[%s2724_s17 + $0xc68] sm:$0xff] %v1687_v43  ;;  %2200 = vst [vmem:[%s2724_s17 + $0xc70] sm:$0xff] %v1688_v22  ;;  %v1690_v52 = vcvt.s32.f32 %v1178_v4  ;;  %v1691_v33 = vcvt.s32.f32 %v1179_v34  ;;  %v1180_v20 = vand.u32 255, %v668_v11  ;;  %v672_v54 = vunpack.c.2.s8 %v3763_v53 }
 0x165   : > { %2201 = vst [vmem:[%s2724_s17 + $0xc78] sm:$0xff] %v1689_v49  ;;  %v1181_v59 = vand.u32 255, %v669_v0  ;;  %v1182_v24 = vand.u32 255, %v670_v16  ;;  %v1183_v61 = vand.u32 255, %v671_v39  ;;  %v673_v1 = vunpack.c.2.s8 %v3768_v55 }
 0x166   : > { %2202 = vst [vmem:[%s2724_s17 + $0xc80] sm:$0xff] %v1690_v52  ;;  %2203 = vst [vmem:[%s2724_s17 + $0xc88] sm:$0xff] %v1691_v33  ;;  %v1692_v38 = vcvt.s32.f32 %v1180_v20  ;;  %v1184_v25 = vand.u32 255, %v672_v54  ;;  %v674_v51 = vunpack.c.3.s8 %v3737_v37  ;;  %v675_v29 = vunpack.c.3.s8 %v3740_v63 }
 0x167   : > { %v1693_v5 = vcvt.s32.f32 %v1181_v59  ;;  %v1694_v44 = vcvt.s32.f32 %v1182_v24  ;;  %v1695_v32 = vcvt.s32.f32 %v1183_v61  ;;  %v1185_v58 = vand.u32 255, %v673_v1 }
 0x168   : > { %2204 = vst [vmem:[%s2724_s17 + $0xc90] sm:$0xff] %v1692_v38  ;;  %v1696_v10 = vcvt.s32.f32 %v1184_v25  ;;  %v1186_v50 = vand.u32 255, %v674_v51  ;;  %v1187_v36 = vand.u32 255, %v675_v29  ;;  %v676_v12 = vunpack.c.3.s8 %v3747_v42 }
 0x169   : > { %2205 = vst [vmem:[%s2724_s17 + $0xc98] sm:$0xff] %v1693_v5  ;;  %2206 = vst [vmem:[%s2724_s17 + $0xca0] sm:$0xff] %v1694_v44  ;;  %v1697_v37 = vcvt.s32.f32 %v1185_v58  ;;  %v677_v63 = vunpack.c.3.s8 %v3754_v46  ;;  %v678_v19 = vunpack.c.3.s8 %v3757_v27  ;;  %v679_v40 = vunpack.c.3.s8 %v3760_v15 }
 0x16a   : > { %2207 = vst [vmem:[%s2724_s17 + $0xca8] sm:$0xff] %v1695_v32  ;;  %2208 = vst [vmem:[%s2724_s17 + $0xcb0] sm:$0xff] %v1696_v10  ;;  %v1698_v57 = vcvt.s32.f32 %v1186_v50  ;;  %v1699_v42 = vcvt.s32.f32 %v1187_v36  ;;  %v1188_v41 = vand.u32 255, %v676_v12  ;;  %v680_v14 = vunpack.c.3.s8 %v3763_v53 }
 0x16b   : > { %2209 = vst [vmem:[%s2724_s17 + $0xcb8] sm:$0xff] %v1697_v37  ;;  %v1189_v46 = vand.u32 255, %v677_v63  ;;  %v1190_v47 = vand.u32 255, %v678_v19  ;;  %v1191_v27 = vand.u32 255, %v679_v40  ;;  %v681_v15 = vunpack.c.3.s8 %v3768_v55  ;;  %v3848_v55 = vld [vmem:[%s2683_s30 + $0x368] sm:$0xff] }
 0x16c   : > { %2210 = vst [vmem:[%s2724_s17 + $0xcc0] sm:$0xff] %v1698_v57  ;;  %2211 = vst [vmem:[%s2724_s17 + $0xcc8] sm:$0xff] %v1699_v42  ;;  %v1700_v62 = vcvt.s32.f32 %v1188_v41  ;;  %v1192_v48 = vand.u32 255, %v680_v14  ;;  %v682_v18 = vunpack.c.0.s8 %v3825_v21  ;;  %v683_v53 = vunpack.c.0.s8 %v3828_v45 }
 0x16d   : > { %v1701_v2 = vcvt.s32.f32 %v1189_v46  ;;  %v1702_v30 = vcvt.s32.f32 %v1190_v47  ;;  %v1703_v56 = vcvt.s32.f32 %v1191_v27  ;;  %v1193_v23 = vand.u32 255, %v681_v15 }
 0x16e   : > { %2212 = vst [vmem:[%s2724_s17 + $0xcd0] sm:$0xff] %v1700_v62  ;;  %v1704_v6 = vcvt.s32.f32 %v1192_v48  ;;  %v1194_v17 = vand.u32 255, %v682_v18  ;;  %v1195_v60 = vand.u32 255, %v683_v53  ;;  %v684_v7 = vunpack.c.0.s8 %v3835_v26 }
 0x16f   : > { %2213 = vst [vmem:[%s2724_s17 + $0xcd8] sm:$0xff] %v1701_v2  ;;  %2214 = vst [vmem:[%s2724_s17 + $0xce0] sm:$0xff] %v1702_v30  ;;  %v1705_v13 = vcvt.s32.f32 %v1193_v23  ;;  %v685_v3 = vunpack.c.0.s8 %v3842_v28  ;;  %v686_v43 = vunpack.c.0.s8 %v3845_v9  ;;  %v687_v31 = vunpack.c.0.s8 %v3848_v55 }
 0x170   : > { %2215 = vst [vmem:[%s2724_s17 + $0xce8] sm:$0xff] %v1703_v56  ;;  %2216 = vst [vmem:[%s2724_s17 + $0xcf0] sm:$0xff] %v1704_v6  ;;  %v1706_v22 = vcvt.s32.f32 %v1194_v17  ;;  %v1707_v4 = vcvt.s32.f32 %v1195_v60  ;;  %v1196_v34 = vand.u32 255, %v684_v7  ;;  %v688_v11 = vunpack.c.0.s8 %v3851_v35 }
 0x171   : > { %2217 = vst [vmem:[%s2724_s17 + $0xcf8] sm:$0xff] %v1705_v13  ;;  %v1197_v49 = vand.u32 255, %v685_v3  ;;  %v1198_v0 = vand.u32 255, %v686_v43  ;;  %v1199_v16 = vand.u32 255, %v687_v31  ;;  %v689_v39 = vunpack.c.0.s8 %v3856_v8 }
 0x172   : > { %2218 = vst [vmem:[%s2724_s17 + $0xd00] sm:$0xff] %v1706_v22  ;;  %2219 = vst [vmem:[%s2724_s17 + $0xd08] sm:$0xff] %v1707_v4  ;;  %v1708_v52 = vcvt.s32.f32 %v1196_v34  ;;  %v1200_v33 = vand.u32 255, %v688_v11  ;;  %v690_v20 = vunpack.c.1.s8 %v3825_v21  ;;  %v691_v54 = vunpack.c.1.s8 %v3828_v45 }
 0x173   : > { %v1709_v59 = vcvt.s32.f32 %v1197_v49  ;;  %v1710_v24 = vcvt.s32.f32 %v1198_v0  ;;  %v1711_v61 = vcvt.s32.f32 %v1199_v16  ;;  %v1201_v1 = vand.u32 255, %v689_v39 }
 0x174   : > { %2220 = vst [vmem:[%s2724_s17 + $0xd10] sm:$0xff] %v1708_v52  ;;  %v1712_v38 = vcvt.s32.f32 %v1200_v33  ;;  %v1202_v25 = vand.u32 255, %v690_v20  ;;  %v1203_v51 = vand.u32 255, %v691_v54  ;;  %v692_v29 = vunpack.c.1.s8 %v3835_v26 }
 0x175   : > { %2221 = vst [vmem:[%s2724_s17 + $0xd18] sm:$0xff] %v1709_v59  ;;  %2222 = vst [vmem:[%s2724_s17 + $0xd20] sm:$0xff] %v1710_v24  ;;  %v1713_v5 = vcvt.s32.f32 %v1201_v1  ;;  %v693_v44 = vunpack.c.1.s8 %v3842_v28  ;;  %v694_v32 = vunpack.c.1.s8 %v3845_v9  ;;  %v695_v58 = vunpack.c.1.s8 %v3848_v55  ;;  %v3916_v1 = vld [vmem:[%s2683_s30 + $0x388] sm:$0xff] }
 0x176   : > { %2223 = vst [vmem:[%s2724_s17 + $0xd28] sm:$0xff] %v1711_v61  ;;  %2224 = vst [vmem:[%s2724_s17 + $0xd30] sm:$0xff] %v1712_v38  ;;  %v1714_v10 = vcvt.s32.f32 %v1202_v25  ;;  %v1715_v50 = vcvt.s32.f32 %v1203_v51  ;;  %v1204_v36 = vand.u32 255, %v692_v29  ;;  %v696_v12 = vunpack.c.1.s8 %v3851_v35  ;;  %v3913_v61 = vld [vmem:[%s2683_s30 + $0x380] sm:$0xff] }
 0x177   : > { %2225 = vst [vmem:[%s2724_s17 + $0xd38] sm:$0xff] %v1713_v5  ;;  %v1205_v37 = vand.u32 255, %v693_v44  ;;  %v1206_v63 = vand.u32 255, %v694_v32  ;;  %v1207_v19 = vand.u32 255, %v695_v58  ;;  %v697_v40 = vunpack.c.1.s8 %v3856_v8  ;;  %v3923_v5 = vld [vmem:[%s2683_s30 + $0x390] sm:$0xff] }
 0x178   : > { %2226 = vst [vmem:[%s2724_s17 + $0xd40] sm:$0xff] %v1714_v10  ;;  %2227 = vst [vmem:[%s2724_s17 + $0xd48] sm:$0xff] %v1715_v50  ;;  %v1716_v57 = vcvt.s32.f32 %v1204_v36  ;;  %v1208_v42 = vand.u32 255, %v696_v12  ;;  %v698_v41 = vunpack.c.2.s8 %v3825_v21  ;;  %v699_v14 = vunpack.c.2.s8 %v3828_v45  ;;  %v3930_v10 = vld [vmem:[%s2683_s30 + $0x398] sm:$0xff]  ;;  %v3933_v50 = vld [vmem:[%s2683_s30 + $0x3a0] sm:$0xff] }
 0x179   : > { %v1717_v46 = vcvt.s32.f32 %v1205_v37  ;;  %v1718_v47 = vcvt.s32.f32 %v1206_v63  ;;  %v1719_v27 = vcvt.s32.f32 %v1207_v19  ;;  %v1209_v15 = vand.u32 255, %v697_v40  ;;  %v3939_v19 = vld [vmem:[%s2683_s30 + $0x3b0] sm:$0xff] }
 0x17a   : > { %2228 = vst [vmem:[%s2724_s17 + $0xd50] sm:$0xff] %v1716_v57  ;;  %v1720_v62 = vcvt.s32.f32 %v1208_v42  ;;  %v1210_v48 = vand.u32 255, %v698_v41  ;;  %v1211_v18 = vand.u32 255, %v699_v14  ;;  %v700_v53 = vunpack.c.2.s8 %v3835_v26  ;;  %v3944_v14 = vld [vmem:[%s2683_s30 + $0x3b8] sm:$0xff] }
 0x17b   : > { %2229 = vst [vmem:[%s2724_s17 + $0xd58] sm:$0xff] %v1717_v46  ;;  %2230 = vst [vmem:[%s2724_s17 + $0xd60] sm:$0xff] %v1718_v47  ;;  %v1721_v2 = vcvt.s32.f32 %v1209_v15  ;;  %v701_v30 = vunpack.c.2.s8 %v3842_v28  ;;  %v702_v56 = vunpack.c.2.s8 %v3845_v9  ;;  %v703_v23 = vunpack.c.2.s8 %v3848_v55 }
 0x17c   : > { %2231 = vst [vmem:[%s2724_s17 + $0xd68] sm:$0xff] %v1719_v27  ;;  %2232 = vst [vmem:[%s2724_s17 + $0xd70] sm:$0xff] %v1720_v62  ;;  %v1722_v6 = vcvt.s32.f32 %v1210_v48  ;;  %v1723_v17 = vcvt.s32.f32 %v1211_v18  ;;  %v1212_v60 = vand.u32 255, %v700_v53  ;;  %v704_v7 = vunpack.c.2.s8 %v3851_v35 }
 0x17d   : > { %2233 = vst [vmem:[%s2724_s17 + $0xd78] sm:$0xff] %v1721_v2  ;;  %v1213_v13 = vand.u32 255, %v701_v30  ;;  %v1214_v3 = vand.u32 255, %v702_v56  ;;  %v1215_v43 = vand.u32 255, %v703_v23  ;;  %v705_v31 = vunpack.c.2.s8 %v3856_v8 }
 0x17e   : > { %2234 = vst [vmem:[%s2724_s17 + $0xd80] sm:$0xff] %v1722_v6  ;;  %2235 = vst [vmem:[%s2724_s17 + $0xd88] sm:$0xff] %v1723_v17  ;;  %v1724_v22 = vcvt.s32.f32 %v1212_v60  ;;  %v1216_v4 = vand.u32 255, %v704_v7  ;;  %v706_v34 = vunpack.c.3.s8 %v3825_v21  ;;  %v707_v11 = vunpack.c.3.s8 %v3828_v45 }
 0x17f   : > { %v1725_v49 = vcvt.s32.f32 %v1213_v13  ;;  %v1726_v0 = vcvt.s32.f32 %v1214_v3  ;;  %v1727_v16 = vcvt.s32.f32 %v1215_v43  ;;  %v1217_v39 = vand.u32 255, %v705_v31 }
 0x180   : > { %2236 = vst [vmem:[%s2724_s17 + $0xd90] sm:$0xff] %v1724_v22  ;;  %v1728_v52 = vcvt.s32.f32 %v1216_v4  ;;  %v1218_v33 = vand.u32 255, %v706_v34  ;;  %v1219_v20 = vand.u32 255, %v707_v11  ;;  %v708_v54 = vunpack.c.3.s8 %v3835_v26 }
 0x181   : > { %2237 = vst [vmem:[%s2724_s17 + $0xd98] sm:$0xff] %v1725_v49  ;;  %2238 = vst [vmem:[%s2724_s17 + $0xda0] sm:$0xff] %v1726_v0  ;;  %v1729_v21 = vcvt.s32.f32 %v1217_v39  ;;  %v709_v45 = vunpack.c.3.s8 %v3842_v28  ;;  %v710_v59 = vunpack.c.3.s8 %v3845_v9  ;;  %v711_v24 = vunpack.c.3.s8 %v3848_v55 }
 0x182   : > { %2239 = vst [vmem:[%s2724_s17 + $0xda8] sm:$0xff] %v1727_v16  ;;  %2240 = vst [vmem:[%s2724_s17 + $0xdb0] sm:$0xff] %v1728_v52  ;;  %v1730_v38 = vcvt.s32.f32 %v1218_v33  ;;  %v1731_v26 = vcvt.s32.f32 %v1219_v20  ;;  %v1220_v25 = vand.u32 255, %v708_v54  ;;  %v712_v51 = vunpack.c.3.s8 %v3851_v35 }
 0x183   : > { %2241 = vst [vmem:[%s2724_s17 + $0xdb8] sm:$0xff] %v1729_v21  ;;  %v1221_v28 = vand.u32 255, %v709_v45  ;;  %v1222_v29 = vand.u32 255, %v710_v59  ;;  %v1223_v9 = vand.u32 255, %v711_v24  ;;  %v713_v55 = vunpack.c.3.s8 %v3856_v8  ;;  %v3936_v8 = vld [vmem:[%s2683_s30 + $0x3a8] sm:$0xff] }
 0x184   : > { %2242 = vst [vmem:[%s2724_s17 + $0xdc0] sm:$0xff] %v1730_v38  ;;  %2243 = vst [vmem:[%s2724_s17 + $0xdc8] sm:$0xff] %v1731_v26  ;;  %v1732_v44 = vcvt.s32.f32 %v1220_v25  ;;  %v1224_v32 = vand.u32 255, %v712_v51  ;;  %v714_v58 = vunpack.c.0.s8 %v3913_v61  ;;  %v715_v35 = vunpack.c.0.s8 %v3916_v1 }
 0x185   : > { %v1733_v36 = vcvt.s32.f32 %v1221_v28  ;;  %v1734_v12 = vcvt.s32.f32 %v1222_v29  ;;  %v1735_v37 = vcvt.s32.f32 %v1223_v9  ;;  %v1225_v63 = vand.u32 255, %v713_v55 }
 0x186   : > { %2244 = vst [vmem:[%s2724_s17 + $0xdd0] sm:$0xff] %v1732_v44  ;;  %v1736_v40 = vcvt.s32.f32 %v1224_v32  ;;  %v1226_v57 = vand.u32 255, %v714_v58  ;;  %v1227_v42 = vand.u32 255, %v715_v35  ;;  %v716_v41 = vunpack.c.0.s8 %v3923_v5 }
 0x187   : > { %2245 = vst [vmem:[%s2724_s17 + $0xdd8] sm:$0xff] %v1733_v36  ;;  %2246 = vst [vmem:[%s2724_s17 + $0xde0] sm:$0xff] %v1734_v12  ;;  %v1737_v46 = vcvt.s32.f32 %v1225_v63  ;;  %v717_v47 = vunpack.c.0.s8 %v3930_v10  ;;  %v718_v27 = vunpack.c.0.s8 %v3933_v50  ;;  %v719_v15 = vunpack.c.0.s8 %v3936_v8 }
 0x188   : > { %2247 = vst [vmem:[%s2724_s17 + $0xde8] sm:$0xff] %v1735_v37  ;;  %2248 = vst [vmem:[%s2724_s17 + $0xdf0] sm:$0xff] %v1736_v40  ;;  %v1738_v62 = vcvt.s32.f32 %v1226_v57  ;;  %v1739_v48 = vcvt.s32.f32 %v1227_v42  ;;  %v1228_v18 = vand.u32 255, %v716_v41  ;;  %v720_v53 = vunpack.c.0.s8 %v3939_v19 }
 0x189   : > { %2249 = vst [vmem:[%s2724_s17 + $0xdf8] sm:$0xff] %v1737_v46  ;;  %v1229_v2 = vand.u32 255, %v717_v47  ;;  %v1230_v30 = vand.u32 255, %v718_v27  ;;  %v1231_v56 = vand.u32 255, %v719_v15  ;;  %v721_v23 = vunpack.c.0.s8 %v3944_v14 }
 0x18a   : > { %2250 = vst [vmem:[%s2724_s17 + $0xe00] sm:$0xff] %v1738_v62  ;;  %2251 = vst [vmem:[%s2724_s17 + $0xe08] sm:$0xff] %v1739_v48  ;;  %v1740_v6 = vcvt.s32.f32 %v1228_v18  ;;  %v1232_v17 = vand.u32 255, %v720_v53  ;;  %v722_v60 = vunpack.c.1.s8 %v3913_v61  ;;  %v723_v7 = vunpack.c.1.s8 %v3916_v1 }
 0x18b   : > { %v1741_v13 = vcvt.s32.f32 %v1229_v2  ;;  %v1742_v3 = vcvt.s32.f32 %v1230_v30  ;;  %v1743_v43 = vcvt.s32.f32 %v1231_v56  ;;  %v1233_v31 = vand.u32 255, %v721_v23 }
 0x18c   : > { %2252 = vst [vmem:[%s2724_s17 + $0xe10] sm:$0xff] %v1740_v6  ;;  %v1744_v22 = vcvt.s32.f32 %v1232_v17  ;;  %v1234_v4 = vand.u32 255, %v722_v60  ;;  %v1235_v34 = vand.u32 255, %v723_v7  ;;  %v724_v11 = vunpack.c.1.s8 %v3923_v5 }
 0x18d   : > { %2253 = vst [vmem:[%s2724_s17 + $0xe18] sm:$0xff] %v1741_v13  ;;  %2254 = vst [vmem:[%s2724_s17 + $0xe20] sm:$0xff] %v1742_v3  ;;  %v1745_v49 = vcvt.s32.f32 %v1233_v31  ;;  %v725_v0 = vunpack.c.1.s8 %v3930_v10  ;;  %v726_v16 = vunpack.c.1.s8 %v3933_v50  ;;  %v727_v39 = vunpack.c.1.s8 %v3936_v8  ;;  %v4004_v31 = vld [vmem:[%s2683_s30 + $0x3c8] sm:$0xff] }
 0x18e   : > { %2255 = vst [vmem:[%s2724_s17 + $0xe28] sm:$0xff] %v1743_v43  ;;  %2256 = vst [vmem:[%s2724_s17 + $0xe30] sm:$0xff] %v1744_v22  ;;  %v1746_v52 = vcvt.s32.f32 %v1234_v4  ;;  %v1747_v33 = vcvt.s32.f32 %v1235_v34  ;;  %v1236_v20 = vand.u32 255, %v724_v11  ;;  %v728_v54 = vunpack.c.1.s8 %v3939_v19  ;;  %v4001_v43 = vld [vmem:[%s2683_s30 + $0x3c0] sm:$0xff] }
 0x18f   : > { %2257 = vst [vmem:[%s2724_s17 + $0xe38] sm:$0xff] %v1745_v49  ;;  %v1237_v21 = vand.u32 255, %v725_v0  ;;  %v1238_v45 = vand.u32 255, %v726_v16  ;;  %v1239_v59 = vand.u32 255, %v727_v39  ;;  %v729_v24 = vunpack.c.1.s8 %v3944_v14  ;;  %v4011_v49 = vld [vmem:[%s2683_s30 + $0x3d0] sm:$0xff] }
 0x190   : > { %2258 = vst [vmem:[%s2724_s17 + $0xe40] sm:$0xff] %v1746_v52  ;;  %2259 = vst [vmem:[%s2724_s17 + $0xe48] sm:$0xff] %v1747_v33  ;;  %v1748_v38 = vcvt.s32.f32 %v1236_v20  ;;  %v1240_v26 = vand.u32 255, %v728_v54  ;;  %v730_v25 = vunpack.c.2.s8 %v3913_v61  ;;  %v731_v51 = vunpack.c.2.s8 %v3916_v1  ;;  %v4018_v52 = vld [vmem:[%s2683_s30 + $0x3d8] sm:$0xff]  ;;  %v4021_v33 = vld [vmem:[%s2683_s30 + $0x3e0] sm:$0xff] }
 0x191   : > { %v1749_v28 = vcvt.s32.f32 %v1237_v21  ;;  %v1750_v29 = vcvt.s32.f32 %v1238_v45  ;;  %v1751_v9 = vcvt.s32.f32 %v1239_v59  ;;  %v1241_v55 = vand.u32 255, %v729_v24  ;;  %v4027_v59 = vld [vmem:[%s2683_s30 + $0x3f0] sm:$0xff] }
 0x192   : > { %2260 = vst [vmem:[%s2724_s17 + $0xe50] sm:$0xff] %v1748_v38  ;;  %v1752_v44 = vcvt.s32.f32 %v1240_v26  ;;  %v1242_v32 = vand.u32 255, %v730_v25  ;;  %v1243_v58 = vand.u32 255, %v731_v51  ;;  %v732_v35 = vunpack.c.2.s8 %v3923_v5  ;;  %v4032_v51 = vld [vmem:[%s2683_s30 + $0x3f8] sm:$0xff] }
 0x193   : > { %2261 = vst [vmem:[%s2724_s17 + $0xe58] sm:$0xff] %v1749_v28  ;;  %2262 = vst [vmem:[%s2724_s17 + $0xe60] sm:$0xff] %v1750_v29  ;;  %v1753_v36 = vcvt.s32.f32 %v1241_v55  ;;  %v733_v12 = vunpack.c.2.s8 %v3930_v10  ;;  %v734_v37 = vunpack.c.2.s8 %v3933_v50  ;;  %v735_v63 = vunpack.c.2.s8 %v3936_v8 }
 0x194   : > { %2263 = vst [vmem:[%s2724_s17 + $0xe68] sm:$0xff] %v1751_v9  ;;  %2264 = vst [vmem:[%s2724_s17 + $0xe70] sm:$0xff] %v1752_v44  ;;  %v1754_v40 = vcvt.s32.f32 %v1242_v32  ;;  %v1755_v57 = vcvt.s32.f32 %v1243_v58  ;;  %v1244_v42 = vand.u32 255, %v732_v35  ;;  %v736_v41 = vunpack.c.2.s8 %v3939_v19 }
 0x195   : > { %2265 = vst [vmem:[%s2724_s17 + $0xe78] sm:$0xff] %v1753_v36  ;;  %v1245_v46 = vand.u32 255, %v733_v12  ;;  %v1246_v47 = vand.u32 255, %v734_v37  ;;  %v1247_v27 = vand.u32 255, %v735_v63  ;;  %v737_v15 = vunpack.c.2.s8 %v3944_v14 }
 0x196   : > { %2266 = vst [vmem:[%s2724_s17 + $0xe80] sm:$0xff] %v1754_v40  ;;  %2267 = vst [vmem:[%s2724_s17 + $0xe88] sm:$0xff] %v1755_v57  ;;  %v1756_v62 = vcvt.s32.f32 %v1244_v42  ;;  %v1248_v48 = vand.u32 255, %v736_v41  ;;  %v738_v18 = vunpack.c.3.s8 %v3913_v61  ;;  %v739_v53 = vunpack.c.3.s8 %v3916_v1 }
 0x197   : > { %v1757_v2 = vcvt.s32.f32 %v1245_v46  ;;  %v1758_v30 = vcvt.s32.f32 %v1246_v47  ;;  %v1759_v56 = vcvt.s32.f32 %v1247_v27  ;;  %v1249_v23 = vand.u32 255, %v737_v15 }
 0x198   : > { %2268 = vst [vmem:[%s2724_s17 + $0xe90] sm:$0xff] %v1756_v62  ;;  %v1760_v6 = vcvt.s32.f32 %v1248_v48  ;;  %v1250_v17 = vand.u32 255, %v738_v18  ;;  %v1251_v60 = vand.u32 255, %v739_v53  ;;  %v740_v7 = vunpack.c.3.s8 %v3923_v5 }
 0x199   : > { %2269 = vst [vmem:[%s2724_s17 + $0xe98] sm:$0xff] %v1757_v2  ;;  %2270 = vst [vmem:[%s2724_s17 + $0xea0] sm:$0xff] %v1758_v30  ;;  %v1761_v61 = vcvt.s32.f32 %v1249_v23  ;;  %v741_v1 = vunpack.c.3.s8 %v3930_v10  ;;  %v742_v13 = vunpack.c.3.s8 %v3933_v50  ;;  %v743_v3 = vunpack.c.3.s8 %v3936_v8 }
 0x19a   : > { %2271 = vst [vmem:[%s2724_s17 + $0xea8] sm:$0xff] %v1759_v56  ;;  %2272 = vst [vmem:[%s2724_s17 + $0xeb0] sm:$0xff] %v1760_v6  ;;  %v1762_v22 = vcvt.s32.f32 %v1250_v17  ;;  %v1763_v5 = vcvt.s32.f32 %v1251_v60  ;;  %v1252_v4 = vand.u32 255, %v740_v7  ;;  %v744_v34 = vunpack.c.3.s8 %v3939_v19 }
 0x19b   : > { %2273 = vst [vmem:[%s2724_s17 + $0xeb8] sm:$0xff] %v1761_v61  ;;  %v1253_v10 = vand.u32 255, %v741_v1  ;;  %v1254_v11 = vand.u32 255, %v742_v13  ;;  %v1255_v50 = vand.u32 255, %v743_v3  ;;  %v745_v8 = vunpack.c.3.s8 %v3944_v14  ;;  %v4024_v14 = vld [vmem:[%s2683_s30 + $0x3e8] sm:$0xff] }
 0x19c   : > { %2274 = vst [vmem:[%s2724_s17 + $0xec0] sm:$0xff] %v1762_v22  ;;  %2275 = vst [vmem:[%s2724_s17 + $0xec8] sm:$0xff] %v1763_v5  ;;  %v1764_v0 = vcvt.s32.f32 %v1252_v4  ;;  %v1256_v16 = vand.u32 255, %v744_v34  ;;  %v746_v39 = vunpack.c.0.s8 %v4001_v43  ;;  %v747_v19 = vunpack.c.0.s8 %v4004_v31 }
 0x19d   : > { %v1765_v20 = vcvt.s32.f32 %v1253_v10  ;;  %v1766_v54 = vcvt.s32.f32 %v1254_v11  ;;  %v1767_v21 = vcvt.s32.f32 %v1255_v50  ;;  %v1257_v45 = vand.u32 255, %v745_v8 }
 0x19e   : > { %2276 = vst [vmem:[%s2724_s17 + $0xed0] sm:$0xff] %v1764_v0  ;;  %v1768_v24 = vcvt.s32.f32 %v1256_v16  ;;  %v1258_v38 = vand.u32 255, %v746_v39  ;;  %v1259_v26 = vand.u32 255, %v747_v19  ;;  %v748_v25 = vunpack.c.0.s8 %v4011_v49 }
 0x19f   : > { %2277 = vst [vmem:[%s2724_s17 + $0xed8] sm:$0xff] %v1765_v20  ;;  %2278 = vst [vmem:[%s2724_s17 + $0xee0] sm:$0xff] %v1766_v54  ;;  %v1769_v28 = vcvt.s32.f32 %v1257_v45  ;;  %v749_v29 = vunpack.c.0.s8 %v4018_v52  ;;  %v750_v9 = vunpack.c.0.s8 %v4021_v33  ;;  %v751_v55 = vunpack.c.0.s8 %v4024_v14 }
 0x1a0   : > { %2279 = vst [vmem:[%s2724_s17 + $0xee8] sm:$0xff] %v1767_v21  ;;  %2280 = vst [vmem:[%s2724_s17 + $0xef0] sm:$0xff] %v1768_v24  ;;  %v1770_v44 = vcvt.s32.f32 %v1258_v38  ;;  %v1771_v32 = vcvt.s32.f32 %v1259_v26  ;;  %v1260_v58 = vand.u32 255, %v748_v25  ;;  %v752_v35 = vunpack.c.0.s8 %v4027_v59 }
 0x1a1   : > { %2281 = vst [vmem:[%s2724_s17 + $0xef8] sm:$0xff] %v1769_v28  ;;  %v1261_v36 = vand.u32 255, %v749_v29  ;;  %v1262_v12 = vand.u32 255, %v750_v9  ;;  %v1263_v37 = vand.u32 255, %v751_v55  ;;  %v753_v63 = vunpack.c.0.s8 %v4032_v51 }
 0x1a2   : > { %2282 = vst [vmem:[%s2724_s17 + $0xf00] sm:$0xff] %v1770_v44  ;;  %2283 = vst [vmem:[%s2724_s17 + $0xf08] sm:$0xff] %v1771_v32  ;;  %v1772_v40 = vcvt.s32.f32 %v1260_v58  ;;  %v1264_v57 = vand.u32 255, %v752_v35  ;;  %v754_v42 = vunpack.c.1.s8 %v4001_v43  ;;  %v755_v41 = vunpack.c.1.s8 %v4004_v31 }
 0x1a3   : > { %v1773_v46 = vcvt.s32.f32 %v1261_v36  ;;  %v1774_v47 = vcvt.s32.f32 %v1262_v12  ;;  %v1775_v27 = vcvt.s32.f32 %v1263_v37  ;;  %v1265_v15 = vand.u32 255, %v753_v63 }
 0x1a4   : > { %2284 = vst [vmem:[%s2724_s17 + $0xf10] sm:$0xff] %v1772_v40  ;;  %v1776_v62 = vcvt.s32.f32 %v1264_v57  ;;  %v1266_v48 = vand.u32 255, %v754_v42  ;;  %v1267_v18 = vand.u32 255, %v755_v41  ;;  %v756_v53 = vunpack.c.1.s8 %v4011_v49 }
 0x1a5   : > { %2285 = vst [vmem:[%s2724_s17 + $0xf18] sm:$0xff] %v1773_v46  ;;  %2286 = vst [vmem:[%s2724_s17 + $0xf20] sm:$0xff] %v1774_v47  ;;  %v1777_v2 = vcvt.s32.f32 %v1265_v15  ;;  %v757_v30 = vunpack.c.1.s8 %v4018_v52  ;;  %v758_v56 = vunpack.c.1.s8 %v4021_v33  ;;  %v759_v23 = vunpack.c.1.s8 %v4024_v14 }
 0x1a6   : > { %2287 = vst [vmem:[%s2724_s17 + $0xf28] sm:$0xff] %v1775_v27  ;;  %2288 = vst [vmem:[%s2724_s17 + $0xf30] sm:$0xff] %v1776_v62  ;;  %v1778_v6 = vcvt.s32.f32 %v1266_v48  ;;  %v1779_v17 = vcvt.s32.f32 %v1267_v18  ;;  %v1268_v60 = vand.u32 255, %v756_v53  ;;  %v760_v7 = vunpack.c.1.s8 %v4027_v59 }
 0x1a7   : > { %2289 = vst [vmem:[%s2724_s17 + $0xf38] sm:$0xff] %v1777_v2  ;;  %v1269_v61 = vand.u32 255, %v757_v30  ;;  %v1270_v1 = vand.u32 255, %v758_v56  ;;  %v1271_v13 = vand.u32 255, %v759_v23  ;;  %v761_v3 = vunpack.c.1.s8 %v4032_v51 }
 0x1a8   : > { %2290 = vst [vmem:[%s2724_s17 + $0xf40] sm:$0xff] %v1778_v6  ;;  %2291 = vst [vmem:[%s2724_s17 + $0xf48] sm:$0xff] %v1779_v17  ;;  %v1780_v22 = vcvt.s32.f32 %v1268_v60  ;;  %v1272_v5 = vand.u32 255, %v760_v7  ;;  %v762_v4 = vunpack.c.2.s8 %v4001_v43  ;;  %v763_v34 = vunpack.c.2.s8 %v4004_v31 }
 0x1a9   : > { %v1781_v10 = vcvt.s32.f32 %v1269_v61  ;;  %v1782_v11 = vcvt.s32.f32 %v1270_v1  ;;  %v1783_v50 = vcvt.s32.f32 %v1271_v13  ;;  %v1273_v8 = vand.u32 255, %v761_v3 }
 0x1aa   : > { %2292 = vst [vmem:[%s2724_s17 + $0xf50] sm:$0xff] %v1780_v22  ;;  %v1784_v0 = vcvt.s32.f32 %v1272_v5  ;;  %v1274_v16 = vand.u32 255, %v762_v4  ;;  %v1275_v39 = vand.u32 255, %v763_v34  ;;  %v764_v19 = vunpack.c.2.s8 %v4011_v49 }
 0x1ab   : > { %2293 = vst [vmem:[%s2724_s17 + $0xf58] sm:$0xff] %v1781_v10  ;;  %2294 = vst [vmem:[%s2724_s17 + $0xf60] sm:$0xff] %v1782_v11  ;;  %v1785_v20 = vcvt.s32.f32 %v1273_v8  ;;  %v765_v54 = vunpack.c.2.s8 %v4018_v52  ;;  %v766_v21 = vunpack.c.2.s8 %v4021_v33  ;;  %v767_v45 = vunpack.c.2.s8 %v4024_v14 }
 0x1ac   : > { %2295 = vst [vmem:[%s2724_s17 + $0xf68] sm:$0xff] %v1783_v50  ;;  %2296 = vst [vmem:[%s2724_s17 + $0xf70] sm:$0xff] %v1784_v0  ;;  %v1786_v24 = vcvt.s32.f32 %v1274_v16  ;;  %v1787_v38 = vcvt.s32.f32 %v1275_v39  ;;  %v1276_v26 = vand.u32 255, %v764_v19  ;;  %v768_v25 = vunpack.c.2.s8 %v4027_v59 }
 0x1ad   : > { %2297 = vst [vmem:[%s2724_s17 + $0xf78] sm:$0xff] %v1785_v20  ;;  %v1277_v28 = vand.u32 255, %v765_v54  ;;  %v1278_v29 = vand.u32 255, %v766_v21  ;;  %v1279_v9 = vand.u32 255, %v767_v45  ;;  %v769_v55 = vunpack.c.2.s8 %v4032_v51 }
 0x1ae   : > { %2298 = vst [vmem:[%s2724_s17 + $0xf80] sm:$0xff] %v1786_v24  ;;  %2299 = vst [vmem:[%s2724_s17 + $0xf88] sm:$0xff] %v1787_v38  ;;  %v1788_v44 = vcvt.s32.f32 %v1276_v26  ;;  %v1280_v32 = vand.u32 255, %v768_v25  ;;  %v770_v58 = vunpack.c.3.s8 %v4001_v43  ;;  %v771_v35 = vunpack.c.3.s8 %v4004_v31 }
 0x1af   : > { %v1789_v36 = vcvt.s32.f32 %v1277_v28  ;;  %v1790_v12 = vcvt.s32.f32 %v1278_v29  ;;  %v1791_v37 = vcvt.s32.f32 %v1279_v9  ;;  %v1281_v63 = vand.u32 255, %v769_v55 }
 0x1b0   : > { %2300 = vst [vmem:[%s2724_s17 + $0xf90] sm:$0xff] %v1788_v44  ;;  %v1792_v40 = vcvt.s32.f32 %v1280_v32  ;;  %v1282_v57 = vand.u32 255, %v770_v58  ;;  %v1283_v42 = vand.u32 255, %v771_v35  ;;  %v772_v41 = vunpack.c.3.s8 %v4011_v49 }
 0x1b1   : > { %2301 = vst [vmem:[%s2724_s17 + $0xf98] sm:$0xff] %v1789_v36  ;;  %2302 = vst [vmem:[%s2724_s17 + $0xfa0] sm:$0xff] %v1790_v12  ;;  %v1793_v43 = vcvt.s32.f32 %v1281_v63  ;;  %v773_v31 = vunpack.c.3.s8 %v4018_v52  ;;  %v774_v46 = vunpack.c.3.s8 %v4021_v33  ;;  %v775_v47 = vunpack.c.3.s8 %v4024_v14 }
 0x1b2   : > { %2303 = vst [vmem:[%s2724_s17 + $0xfa8] sm:$0xff] %v1791_v37  ;;  %2304 = vst [vmem:[%s2724_s17 + $0xfb0] sm:$0xff] %v1792_v40  ;;  %v1794_v27 = vcvt.s32.f32 %v1282_v57  ;;  %v1795_v15 = vcvt.s32.f32 %v1283_v42  ;;  %v1284_v62 = vand.u32 255, %v772_v41  ;;  %v776_v49 = vunpack.c.3.s8 %v4027_v59 }
 0x1b3   : > { %2305 = vst [vmem:[%s2724_s17 + $0xfb8] sm:$0xff] %v1793_v43  ;;  %v1285_v48 = vand.u32 255, %v773_v31  ;;  %v1286_v18 = vand.u32 255, %v774_v46  ;;  %v1287_v53 = vand.u32 255, %v775_v47  ;;  %v777_v2 = vunpack.c.3.s8 %v4032_v51 }
 0x1b4   : > { %2306 = vst [vmem:[%s2724_s17 + $0xfc0] sm:$0xff] %v1794_v27  ;;  %2307 = vst [vmem:[%s2724_s17 + $0xfc8] sm:$0xff] %v1795_v15  ;;  %v1796_v52 = vcvt.s32.f32 %v1284_v62  ;;  %v1288_v33 = vand.u32 255, %v776_v49 }
 0x1b5   : > { %v1797_v14 = vcvt.s32.f32 %v1285_v48  ;;  %v1798_v59 = vcvt.s32.f32 %v1286_v18  ;;  %v1799_v30 = vcvt.s32.f32 %v1287_v53  ;;  %v1289_v56 = vand.u32 255, %v777_v2 }
 0x1b6   : > { %2308 = vst [vmem:[%s2724_s17 + $0xfd0] sm:$0xff] %v1796_v52  ;;  %v1800_v23 = vcvt.s32.f32 %v1288_v33 }
 0x1b7   : > { %2309 = vst [vmem:[%s2724_s17 + $0xfd8] sm:$0xff] %v1797_v14  ;;  %2310 = vst [vmem:[%s2724_s17 + $0xfe0] sm:$0xff] %v1798_v59  ;;  %v1801_v51 = vcvt.s32.f32 %v1289_v56 }
 0x1b8   : > { %2311 = vst [vmem:[%s2724_s17 + $0xfe8] sm:$0xff] %v1799_v30  ;;  %2312 = vst [vmem:[%s2724_s17 + $0xff0] sm:$0xff] %v1800_v23 }
 0x1b9   : > { %2313 = vst [vmem:[%s2724_s17 + $0xff8] sm:$0xff] %v1801_v51 }
 0x1ba   : > { %2513 = shalt.err (!%p2510_p10)
}
 0x1bb   : > { %s2514_s14 = scalar_lea.hbm %s4100_s10, 65536  ;;  %s2518_s21 = scalar_lea.hbm %s4151_s1, 131072 }
 0x1bc   : > { %p2515_p0 = scmp.ne.s32.totalorder %s4100_s10, %s2514_s14  ;;  %p2519_p1 = scmp.lt.s32.totalorder %s4100_s10, %s4151_s1 }
 0x1bd   : > { %p2520_p3 = scmp.lt.s32.totalorder %s2518_s21, %s2514_s14 }
 0x1be   : > { %p2516_p2 = pnand %p2515_p0, %p4160_p12 }
 0x1bf   : > { %p2521_p6 = por %p2520_p3, %p2519_p1 }
 0x1c0   : > { %p2517_p9 = pneg %p2516_p2 }
 0x1c2   : > { %p2522_p11 = pnand %p2521_p6, %p2517_p9 }
 0x1c4   : > { %2525 = shalt.err (!%p2522_p11)
}
 0x1c5   : > { %s2570_s26 = smov 1024   ;;  %s2571_s30 = smov 64  }
 0x1c6   : > { %2424 = dma.vmem_to_hbm [thread:$0]  (%p4160_p12), %s4102_s28, 65536, %s4100_s10, %s2315_s3, %s2570_s26, %s2570_s26, %s2571_s30  }
 0x1c7 PF: > { %s2344_s25 = sand.u32 1, %s2552_s6   ;;  %p4161_p13 = scmp.ne.s32.totalorder %s4157_s19, 0 }
 0x1c8   : > { %p4162_p4 = scmp.ge.s32.totalorder %s2564_s9, 2  ;;  %s2345_s17 = scalar_lea.sflag [#allocation4], %s2344_s25 }
 0x1ca   : > { %p2431_p5 = pnand %p4162_p4, %p4161_p13 }
 0x1cc   : > { %p2432_p7 = pneg %p2431_p5 }
 0x1ce   : > { %2547 = dma.done.wait (%p2432_p7), %s2345_s17, 65536  }
 0x1cf   : > { %2549 = vsyncadd (%p2432_p7), %s2345_s17, 4294901760  ;;  %p14_p8 = scmp.ge.s32.totalorder %s2607_s12, 4   ;;  %s4163_s6 = smov %s2556_s7 }
 0x1d0   : > { %s4164_s7 = smov %s2560_s8  ;;  %s4165_s8 = smov %s2619_s15 }
 0x1d1   : > { %s4166_s9 = smov %s2607_s12  ;;  %16 = sbr.rel (!%p14_p8) target bundleno = 5 (0x5), region = 69 }
 0x1d6   :  { %2350 = vsyncpa [#allocation3], 1 }
 0x1d7   :  { %2352 = vsyncpa [#allocation3 + $0x1], 1 }
 0x1d8   :  { %2353 = vsyncpa [#allocation4], 1 }
 0x1d9   :  { %2355 = vsyncpa [#allocation4 + $0x1], 1 }

</bundles_post_ra>
